<compile_context>
chip_gen: v7x
topology: tpu7x:2x2x1
jax: 0.10.0
libtpu: 0.0.40
codegen_flags: <defaults>
</compile_context>

<pallas_src>
import functools

import jax
import jax.numpy as jnp
from jax.experimental import pallas as pl
from jax.experimental.pallas import tpu as pltpu


_LANES = 128          # lane-dense padding for the class/output dimension
_MXU_K = 256          # contraction-dim alignment for v6e/v7x MXU
_BF16_SUBLANE = 16    # bf16 sublane packing (rows per vreg)
_MAX_TM = 128         # cap on the batch-row tile


def _round_up(x, m):
    return ((x + m - 1) // m) * m


def _mlp_kernel(pooled_ref, w0_ref, b0_ref, w1_ref, b1_ref, w2_ref, b2_ref,
                out_ref):
    """Fused forward for one batch-row tile.  All weights are VMEM-resident."""
    # Synthetic base_model projection: [TM, Cp] @ [Cp, 2048] -> f32 acc.
    feat = jnp.dot(pooled_ref[...], w0_ref[...],
                   preferred_element_type=jnp.float32) + b0_ref[...]
    # classifier[0] Linear(2048, 512) + classifier[1] ReLU (f32 acc).
    h = jnp.maximum(
        jnp.dot(feat.astype(w1_ref.dtype), w1_ref[...],
                preferred_element_type=jnp.float32) + b1_ref[...], 0.0)
    # classifier[2] Dropout(0.5): eval/inference identity.
    # TODO(synk): training-mode dropout (pltpu.prng_* mask) not implemented.
    # classifier[3] Linear(512, num_classes), padded to 128 output lanes.
    out_ref[...] = jnp.dot(h.astype(w2_ref.dtype), w2_ref[...],
                           preferred_element_type=jnp.float32) + b2_ref[...]


@functools.partial(jax.jit, static_argnames=("num_classes",))
def glomeruli_classifier(x, params, num_classes=2):
    """x: [B, C, H, W] float32 (NCHW). Returns logits [B, num_classes]."""
    w0, b0, w1, b1, w2, b2 = params          # pre-padded / pre-cast in init_params
    B, C = x.shape[0], x.shape[1]
    Cp, F = w0.shape                         # Cp = C rounded up to 256
    H = w1.shape[1]
    ncp = w2.shape[1]                        # num_classes rounded up to 128

    # base_model glue: global average pool over spatial dims.
    pooled = jnp.mean(x, axis=(2, 3)).astype(jnp.bfloat16)      # [B, C]

    # Right-size the batch-row tile.
    if B >= _MAX_TM:
        tm = _MAX_TM
    else:
        tm = max(_BF16_SUBLANE, _round_up(B, _BF16_SUBLANE))
    m_pad = _round_up(B, tm)

    # Single pad op: batch rows to the tile multiple, channels to MXU width.
    pooled_p = jnp.pad(pooled, ((0, m_pad - B), (0, Cp - C)))

    def _rows(m):          # pooled / logits: m-th row tile
        return (m, 0)

    def _const(m):         # resident weights: always block (0, 0)
        return (0, 0)

    resident = pl.Buffered(1)   # constant blocks never need a second buffer

    out = pl.pallas_call(
        _mlp_kernel,
        out_shape=jax.ShapeDtypeStruct((m_pad, ncp), jnp.float32),
        grid_spec=pltpu.PrefetchScalarGridSpec(
            num_scalar_prefetch=0,
            grid=(m_pad // tm,),
            in_specs=[
                pl.BlockSpec((tm, Cp), _rows),                              # pooled rows
                pl.BlockSpec((Cp, F), _const, pipeline_mode=resident),      # w0
                pl.BlockSpec((1, F), _const, pipeline_mode=resident),       # b0
                pl.BlockSpec((F, H), _const, pipeline_mode=resident),       # w1
                pl.BlockSpec((1, H), _const, pipeline_mode=resident),       # b1
                pl.BlockSpec((H, ncp), _const, pipeline_mode=resident),     # w2
                pl.BlockSpec((1, ncp), _const, pipeline_mode=resident),     # b2
            ],
            out_specs=pl.BlockSpec((tm, ncp), _rows),
        ),
        compiler_params=pltpu.CompilerParams(
            dimension_semantics=("parallel",),
            vmem_limit_bytes=32 * 1024 * 1024,
        ),
    )(pooled_p, w0, b0, w1, b1, w2, b2)

    return out[:B, :num_classes]


def init_params(key, in_channels, num_features=2048, hidden=512, num_classes=2):
    """PyTorch-Linear-style uniform(-1/sqrt(fan_in), +) init.

    Weights stored bf16, biases f32.  The backbone-channel dim is zero-padded
    to a 256 multiple (MXU contraction alignment) and the class dim to 128
    lanes, so no weight padding happens inside the jitted forward.
    """
    ks = jax.random.split(key, 6)

    def lin(kw, kb, fan_in, fan_out, pad_in=None, pad_out=None):
        bound = 1.0 / jnp.sqrt(jnp.float32(fan_in))
        w = jax.random.uniform(kw, (fan_in, fan_out), jnp.float32, -bound, bound)
        b = jax.random.uniform(kb, (1, fan_out), jnp.float32, -bound, bound)
        if pad_in is not None and pad_in > fan_in:
            w = jnp.pad(w, ((0, pad_in - fan_in), (0, 0)))
        if pad_out is not None and pad_out > fan_out:
            w = jnp.pad(w, ((0, 0), (0, pad_out - fan_out)))
            b = jnp.pad(b, ((0, 0), (0, pad_out - fan_out)))
        return w.astype(jnp.bfloat16), b

    c_pad = _round_up(in_channels, _MXU_K)
    nc_pad = _round_up(num_classes, _LANES)
    w0, b0 = lin(ks[0], ks[1], in_channels, num_features, pad_in=c_pad)   # synthetic base_model proj
    w1, b1 = lin(ks[2], ks[3], num_features, hidden)                      # classifier Linear(2048, 512)
    w2, b2 = lin(ks[4], ks[5], hidden, num_classes, pad_out=nc_pad)       # classifier Linear(512, 2)
    return (w0, b0, w1, b1, w2, b2)


def _reference(x, params, num_classes=2):
    """Pure-JAX reference using the same bf16 weights + f32 accumulation."""
    w0, b0, w1, b1, w2, b2 = params
    C = x.shape[1]
    pooled = jnp.mean(x, axis=(2, 3)).astype(jnp.bfloat16)
    feat = jnp.dot(pooled, w0[:C], preferred_element_type=jnp.float32) + b0
    h = jnp.maximum(
        jnp.dot(feat.astype(jnp.bfloat16), w1,
                preferred_element_type=jnp.float32) + b1, 0.0)
    out = jnp.dot(h.astype(jnp.bfloat16), w2,
                  preferred_element_type=jnp.float32) + b2
    return out[:, :num_classes]


if __name__ == "__main__":
    key = jax.random.PRNGKey(0)
    k_x, k_p = jax.random.split(key)

    B, C, H, W = 2, 4, 16, 16
    x = jax.random.normal(k_x, (B, C, H, W), dtype=jnp.float32)
    params = init_params(k_p, in_channels=C, num_features=2048, hidden=512,
                         num_classes=2)

    logits = jax.block_until_ready(glomeruli_classifier(x, params, num_classes=2))
    ref = jax.block_until_ready(_reference(x, params, num_classes=2))

    assert logits.shape == (B, 2)
    assert jnp.allclose(logits, ref, atol=1e-2, rtol=1e-2), "mismatch vs JAX reference"

    print("KERNEL_OK")
</pallas_src>

<mosaic_0001>
module attributes {stable_mosaic.version = 11 : i64} {
  func.func @_mlp_kernel(%arg0: i32, %arg1: memref<16x256xbf16, #tpu.memory_space<vmem>>, %arg2: memref<256x2048xbf16, #tpu.memory_space<vmem>>, %arg3: memref<1x2048xf32, #tpu.memory_space<vmem>>, %arg4: memref<2048x512xbf16, #tpu.memory_space<vmem>>, %arg5: memref<1x512xf32, #tpu.memory_space<vmem>>, %arg6: memref<512x128xbf16, #tpu.memory_space<vmem>>, %arg7: memref<1x128xf32, #tpu.memory_space<vmem>>, %arg8: memref<16x128xf32, #tpu.memory_space<vmem>>) attributes {dimension_semantics = [#tpu.dimension_semantics<parallel>], iteration_bounds = array<i64: 1>, scalar_prefetch = 0 : i64, scratch_operands = 0 : i64, tpu.core_type = #tpu.core_type<tc>, window_params = [{transform_indices = @transform_0, window_bounds = array<i64: 16, 256>}, {pipeline_mode = #tpu.pipeline_mode<synchronous>, transform_indices = @transform_1, window_bounds = array<i64: 256, 2048>}, {pipeline_mode = #tpu.pipeline_mode<synchronous>, transform_indices = @transform_2, window_bounds = array<i64: 1, 2048>}, {pipeline_mode = #tpu.pipeline_mode<synchronous>, transform_indices = @transform_3, window_bounds = array<i64: 2048, 512>}, {pipeline_mode = #tpu.pipeline_mode<synchronous>, transform_indices = @transform_4, window_bounds = array<i64: 1, 512>}, {pipeline_mode = #tpu.pipeline_mode<synchronous>, transform_indices = @transform_5, window_bounds = array<i64: 512, 128>}, {pipeline_mode = #tpu.pipeline_mode<synchronous>, transform_indices = @transform_6, window_bounds = array<i64: 1, 128>}, {transform_indices = @transform_7, window_bounds = array<i64: 16, 128>}]} {
    %c0 = arith.constant 0 : index
    %c0_0 = arith.constant 0 : index
    %0 = vector.load %arg1[%c0, %c0_0] : memref<16x256xbf16, #tpu.memory_space<vmem>>, vector<16x256xbf16>
    %c0_1 = arith.constant 0 : index
    %c0_2 = arith.constant 0 : index
    %1 = vector.load %arg2[%c0_1, %c0_2] : memref<256x2048xbf16, #tpu.memory_space<vmem>>, vector<256x2048xbf16>
    %cst = arith.constant dense<0.000000e+00> : vector<16x2048xf32>
    %2 = tpu.matmul %0, %1, %cst {dimension_numbers = #tpu.dot_dimension_numbers<[1], [0], [0], [1], [0, 0, 1, 1], [], []>} : vector<16x256xbf16>, vector<256x2048xbf16>, vector<16x2048xf32> -> vector<16x2048xf32>
    %c0_3 = arith.constant 0 : index
    %c0_4 = arith.constant 0 : index
    %3 = vector.load %arg3[%c0_3, %c0_4] : memref<1x2048xf32, #tpu.memory_space<vmem>>, vector<1x2048xf32>
    %4 = vector.broadcast %3 : vector<1x2048xf32> to vector<16x2048xf32>
    %5 = arith.addf %2, %4 : vector<16x2048xf32>
    %6 = arith.truncf %5 : vector<16x2048xf32> to vector<16x2048xbf16>
    %c0_5 = arith.constant 0 : index
    %c0_6 = arith.constant 0 : index
    %7 = vector.load %arg4[%c0_5, %c0_6] : memref<2048x512xbf16, #tpu.memory_space<vmem>>, vector<2048x512xbf16>
    %cst_7 = arith.constant dense<0.000000e+00> : vector<16x512xf32>
    %8 = tpu.matmul %6, %7, %cst_7 {dimension_numbers = #tpu.dot_dimension_numbers<[1], [0], [0], [1], [0, 0, 1, 1], [], []>} : vector<16x2048xbf16>, vector<2048x512xbf16>, vector<16x512xf32> -> vector<16x512xf32>
    %c0_8 = arith.constant 0 : index
    %c0_9 = arith.constant 0 : index
    %9 = vector.load %arg5[%c0_8, %c0_9] : memref<1x512xf32, #tpu.memory_space<vmem>>, vector<1x512xf32>
    %10 = vector.broadcast %9 : vector<1x512xf32> to vector<16x512xf32>
    %11 = arith.addf %8, %10 : vector<16x512xf32>
    %cst_10 = arith.constant 0.000000e+00 : f32
    %12 = vector.broadcast %cst_10 : f32 to vector<16x512xf32>
    %13 = arith.maximumf %11, %12 : vector<16x512xf32>
    %14 = arith.truncf %13 : vector<16x512xf32> to vector<16x512xbf16>
    %c0_11 = arith.constant 0 : index
    %c0_12 = arith.constant 0 : index
    %15 = vector.load %arg6[%c0_11, %c0_12] : memref<512x128xbf16, #tpu.memory_space<vmem>>, vector<512x128xbf16>
    %cst_13 = arith.constant dense<0.000000e+00> : vector<16x128xf32>
    %16 = tpu.matmul %14, %15, %cst_13 {dimension_numbers = #tpu.dot_dimension_numbers<[1], [0], [0], [1], [0, 0, 1, 1], [], []>} : vector<16x512xbf16>, vector<512x128xbf16>, vector<16x128xf32> -> vector<16x128xf32>
    %c0_14 = arith.constant 0 : index
    %c0_15 = arith.constant 0 : index
    %17 = vector.load %arg7[%c0_14, %c0_15] : memref<1x128xf32, #tpu.memory_space<vmem>>, vector<1x128xf32>
    %18 = vector.broadcast %17 : vector<1x128xf32> to vector<16x128xf32>
    %19 = arith.addf %16, %18 : vector<16x128xf32>
    %c0_16 = arith.constant 0 : index
    %c0_17 = arith.constant 0 : index
    %20 = vector.load %arg8[%c0_16, %c0_17] : memref<16x128xf32, #tpu.memory_space<vmem>>, vector<16x128xf32>
    tpu.vector_store %arg8[%c0_16, %c0_17], %19 {strides = array<i32>} : memref<16x128xf32, #tpu.memory_space<vmem>>, vector<16x128xf32>,
    return
  }
  func.func @transform_0(%arg0: i32) -> (i32, i32) {
    %c0_i32 = arith.constant 0 : i32
    %c0_i32_0 = arith.constant 0 : i32
    return %arg0, %c0_i32 : i32, i32
  }
  func.func @transform_1(%arg0: i32) -> (i32, i32) {
    %c0_i32 = arith.constant 0 : i32
    %c0_i32_0 = arith.constant 0 : i32
    %c0_i32_1 = arith.constant 0 : i32
    return %c0_i32, %c0_i32_0 : i32, i32
  }
  func.func @transform_2(%arg0: i32) -> (i32, i32) {
    %c0_i32 = arith.constant 0 : i32
    %c0_i32_0 = arith.constant 0 : i32
    %c0_i32_1 = arith.constant 0 : i32
    return %c0_i32, %c0_i32_0 : i32, i32
  }
  func.func @transform_3(%arg0: i32) -> (i32, i32) {
    %c0_i32 = arith.constant 0 : i32
    %c0_i32_0 = arith.constant 0 : i32
    %c0_i32_1 = arith.constant 0 : i32
    return %c0_i32, %c0_i32_0 : i32, i32
  }
  func.func @transform_4(%arg0: i32) -> (i32, i32) {
    %c0_i32 = arith.constant 0 : i32
    %c0_i32_0 = arith.constant 0 : i32
    %c0_i32_1 = arith.constant 0 : i32
    return %c0_i32, %c0_i32_0 : i32, i32
  }
  func.func @transform_5(%arg0: i32) -> (i32, i32) {
    %c0_i32 = arith.constant 0 : i32
    %c0_i32_0 = arith.constant 0 : i32
    %c0_i32_1 = arith.constant 0 : i32
    return %c0_i32, %c0_i32_0 : i32, i32
  }
  func.func @transform_6(%arg0: i32) -> (i32, i32) {
    %c0_i32 = arith.constant 0 : i32
    %c0_i32_0 = arith.constant 0 : i32
    %c0_i32_1 = arith.constant 0 : i32
    return %c0_i32, %c0_i32_0 : i32, i32
  }
  func.func @transform_7(%arg0: i32) -> (i32, i32) {
    %c0_i32 = arith.constant 0 : i32
    %c0_i32_0 = arith.constant 0 : i32
    return %arg0, %c0_i32 : i32, i32
  }
}

</mosaic_0001>

<bundles_post_ra>
// kernel: glomeruli_classifier.1
= control target key start
LH: loop header
LB: loop body
LE: loop exit
PB: predicated region body
PF: predicated region fallthrough
CT: control target
= control target key end

     0   :  { %12 = vsyncpa [#allocation3], 0  ;;  %s8401_s0 = inlined_call_operand.vmem [shape: bf16[16,256], index: 0, kind: input, shape index: {}]   ;;  %s8402_s1 = inlined_call_operand.hbm [shape: bf16[256,2048], index: 1, kind: input, shape index: {}]   ;;  %s8403_s2 = inlined_call_operand.hbm [shape: f32[1,2048], index: 2, kind: input, shape index: {}]   ;;  %s8404_s3 = inlined_call_operand.hbm [shape: bf16[2048,512], index: 3, kind: input, shape index: {}]   ;;  %s8405_s4 = inlined_call_operand.hbm [shape: f32[1,512], index: 4, kind: input, shape index: {}]   ;;  %s8406_s5 = inlined_call_operand.hbm [shape: bf16[512,128], index: 5, kind: input, shape index: {}]   ;;  %s8407_s6 = inlined_call_operand.hbm [shape: f32[1,128], index: 6, kind: input, shape index: {}]   ;;  %s8408_s7 = inlined_call_operand.vmem [shape: f32[16,128], index: 7, kind: output, shape index: {}]  }
   0x1   :  { %13 = vsyncpa [#allocation5], 0 }
   0x2   :  { %14 = vsyncpa [#allocation8], 0 }
   0x3   :  { %15 = vsyncpa [#allocation11], 0  ;;  %s8111_s24 = smov [#allocation4]   ;;  %s8112_s26 = smov [#allocation7]  }
   0x4   :  { %s36_s25 = sshll.u32 %s8111_s24, 4  ;;  %s58_s27 = sshll.u32 %s8112_s26, 4  ;;  %s37_s25 = int_to_ptr.vmem [resolvable:$true] %s36_s25  ;;  %s59_s27 = int_to_ptr.vmem [resolvable:$true] %s58_s27 }
   0x5   :  { %s7971_s30 = scalar_lea.hbm %s8403_s2, 256 }
   0x6   :  { %p7972_p0 = scmp.ne.s32.totalorder %s8403_s2, %s7971_s30  ;;  %p7975_p1 = scmp.lt.u32.totalorder %s7971_s30, %s8403_s2 }
   0x8   :  { %p7977_p2 = pnand %p7975_p1, %p7972_p0 }
   0xa   :  { %7980 = shalt.err (!%p7977_p2)
}
   0xb   :  { %s7981_s12 = scalar_lea.vmem %s37_s25, 256  ;;  %p7986_p4 = scmp.lt.s32.totalorder %s37_s25, %s37_s25 }
   0xc   :  { %p7982_p3 = scmp.ne.s32.totalorder %s37_s25, %s7981_s12  ;;  %p7987_p5 = scmp.lt.s32.totalorder %s7981_s12, %s7981_s12 }
   0xe   :  { %p7988_p6 = por %p7987_p5, %p7986_p4 }
  0x10   :  { %p7989_p7 = pnand %p7988_p6, %p7982_p3 }
  0x12   :  { %7992 = shalt.err (!%p7989_p7)
}
  0x13   :  { %39 = dma.hbm_to_vmem [thread:$0]  %s8403_s2, 256, %s37_s25, [#allocation5]  }
  0x14   :  { %s7993_s17 = scalar_lea.hbm %s8405_s4, 64 }
  0x15   :  { %p7994_p8 = scmp.ne.s32.totalorder %s8405_s4, %s7993_s17  ;;  %p7997_p9 = scmp.lt.u32.totalorder %s7993_s17, %s8405_s4 }
  0x17   :  { %p7999_p10 = pnand %p7997_p9, %p7994_p8 }
  0x19   :  { %8002 = shalt.err (!%p7999_p10)
}
  0x1a   :  { %s8003_s22 = scalar_lea.vmem %s59_s27, 64  ;;  %p8008_p12 = scmp.lt.s32.totalorder %s59_s27, %s59_s27 }
  0x1b   :  { %p8004_p11 = scmp.ne.s32.totalorder %s59_s27, %s8003_s22  ;;  %p8009_p13 = scmp.lt.s32.totalorder %s8003_s22, %s8003_s22 }
  0x1d   :  { %p8010_p0 = por %p8009_p13, %p8008_p12 }
  0x1f   :  { %p8011_p1 = pnand %p8010_p0, %p8004_p11 }
  0x21   :  { %8014 = shalt.err (!%p8011_p1)
}
  0x22   :  { %61 = dma.hbm_to_vmem [thread:$0]  %s8405_s4, 64, %s59_s27, [#allocation8]  }
  0x23   :  { %s8113_s24 = smov [#allocation2]   ;;  %s8015_s29 = scalar_lea.hbm %s8402_s1, 32768 }
  0x24   :  { %s23_s25 = sshll.u32 %s8113_s24, 4  ;;  %p8016_p2 = scmp.ne.s32.totalorder %s8402_s1, %s8015_s29  ;;  %s24_s25 = int_to_ptr.vmem [resolvable:$true] %s23_s25 }
  0x25   :  { %p8019_p3 = scmp.lt.u32.totalorder %s8015_s29, %s8402_s1 }
  0x27   :  { %p8021_p4 = pnand %p8019_p3, %p8016_p2 }
  0x29   :  { %8024 = shalt.err (!%p8021_p4)
}
  0x2a   :  { %s8025_s11 = scalar_lea.vmem %s24_s25, 32768  ;;  %p8030_p6 = scmp.lt.s32.totalorder %s24_s25, %s24_s25 }
  0x2b   :  { %p8026_p5 = scmp.ne.s32.totalorder %s24_s25, %s8025_s11  ;;  %p8031_p7 = scmp.lt.s32.totalorder %s8025_s11, %s8025_s11 }
  0x2d   :  { %p8032_p8 = por %p8031_p7, %p8030_p6 }
  0x2f   :  { %p8033_p9 = pnand %p8032_p8, %p8026_p5 }
  0x31   :  { %8036 = shalt.err (!%p8033_p9)
}
  0x32   :  { %s8114_s4 = smov 1024   ;;  %s8115_s27 = smov 64  }
  0x33   :  { %29 = dma.hbm_to_vmem [thread:$0]  %s8402_s1, 32768, %s24_s25, [#allocation3], %s8114_s4, %s8114_s4, %s8115_s27  }
  0x34   :  { %s8116_s14 = smov [#allocation6]   ;;  %s8037_s18 = scalar_lea.hbm %s8404_s3, 65536 }
  0x35   :  { %s45_s15 = sshll.u32 %s8116_s14, 4  ;;  %p8038_p10 = scmp.ne.s32.totalorder %s8404_s3, %s8037_s18  ;;  %s46_s15 = int_to_ptr.vmem [resolvable:$true] %s45_s15 }
  0x36   :  { %p8041_p11 = scmp.lt.u32.totalorder %s8037_s18, %s8404_s3 }
  0x38   :  { %p8043_p12 = pnand %p8041_p11, %p8038_p10 }
  0x3a   :  { %8046 = shalt.err (!%p8043_p12)
}
  0x3b   :  { %s8047_s2 = scalar_lea.vmem %s46_s15, 65536  ;;  %p8052_p0 = scmp.lt.s32.totalorder %s46_s15, %s46_s15 }
  0x3c   :  { %p8048_p13 = scmp.ne.s32.totalorder %s46_s15, %s8047_s2  ;;  %p8053_p1 = scmp.lt.s32.totalorder %s8047_s2, %s8047_s2 }
  0x3e   :  { %p8054_p2 = por %p8053_p1, %p8052_p0 }
  0x40   :  { %p8055_p3 = pnand %p8054_p2, %p8048_p13 }
  0x42   :  { %8058 = shalt.err (!%p8055_p3)
}
  0x43   :  { %s8117_s1 = smov 256   ;;  %s8118_s23 = smov 16  }
  0x44   :  { %51 = dma.hbm_to_vmem [thread:$0]  %s8404_s3, 65536, %s46_s15, [#allocation5], %s8117_s1, %s8117_s1, %s8118_s23  }
  0x45   :  { %s8119_s26 = smov [#allocation9]   ;;  %s8120_s29 = smov [#allocation10]  }
  0x46   :  { %s67_s28 = sshll.u32 %s8119_s26, 4  ;;  %s80_s30 = sshll.u32 %s8120_s29, 4  ;;  %s68_s28 = int_to_ptr.vmem [resolvable:$true] %s67_s28  ;;  %s81_s30 = int_to_ptr.vmem [resolvable:$true] %s80_s30 }
  0x47   :  { %s8059_s10 = scalar_lea.hbm %s8406_s5, 4096 }
  0x48   :  { %p8060_p4 = scmp.ne.s32.totalorder %s8406_s5, %s8059_s10  ;;  %p8063_p5 = scmp.lt.u32.totalorder %s8059_s10, %s8406_s5 }
  0x4a   :  { %p8065_p6 = pnand %p8063_p5, %p8060_p4 }
  0x4c   :  { %8068 = shalt.err (!%p8065_p6)
}
  0x4d   :  { %s8069_s3 = scalar_lea.vmem %s68_s28, 4096  ;;  %p8074_p8 = scmp.lt.s32.totalorder %s68_s28, %s68_s28 }
  0x4e   :  { %p8070_p7 = scmp.ne.s32.totalorder %s68_s28, %s8069_s3  ;;  %p8075_p9 = scmp.lt.s32.totalorder %s8069_s3, %s8069_s3 }
  0x50   :  { %p8076_p10 = por %p8075_p9, %p8074_p8 }
  0x52   :  { %p8077_p11 = pnand %p8076_p10, %p8070_p7 }
  0x54   :  { %8080 = shalt.err (!%p8077_p11)
}
  0x55   :  { %s8121_s14 = smov 4   ;;  %s8081_s19 = scalar_lea.hbm %s8407_s6, 16 }
  0x56   :  { %73 = dma.hbm_to_vmem [thread:$0]  %s8406_s5, 4096, %s68_s28, [#allocation8], %s8115_s27, %s8115_s27, %s8121_s14  }
  0x57   :  { %p8082_p12 = scmp.ne.s32.totalorder %s8407_s6, %s8081_s19  ;;  %p8085_p13 = scmp.lt.u32.totalorder %s8081_s19, %s8407_s6 }
  0x59   :  { %p8087_p0 = pnand %p8085_p13, %p8082_p12 }
  0x5b   :  { %8090 = shalt.err (!%p8087_p0)
}
  0x5c   :  { %s8091_s1 = scalar_lea.vmem %s81_s30, 16  ;;  %s8095_s23 = scalar_lea.vmem %s81_s30, 32 }
  0x5d   :  { %p8092_p1 = scmp.ne.s32.totalorder %s81_s30, %s8091_s1  ;;  %p8096_p2 = scmp.lt.s32.totalorder %s81_s30, %s81_s30 }
  0x5e   :  { %p8097_p3 = scmp.lt.s32.totalorder %s8095_s23, %s8091_s1 }
  0x60   :  { %p8098_p4 = por %p8097_p3, %p8096_p2 }
  0x62   :  { %p8099_p5 = pnand %p8098_p4, %p8092_p1 }
  0x64   :  { %8102 = shalt.err (!%p8099_p5)
}
  0x65   :  { %83 = dma.hbm_to_vmem [thread:$0]  %s8407_s6, 16, %s81_s30, [#allocation11]  }
  0x66   :  { %8103 = dma.done.wait [#allocation3], 32768  }
  0x67   :  { %8104 = vsyncadd [#allocation3], 4294934528 }
  0x68   :  { %8105 = dma.done.wait [#allocation5], 65792  }
  0x69   :  { %8106 = vsyncadd [#allocation5], 4294901504 }
  0x6a   :  { %8107 = dma.done.wait [#allocation8], 4160  }
  0x6b   :  { %8108 = vsyncadd [#allocation8], 4294963136 }
  0x6c   :  { %8109 = dma.done.wait [#allocation11], 16  }
  0x6d   :  { %8110 = vsyncadd [#allocation11], 4294967280  ;;  %v105_v0 = vld [vmem:[#allocation2] sm:$0xff]  ;;  %v106_v2 = vld [vmem:[#allocation2 + $0x8] sm:$0xff] }
  0x6e   :  { %v113_v1 = vld [vmem:[#allocation2 + $0x40] sm:$0xff]  ;;  %v114_v4 = vld [vmem:[#allocation2 + $0x48] sm:$0xff] }
  0x6f   :  { %v6247_v3 = vcombine.high %v105_v0, %v113_v1  ;;  %v6246_v5 = vcombine.low %v105_v0, %v113_v1  ;;  %v121_v6 = vld [vmem:[#allocation2 + $0x80] sm:$0xff]  ;;  %v6249_v8 = vcombine.high %v106_v2, %v114_v4  ;;  %v6248_v9 = vcombine.low %v106_v2, %v114_v4  ;;  %v122_v11 = vld [vmem:[#allocation2 + $0x88] sm:$0xff] }
  0x70   :  { %v129_v7 = vld [vmem:[#allocation2 + $0xc0] sm:$0xff]  ;;  %v130_v12 = vld [vmem:[#allocation2 + $0xc8] sm:$0xff] }
  0x71   :  { %v6263_v10 = vcombine.high %v121_v6, %v129_v7  ;;  %v137_v13 = vld [vmem:[#allocation2 + $0x100] sm:$0xff]  ;;  %1735 = vmatprep.subr.bf16.mxu0 %v6247_v3  ;;  %v6265_v14 = vcombine.high %v122_v11, %v130_v12  ;;  %v138_v16 = vld [vmem:[#allocation2 + $0x108] sm:$0xff]  ;;  %1778 = vmatprep.subr.bf16.mxu1 %v6249_v8  ;;  %v6262_v18 = vcombine.low %v121_v6, %v129_v7 }
  0x72   :  { %v145_v15 = vld [vmem:[#allocation2 + $0x140] sm:$0xff]  ;;  %v146_v17 = vld [vmem:[#allocation2 + $0x148] sm:$0xff]  ;;  %1736 = vmatpush1.bf16.msra.mxu0 %v6246_v5  ;;  %1779 = vmatpush1.bf16.msra.mxu1 %v6248_v9  ;;  %v6264_v19 = vcombine.low %v122_v11, %v130_v12 }
  0x73   :  { %1737 = vmatprep.subr.bf16.mxu0 %v6263_v10  ;;  %v6279_v20 = vcombine.high %v137_v13, %v145_v15  ;;  %1780 = vmatprep.subr.bf16.mxu1 %v6265_v14  ;;  %v6281_v21 = vcombine.high %v138_v16, %v146_v17  ;;  %v153_v22 = vld [vmem:[#allocation2 + $0x180] sm:$0xff]  ;;  %v154_v24 = vld [vmem:[#allocation2 + $0x188] sm:$0xff]  ;;  %v6278_v26 = vcombine.low %v137_v13, %v145_v15 }
  0x74   :  { %v161_v23 = vld [vmem:[#allocation2 + $0x1c0] sm:$0xff]  ;;  %v162_v25 = vld [vmem:[#allocation2 + $0x1c8] sm:$0xff]  ;;  %v6280_v27 = vcombine.low %v138_v16, %v146_v17 }
  0x75   :  { %v6295_v28 = vcombine.high %v153_v22, %v161_v23  ;;  %v6297_v29 = vcombine.high %v154_v24, %v162_v25  ;;  %v169_v30 = vld [vmem:[#allocation2 + $0x200] sm:$0xff]  ;;  %v170_v32 = vld [vmem:[#allocation2 + $0x208] sm:$0xff]  ;;  %v6294_v34 = vcombine.low %v153_v22, %v161_v23  ;;  %v6296_v35 = vcombine.low %v154_v24, %v162_v25 }
  0x76   :  { %1738 = vmatpush1.bf16.msra.mxu0 %v6262_v18  ;;  %1781 = vmatpush1.bf16.msra.mxu1 %v6264_v19  ;;  %v177_v31 = vld [vmem:[#allocation2 + $0x240] sm:$0xff]  ;;  %v178_v33 = vld [vmem:[#allocation2 + $0x248] sm:$0xff] }
  0x77   :  { %1739 = vmatprep.subr.bf16.mxu0 %v6279_v20  ;;  %1782 = vmatprep.subr.bf16.mxu1 %v6281_v21  ;;  %v6311_v36 = vcombine.high %v169_v30, %v177_v31  ;;  %v6313_v37 = vcombine.high %v170_v32, %v178_v33  ;;  %v185_v38 = vld [vmem:[#allocation2 + $0x280] sm:$0xff]  ;;  %v186_v40 = vld [vmem:[#allocation2 + $0x288] sm:$0xff]  ;;  %v6310_v42 = vcombine.low %v169_v30, %v177_v31 }
  0x78   :  { %v193_v39 = vld [vmem:[#allocation2 + $0x2c0] sm:$0xff]  ;;  %v194_v41 = vld [vmem:[#allocation2 + $0x2c8] sm:$0xff]  ;;  %v6312_v43 = vcombine.low %v170_v32, %v178_v33 }
  0x79   :  { %v6327_v44 = vcombine.high %v185_v38, %v193_v39  ;;  %v6329_v45 = vcombine.high %v186_v40, %v194_v41  ;;  %v201_v46 = vld [vmem:[#allocation2 + $0x300] sm:$0xff]  ;;  %v202_v48 = vld [vmem:[#allocation2 + $0x308] sm:$0xff]  ;;  %v6326_v50 = vcombine.low %v185_v38, %v193_v39  ;;  %v6328_v51 = vcombine.low %v186_v40, %v194_v41 }
  0x7a   :  { %1740 = vmatpush1.bf16.msra.mxu0 %v6278_v26  ;;  %1783 = vmatpush1.bf16.msra.mxu1 %v6280_v27  ;;  %v209_v47 = vld [vmem:[#allocation2 + $0x340] sm:$0xff]  ;;  %v210_v49 = vld [vmem:[#allocation2 + $0x348] sm:$0xff] }
  0x7b   :  { %1741 = vmatprep.subr.bf16.mxu0 %v6295_v28  ;;  %1784 = vmatprep.subr.bf16.mxu1 %v6297_v29  ;;  %v6343_v52 = vcombine.high %v201_v46, %v209_v47  ;;  %v6345_v53 = vcombine.high %v202_v48, %v210_v49  ;;  %v217_v54 = vld [vmem:[#allocation2 + $0x380] sm:$0xff]  ;;  %v218_v57 = vld [vmem:[#allocation2 + $0x388] sm:$0xff]  ;;  %v6342_v59 = vcombine.low %v201_v46, %v209_v47 }
  0x7c   :  { %v225_v55 = vld [vmem:[#allocation2 + $0x3c0] sm:$0xff]  ;;  %v226_v58 = vld [vmem:[#allocation2 + $0x3c8] sm:$0xff]  ;;  %v6344_v60 = vcombine.low %v202_v48, %v210_v49 }
  0x7d   :  { %v8240_v56 = vld [vmem:[%s8401_s0 + $0x4] ss:$8 sps:$4 sm:$0xff]   ;;  %v6359_v61 = vcombine.high %v217_v54, %v225_v55  ;;  %v6361_v62 = vcombine.high %v218_v57, %v226_v58  ;;  %v6358_v3 = vcombine.low %v217_v54, %v225_v55  ;;  %v6360_v4 = vcombine.low %v218_v57, %v226_v58 }
  0x7e   :  { %1742 = vmatpush1.bf16.msra.mxu0 %v6294_v34  ;;  %1785 = vmatpush1.bf16.msra.mxu1 %v6296_v35  ;;  %v233_v63 = vld [vmem:[#allocation2 + $0x400] sm:$0xff]  ;;  %v234_v1 = vld [vmem:[#allocation2 + $0x408] sm:$0xff] }
  0x7f   :  { %1743 = vmatprep.subr.bf16.mxu0 %v6311_v36  ;;  %1786 = vmatprep.subr.bf16.mxu1 %v6313_v37  ;;  %v241_v0 = vld [vmem:[#allocation2 + $0x440] sm:$0xff]  ;;  %v242_v2 = vld [vmem:[#allocation2 + $0x448] sm:$0xff] }
  0x80   :  { %1767 = vmatprep.mubr.bf16.mxu0 %v8240_v56  ;;  %1810 = vmatprep.mubr.bf16.mxu1 %v8240_v56  ;;  %v6375_v5 = vcombine.high %v233_v63, %v241_v0  ;;  %v6377_v6 = vcombine.high %v234_v1, %v242_v2  ;;  %v249_v7 = vld [vmem:[#allocation2 + $0x480] sm:$0xff]  ;;  %v250_v9 = vld [vmem:[#allocation2 + $0x488] sm:$0xff]  ;;  %v6374_v11 = vcombine.low %v233_v63, %v241_v0  ;;  %v107_v0 = vld [vmem:[#allocation2 + $0x10] sm:$0xff] }
  0x81   :  { %v257_v8 = vld [vmem:[#allocation2 + $0x4c0] sm:$0xff]  ;;  %v258_v10 = vld [vmem:[#allocation2 + $0x4c8] sm:$0xff]  ;;  %v6376_v12 = vcombine.low %v234_v1, %v242_v2  ;;  %v115_v1 = vld [vmem:[#allocation2 + $0x50] sm:$0xff] }
  0x82   :  { %1744 = vmatpush1.bf16.msra.mxu0 %v6310_v42  ;;  %1787 = vmatpush1.bf16.msra.mxu1 %v6312_v43  ;;  %v6391_v13 = vcombine.high %v249_v7, %v257_v8  ;;  %v6393_v14 = vcombine.high %v250_v9, %v258_v10  ;;  %v265_v15 = vld [vmem:[#allocation2 + $0x500] sm:$0xff]  ;;  %v266_v17 = vld [vmem:[#allocation2 + $0x508] sm:$0xff]  ;;  %v6390_v19 = vcombine.low %v249_v7, %v257_v8  ;;  %v108_v2 = vld [vmem:[#allocation2 + $0x18] sm:$0xff] }
  0x83   :  { %1745 = vmatprep.subr.bf16.mxu0 %v6327_v44  ;;  %1788 = vmatprep.subr.bf16.mxu1 %v6329_v45  ;;  %v273_v16 = vld [vmem:[#allocation2 + $0x540] sm:$0xff]  ;;  %v274_v18 = vld [vmem:[#allocation2 + $0x548] sm:$0xff]  ;;  %v6392_v20 = vcombine.low %v250_v9, %v258_v10  ;;  %v123_v8 = vld [vmem:[#allocation2 + $0x90] sm:$0xff] }
  0x84   :  { %v6407_v21 = vcombine.high %v265_v15, %v273_v16  ;;  %v6409_v22 = vcombine.high %v266_v17, %v274_v18  ;;  %v281_v23 = vld [vmem:[#allocation2 + $0x580] sm:$0xff]  ;;  %v282_v25 = vld [vmem:[#allocation2 + $0x588] sm:$0xff]  ;;  %v6406_v27 = vcombine.low %v265_v15, %v273_v16  ;;  %v6408_v28 = vcombine.low %v266_v17, %v274_v18  ;;  %v131_v9 = vld [vmem:[#allocation2 + $0xd0] sm:$0xff] }
  0x85   :  { %v289_v24 = vld [vmem:[#allocation2 + $0x5c0] sm:$0xff]  ;;  %v290_v26 = vld [vmem:[#allocation2 + $0x5c8] sm:$0xff]  ;;  %v6267_v15 = vcombine.high %v123_v8, %v131_v9  ;;  %v139_v16 = vld [vmem:[#allocation2 + $0x110] sm:$0xff] }
  0x86   :  { %1746 = vmatpush1.bf16.msra.mxu0 %v6326_v50  ;;  %1789 = vmatpush1.bf16.msra.mxu1 %v6328_v51  ;;  %v6423_v29 = vcombine.high %v281_v23, %v289_v24  ;;  %v6425_v30 = vcombine.high %v282_v25, %v290_v26  ;;  %v297_v31 = vld [vmem:[#allocation2 + $0x600] sm:$0xff]  ;;  %v298_v33 = vld [vmem:[#allocation2 + $0x608] sm:$0xff]  ;;  %v6422_v35 = vcombine.low %v281_v23, %v289_v24  ;;  %v147_v17 = vld [vmem:[#allocation2 + $0x150] sm:$0xff] }
  0x87   :  { %1747 = vmatprep.subr.bf16.mxu0 %v6343_v52  ;;  %1790 = vmatprep.subr.bf16.mxu1 %v6345_v53  ;;  %v305_v32 = vld [vmem:[#allocation2 + $0x640] sm:$0xff]  ;;  %v306_v34 = vld [vmem:[#allocation2 + $0x648] sm:$0xff]  ;;  %v6424_v36 = vcombine.low %v282_v25, %v290_v26  ;;  %v6283_v23 = vcombine.high %v139_v16, %v147_v17  ;;  %v155_v24 = vld [vmem:[#allocation2 + $0x190] sm:$0xff] }
  0x88   :  { %v6439_v37 = vcombine.high %v297_v31, %v305_v32  ;;  %v6441_v38 = vcombine.high %v298_v33, %v306_v34  ;;  %v313_v39 = vld [vmem:[#allocation2 + $0x680] sm:$0xff]  ;;  %v314_v41 = vld [vmem:[#allocation2 + $0x688] sm:$0xff]  ;;  %v6438_v43 = vcombine.low %v297_v31, %v305_v32  ;;  %v6440_v44 = vcombine.low %v298_v33, %v306_v34  ;;  %v163_v25 = vld [vmem:[#allocation2 + $0x1d0] sm:$0xff] }
  0x89   :  { %v321_v40 = vld [vmem:[#allocation2 + $0x6c0] sm:$0xff]  ;;  %v322_v42 = vld [vmem:[#allocation2 + $0x6c8] sm:$0xff]  ;;  %v156_v26 = vld [vmem:[#allocation2 + $0x198] sm:$0xff]  ;;  %v6299_v31 = vcombine.high %v155_v24, %v163_v25 }
  0x8a   :  { %1748 = vmatpush1.bf16.msra.mxu0 %v6342_v59  ;;  %1791 = vmatpush1.bf16.msra.mxu1 %v6344_v60  ;;  %v6455_v45 = vcombine.high %v313_v39, %v321_v40  ;;  %v6457_v46 = vcombine.high %v314_v41, %v322_v42  ;;  %v329_v47 = vld [vmem:[#allocation2 + $0x700] sm:$0xff]  ;;  %v330_v49 = vld [vmem:[#allocation2 + $0x708] sm:$0xff]  ;;  %v6454_v51 = vcombine.low %v313_v39, %v321_v40  ;;  %v171_v32 = vld [vmem:[#allocation2 + $0x210] sm:$0xff] }
  0x8b   :  { %1749 = vmatprep.subr.bf16.mxu0 %v6359_v61  ;;  %1792 = vmatprep.subr.bf16.mxu1 %v6361_v62  ;;  %v337_v48 = vld [vmem:[#allocation2 + $0x740] sm:$0xff]  ;;  %v338_v50 = vld [vmem:[#allocation2 + $0x748] sm:$0xff]  ;;  %v6456_v52 = vcombine.low %v314_v41, %v322_v42  ;;  %v179_v33 = vld [vmem:[#allocation2 + $0x250] sm:$0xff] }
  0x8c   :  { %v6471_v53 = vcombine.high %v329_v47, %v337_v48  ;;  %v6473_v54 = vcombine.high %v330_v49, %v338_v50  ;;  %v345_v55 = vld [vmem:[#allocation2 + $0x780] sm:$0xff]  ;;  %v346_v58 = vld [vmem:[#allocation2 + $0x788] sm:$0xff]  ;;  %v6470_v60 = vcombine.low %v329_v47, %v337_v48  ;;  %v6472_v61 = vcombine.low %v330_v49, %v338_v50  ;;  %v172_v34 = vld [vmem:[#allocation2 + $0x218] sm:$0xff] }
  0x8d   :  { %v353_v57 = vld [vmem:[#allocation2 + $0x7c0] sm:$0xff]  ;;  %v354_v59 = vld [vmem:[#allocation2 + $0x7c8] sm:$0xff]  ;;  %v6315_v39 = vcombine.high %v171_v32, %v179_v33  ;;  %v187_v40 = vld [vmem:[#allocation2 + $0x290] sm:$0xff] }
  0x8e   :  { %1750 = vmatpush1.bf16.msra.mxu0 %v6358_v3  ;;  %1793 = vmatpush1.bf16.msra.mxu1 %v6360_v4  ;;  %v6487_v62 = vcombine.high %v345_v55, %v353_v57  ;;  %v6489_v63 = vcombine.high %v346_v58, %v354_v59  ;;  %v116_v3 = vld [vmem:[#allocation2 + $0x58] sm:$0xff]  ;;  %v6486_v4 = vcombine.low %v345_v55, %v353_v57  ;;  %v8247_v10 = vld [vmem:[%s8401_s0] ss:$8 sps:$4 sm:$0xff]   ;;  %v195_v41 = vld [vmem:[#allocation2 + $0x2d0] sm:$0xff] }
  0x8f   :  { %1751 = vmatprep.subr.bf16.mxu0 %v6375_v5  ;;  %1794 = vmatprep.subr.bf16.mxu1 %v6377_v6  ;;  %v6488_v5 = vcombine.low %v346_v58, %v354_v59  ;;  %v6251_v6 = vcombine.high %v107_v0, %v115_v1  ;;  %v6253_v7 = vcombine.high %v108_v2, %v116_v3  ;;  %v188_v42 = vld [vmem:[#allocation2 + $0x298] sm:$0xff]  ;;  %v203_v48 = vld [vmem:[#allocation2 + $0x310] sm:$0xff] }
  0x90   :  { %v6331_v47 = vcombine.high %v187_v40, %v195_v41  ;;  %v211_v49 = vld [vmem:[#allocation2 + $0x350] sm:$0xff]  ;;  %v204_v50 = vld [vmem:[#allocation2 + $0x318] sm:$0xff] }
  0x91   :  { %v6347_v55 = vcombine.high %v203_v48, %v211_v49  ;;  %v219_v57 = vld [vmem:[#allocation2 + $0x390] sm:$0xff]  ;;  %v220_v59 = vld [vmem:[#allocation2 + $0x398] sm:$0xff] }
  0x92   :  { %1752 = vmatpush1.bf16.msra.mxu0 %v6374_v11  ;;  %1795 = vmatpush1.bf16.msra.mxu1 %v6376_v12  ;;  %v124_v11 = vld [vmem:[#allocation2 + $0x98] sm:$0xff]  ;;  %v227_v58 = vld [vmem:[#allocation2 + $0x3d0] sm:$0xff] }
  0x93   :  { %1753 = vmatprep.subr.bf16.mxu0 %v6391_v13  ;;  %1796 = vmatprep.subr.bf16.mxu1 %v6393_v14  ;;  %v132_v12 = vld [vmem:[#allocation2 + $0xd8] sm:$0xff]  ;;  %v6250_v13 = vcombine.low %v107_v0, %v115_v1  ;;  %v6252_v14 = vcombine.low %v108_v2, %v116_v3  ;;  %v6363_v0 = vcombine.high %v219_v57, %v227_v58  ;;  %v235_v1 = vld [vmem:[#allocation2 + $0x410] sm:$0xff] }
  0x94   :  { %v6269_v18 = vcombine.high %v124_v11, %v132_v12  ;;  %v243_v2 = vld [vmem:[#allocation2 + $0x450] sm:$0xff]  ;;  %v236_v3 = vld [vmem:[#allocation2 + $0x418] sm:$0xff] }
  0x96   :  { %1754 = vmatpush1.bf16.msra.mxu0 %v6390_v19  ;;  %1797 = vmatpush1.bf16.msra.mxu1 %v6392_v20  ;;  %v140_v19 = vld [vmem:[#allocation2 + $0x118] sm:$0xff] }
  0x97   :  { %1755 = vmatprep.subr.bf16.mxu0 %v6407_v21  ;;  %1798 = vmatprep.subr.bf16.mxu1 %v6409_v22  ;;  %v148_v20 = vld [vmem:[#allocation2 + $0x158] sm:$0xff]  ;;  %v6266_v21 = vcombine.low %v123_v8, %v131_v9  ;;  %v6268_v22 = vcombine.low %v124_v11, %v132_v12  ;;  %v6379_v8 = vcombine.high %v235_v1, %v243_v2  ;;  %v251_v9 = vld [vmem:[#allocation2 + $0x490] sm:$0xff] }
  0x98   :  { %v259_v11 = vld [vmem:[#allocation2 + $0x4d0] sm:$0xff]  ;;  %v252_v12 = vld [vmem:[#allocation2 + $0x498] sm:$0xff] }
  0x9a   :  { %1756 = vmatpush1.bf16.msra.mxu0 %v6406_v27  ;;  %1799 = vmatpush1.bf16.msra.mxu1 %v6408_v28  ;;  %v6285_v27 = vcombine.high %v140_v19, %v148_v20  ;;  %v164_v28 = vld [vmem:[#allocation2 + $0x1d8] sm:$0xff] }
  0x9b   :  { %1757 = vmatprep.subr.bf16.mxu0 %v6423_v29  ;;  %1800 = vmatprep.subr.bf16.mxu1 %v6425_v30  ;;  %v6282_v29 = vcombine.low %v139_v16, %v147_v17  ;;  %v6284_v30 = vcombine.low %v140_v19, %v148_v20  ;;  %v6395_v17 = vcombine.high %v251_v9, %v259_v11  ;;  %v275_v19 = vld [vmem:[#allocation2 + $0x550] sm:$0xff]  ;;  %v268_v20 = vld [vmem:[#allocation2 + $0x518] sm:$0xff] }
  0x9e   :  { %1758 = vmatpush1.bf16.msra.mxu0 %v6422_v35  ;;  %1801 = vmatpush1.bf16.msra.mxu1 %v6424_v36  ;;  %v6301_v35 = vcombine.high %v156_v26, %v164_v28  ;;  %v180_v36 = vld [vmem:[#allocation2 + $0x258] sm:$0xff] }
  0x9f   :  { %1759 = vmatprep.subr.bf16.mxu0 %v6439_v37  ;;  %1802 = vmatprep.subr.bf16.mxu1 %v6441_v38  ;;  %v6298_v37 = vcombine.low %v155_v24, %v163_v25  ;;  %v6300_v38 = vcombine.low %v156_v26, %v164_v28  ;;  %v283_v26 = vld [vmem:[#allocation2 + $0x590] sm:$0xff]  ;;  %v284_v28 = vld [vmem:[#allocation2 + $0x598] sm:$0xff] }
  0xa2   :  { %1760 = vmatpush1.bf16.msra.mxu0 %v6438_v43  ;;  %1803 = vmatpush1.bf16.msra.mxu1 %v6440_v44  ;;  %v6317_v43 = vcombine.high %v172_v34, %v180_v36  ;;  %v196_v44 = vld [vmem:[#allocation2 + $0x2d8] sm:$0xff] }
  0xa3   :  { %1761 = vmatprep.subr.bf16.mxu0 %v6455_v45  ;;  %1804 = vmatprep.subr.bf16.mxu1 %v6457_v46  ;;  %v6314_v45 = vcombine.low %v171_v32, %v179_v33  ;;  %v6316_v46 = vcombine.low %v172_v34, %v180_v36  ;;  %v299_v34 = vld [vmem:[#allocation2 + $0x610] sm:$0xff]  ;;  %v300_v36 = vld [vmem:[#allocation2 + $0x618] sm:$0xff] }
  0xa6   :  { %1762 = vmatpush1.bf16.msra.mxu0 %v6454_v51  ;;  %1805 = vmatpush1.bf16.msra.mxu1 %v6456_v52  ;;  %v6333_v51 = vcombine.high %v188_v42, %v196_v44  ;;  %v212_v52 = vld [vmem:[#allocation2 + $0x358] sm:$0xff] }
  0xa7   :  { %1763 = vmatprep.subr.bf16.mxu0 %v6471_v53  ;;  %1806 = vmatprep.subr.bf16.mxu1 %v6473_v54  ;;  %v6330_v53 = vcombine.low %v187_v40, %v195_v41  ;;  %v6332_v54 = vcombine.low %v188_v42, %v196_v44  ;;  %v315_v42 = vld [vmem:[#allocation2 + $0x690] sm:$0xff]  ;;  %v316_v44 = vld [vmem:[#allocation2 + $0x698] sm:$0xff] }
  0xaa   :  { %1764 = vmatpush1.bf16.msra.mxu0 %v6470_v60  ;;  %1807 = vmatpush1.bf16.msra.mxu1 %v6472_v61  ;;  %v6349_v60 = vcombine.high %v204_v50, %v212_v52  ;;  %v228_v61 = vld [vmem:[#allocation2 + $0x3d8] sm:$0xff] }
  0xab   :  { %1765 = vmatprep.subr.bf16.mxu0 %v6487_v62  ;;  %1808 = vmatprep.subr.bf16.mxu1 %v6489_v63  ;;  %v6346_v62 = vcombine.low %v203_v48, %v211_v49  ;;  %v6348_v63 = vcombine.low %v204_v50, %v212_v52  ;;  %v331_v50 = vld [vmem:[#allocation2 + $0x710] sm:$0xff]  ;;  %v332_v52 = vld [vmem:[#allocation2 + $0x718] sm:$0xff] }
  0xae   :  { %1766 = vmatpush1.bf16.msra.mxu0 %v6486_v4  ;;  %1809 = vmatpush1.bf16.msra.mxu1 %v6488_v5  ;;  %v6365_v4 = vcombine.high %v220_v59, %v228_v61  ;;  %v244_v5 = vld [vmem:[#allocation2 + $0x458] sm:$0xff] }
  0xaf   :  { %1821 = vmatprep.subr.bf16.mxu0 %v6251_v6  ;;  %1864 = vmatprep.subr.bf16.mxu1 %v6253_v7  ;;  %v6362_v6 = vcombine.low %v219_v57, %v227_v58  ;;  %v6364_v7 = vcombine.low %v220_v59, %v228_v61  ;;  %v6380_v16 = vcombine.low %v236_v3, %v244_v5  ;;  %v347_v59 = vld [vmem:[#allocation2 + $0x790] sm:$0xff]  ;;  %v348_v61 = vld [vmem:[#allocation2 + $0x798] sm:$0xff] }
  0xb1   :  { %1768 = vmatmul.mubr.bf16.vlgmr.msra.gmra.mrb[0].mxu0 %v8247_v10  ;;  %1811 = vmatmul.mubr.bf16.vlgmr.msra.gmra.mrb[0].mxu1 %v8247_v10 }
  0xb2   :  { %1822 = vmatpush1.bf16.msra.mxu0 %v6250_v13  ;;  %1865 = vmatpush1.bf16.msra.mxu1 %v6252_v14  ;;  %v6381_v13 = vcombine.high %v236_v3, %v244_v5  ;;  %v260_v14 = vld [vmem:[#allocation2 + $0x4d8] sm:$0xff]  ;;  %v109_v3 = vld [vmem:[#allocation2 + $0x20] sm:$0xff]  ;;  %v110_v5 = vld [vmem:[#allocation2 + $0x28] sm:$0xff] }
  0xb3   :  { %1823 = vmatprep.subr.bf16.mxu0 %v6267_v15  ;;  %1866 = vmatprep.subr.bf16.mxu1 %v6269_v18  ;;  %v6378_v15 = vcombine.low %v235_v1, %v243_v2  ;;  %v267_v18 = vld [vmem:[#allocation2 + $0x510] sm:$0xff]  ;;  %v6396_v24 = vcombine.low %v252_v12, %v260_v14 }
  0xb4   :  { %1853 = vmatprep.mubr.bf16.mxu0 %v8240_v56  ;;  %1896 = vmatprep.mubr.bf16.mxu1 %v8240_v56  ;;  %v6411_v25 = vcombine.high %v267_v18, %v275_v19 }
  0xb6   :  { %1824 = vmatpush1.bf16.msra.mxu0 %v6266_v21  ;;  %1867 = vmatpush1.bf16.msra.mxu1 %v6268_v22  ;;  %v6397_v21 = vcombine.high %v252_v12, %v260_v14  ;;  %v276_v22 = vld [vmem:[#allocation2 + $0x558] sm:$0xff]  ;;  %v125_v12 = vld [vmem:[#allocation2 + $0xa0] sm:$0xff]  ;;  %v126_v14 = vld [vmem:[#allocation2 + $0xa8] sm:$0xff] }
  0xb7   :  { %1825 = vmatprep.subr.bf16.mxu0 %v6283_v23  ;;  %1868 = vmatprep.subr.bf16.mxu1 %v6285_v27  ;;  %v6394_v23 = vcombine.low %v251_v9, %v259_v11  ;;  %v291_v27 = vld [vmem:[#allocation2 + $0x5d0] sm:$0xff]  ;;  %v6412_v32 = vcombine.low %v268_v20, %v276_v22 }
  0xb8   :  { %v6427_v33 = vcombine.high %v283_v26, %v291_v27 }
  0xba   :  { %1826 = vmatpush1.bf16.msra.mxu0 %v6282_v29  ;;  %1869 = vmatpush1.bf16.msra.mxu1 %v6284_v30  ;;  %v6413_v29 = vcombine.high %v268_v20, %v276_v22  ;;  %v292_v30 = vld [vmem:[#allocation2 + $0x5d8] sm:$0xff]  ;;  %v149_v22 = vld [vmem:[#allocation2 + $0x160] sm:$0xff] }
  0xbb   :  { %1827 = vmatprep.subr.bf16.mxu0 %v6299_v31  ;;  %1870 = vmatprep.subr.bf16.mxu1 %v6301_v35  ;;  %v6410_v31 = vcombine.low %v267_v18, %v275_v19  ;;  %v307_v35 = vld [vmem:[#allocation2 + $0x650] sm:$0xff]  ;;  %v6428_v40 = vcombine.low %v284_v28, %v292_v30 }
  0xbc   :  { %v6443_v41 = vcombine.high %v299_v34, %v307_v35 }
  0xbe   :  { %1828 = vmatpush1.bf16.msra.mxu0 %v6298_v37  ;;  %1871 = vmatpush1.bf16.msra.mxu1 %v6300_v38  ;;  %v6429_v37 = vcombine.high %v284_v28, %v292_v30  ;;  %v308_v38 = vld [vmem:[#allocation2 + $0x658] sm:$0xff]  ;;  %v157_v28 = vld [vmem:[#allocation2 + $0x1a0] sm:$0xff]  ;;  %v158_v30 = vld [vmem:[#allocation2 + $0x1a8] sm:$0xff] }
  0xbf   :  { %1829 = vmatprep.subr.bf16.mxu0 %v6315_v39  ;;  %1872 = vmatprep.subr.bf16.mxu1 %v6317_v43  ;;  %v6426_v39 = vcombine.low %v283_v26, %v291_v27  ;;  %v323_v43 = vld [vmem:[#allocation2 + $0x6d0] sm:$0xff]  ;;  %v6444_v48 = vcombine.low %v300_v36, %v308_v38 }
  0xc0   :  { %v6459_v49 = vcombine.high %v315_v42, %v323_v43 }
  0xc2   :  { %1830 = vmatpush1.bf16.msra.mxu0 %v6314_v45  ;;  %1873 = vmatpush1.bf16.msra.mxu1 %v6316_v46  ;;  %v6445_v45 = vcombine.high %v300_v36, %v308_v38  ;;  %v324_v46 = vld [vmem:[#allocation2 + $0x6d8] sm:$0xff]  ;;  %v181_v36 = vld [vmem:[#allocation2 + $0x260] sm:$0xff] }
  0xc3   :  { %1831 = vmatprep.subr.bf16.mxu0 %v6331_v47  ;;  %1874 = vmatprep.subr.bf16.mxu1 %v6333_v51  ;;  %v6442_v47 = vcombine.low %v299_v34, %v307_v35  ;;  %v339_v51 = vld [vmem:[#allocation2 + $0x750] sm:$0xff]  ;;  %v6460_v57 = vcombine.low %v316_v44, %v324_v46  ;;  %v173_v35 = vld [vmem:[#allocation2 + $0x220] sm:$0xff] }
  0xc4   :  { %v6475_v58 = vcombine.high %v331_v50, %v339_v51 }
  0xc6   :  { %1832 = vmatpush1.bf16.msra.mxu0 %v6330_v53  ;;  %1875 = vmatpush1.bf16.msra.mxu1 %v6332_v54  ;;  %v6461_v53 = vcombine.high %v316_v44, %v324_v46  ;;  %v340_v54 = vld [vmem:[#allocation2 + $0x758] sm:$0xff]  ;;  %v190_v44 = vld [vmem:[#allocation2 + $0x2a8] sm:$0xff] }
  0xc7   :  { %1833 = vmatprep.subr.bf16.mxu0 %v6347_v55  ;;  %1876 = vmatprep.subr.bf16.mxu1 %v6349_v60  ;;  %v6458_v55 = vcombine.low %v315_v42, %v323_v43  ;;  %v355_v60 = vld [vmem:[#allocation2 + $0x7d0] sm:$0xff]  ;;  %v6476_v1 = vcombine.low %v332_v52, %v340_v54  ;;  %v6319_v42 = vcombine.high %v173_v35, %v181_v36  ;;  %v189_v43 = vld [vmem:[#allocation2 + $0x2a0] sm:$0xff]  ;;  %v198_v46 = vld [vmem:[#allocation2 + $0x2e8] sm:$0xff] }
  0xc8   :  { %v6491_v2 = vcombine.high %v347_v59, %v355_v60 }
  0xca   :  { %1834 = vmatpush1.bf16.msra.mxu0 %v6346_v62  ;;  %1877 = vmatpush1.bf16.msra.mxu1 %v6348_v63  ;;  %v6477_v62 = vcombine.high %v332_v52, %v340_v54  ;;  %v356_v63 = vld [vmem:[#allocation2 + $0x7d8] sm:$0xff]  ;;  %v206_v52 = vld [vmem:[#allocation2 + $0x328] sm:$0xff] }
  0xcb   :  { %1835 = vmatprep.subr.bf16.mxu0 %v6363_v0  ;;  %1878 = vmatprep.subr.bf16.mxu1 %v6365_v4  ;;  %v6474_v0 = vcombine.low %v331_v50, %v339_v51  ;;  %v117_v4 = vld [vmem:[#allocation2 + $0x60] sm:$0xff]  ;;  %v6492_v9 = vcombine.low %v348_v61, %v356_v63  ;;  %v214_v54 = vld [vmem:[#allocation2 + $0x368] sm:$0xff] }
  0xcc   :  { %v6255_v11 = vcombine.high %v109_v3, %v117_v4  ;;  %v205_v50 = vld [vmem:[#allocation2 + $0x320] sm:$0xff] }
  0xcd   :  { %v213_v51 = vld [vmem:[#allocation2 + $0x360] sm:$0xff] }
  0xce   :  { %1836 = vmatpush1.bf16.msra.mxu0 %v6362_v6  ;;  %1879 = vmatpush1.bf16.msra.mxu1 %v6364_v7  ;;  %v6493_v6 = vcombine.high %v348_v61, %v356_v63  ;;  %v118_v7 = vld [vmem:[#allocation2 + $0x68] sm:$0xff]  ;;  %v229_v61 = vld [vmem:[#allocation2 + $0x3e0] sm:$0xff] }
  0xcf   :  { %1837 = vmatprep.subr.bf16.mxu0 %v6379_v8  ;;  %1880 = vmatprep.subr.bf16.mxu1 %v6381_v13  ;;  %v6490_v8 = vcombine.low %v347_v59, %v355_v60  ;;  %v133_v13 = vld [vmem:[#allocation2 + $0xe0] sm:$0xff]  ;;  %v6256_v18 = vcombine.low %v110_v5, %v118_v7  ;;  %v6353_v59 = vcombine.high %v206_v52, %v214_v54  ;;  %v230_v63 = vld [vmem:[#allocation2 + $0x3e8] sm:$0xff] }
  0xd0   :  { %v6271_v19 = vcombine.high %v125_v12, %v133_v13  ;;  %v221_v60 = vld [vmem:[#allocation2 + $0x3a0] sm:$0xff] }
  0xd2   :  { %1838 = vmatpush1.bf16.msra.mxu0 %v6378_v15  ;;  %1881 = vmatpush1.bf16.msra.mxu1 %v6380_v16  ;;  %v6257_v15 = vcombine.high %v110_v5, %v118_v7  ;;  %v134_v16 = vld [vmem:[#allocation2 + $0xe8] sm:$0xff]  ;;  %v245_v5 = vld [vmem:[#allocation2 + $0x460] sm:$0xff] }
  0xd3   :  { %1839 = vmatprep.subr.bf16.mxu0 %v6395_v17  ;;  %1882 = vmatprep.subr.bf16.mxu1 %v6397_v21  ;;  %v6254_v17 = vcombine.low %v109_v3, %v117_v4  ;;  %v6273_v20 = vcombine.high %v126_v14, %v134_v16  ;;  %v141_v21 = vld [vmem:[#allocation2 + $0x120] sm:$0xff]  ;;  %v6272_v26 = vcombine.low %v126_v14, %v134_v16  ;;  %v246_v7 = vld [vmem:[#allocation2 + $0x468] sm:$0xff] }
  0xd4   :  { %v6287_v27 = vcombine.high %v141_v21, %v149_v22  ;;  %v237_v4 = vld [vmem:[#allocation2 + $0x420] sm:$0xff]  ;;  %v262_v16 = vld [vmem:[#allocation2 + $0x4e8] sm:$0xff] }
  0xd5   :  { %v261_v14 = vld [vmem:[#allocation2 + $0x4e0] sm:$0xff] }
  0xd6   :  { %1840 = vmatpush1.bf16.msra.mxu0 %v6394_v23  ;;  %1883 = vmatpush1.bf16.msra.mxu1 %v6396_v24  ;;  %v142_v23 = vld [vmem:[#allocation2 + $0x128] sm:$0xff] }
  0xd7   :  { %1841 = vmatprep.subr.bf16.mxu0 %v6411_v25  ;;  %1884 = vmatprep.subr.bf16.mxu1 %v6413_v29  ;;  %v150_v24 = vld [vmem:[#allocation2 + $0x168] sm:$0xff]  ;;  %v6270_v25 = vcombine.low %v125_v12, %v133_v13  ;;  %v165_v29 = vld [vmem:[#allocation2 + $0x1e0] sm:$0xff] }
  0xd8   :  { %v6303_v34 = vcombine.high %v157_v28, %v165_v29  ;;  %v253_v13 = vld [vmem:[#allocation2 + $0x4a0] sm:$0xff] }
  0xda   :  { %1842 = vmatpush1.bf16.msra.mxu0 %v6410_v31  ;;  %1885 = vmatpush1.bf16.msra.mxu1 %v6412_v32  ;;  %v6289_v31 = vcombine.high %v142_v23, %v150_v24  ;;  %v166_v32 = vld [vmem:[#allocation2 + $0x1e8] sm:$0xff] }
  0xdb   :  { %1843 = vmatprep.subr.bf16.mxu0 %v6427_v33  ;;  %1886 = vmatprep.subr.bf16.mxu1 %v6429_v37  ;;  %v6286_v33 = vcombine.low %v141_v21, %v149_v22  ;;  %v174_v37 = vld [vmem:[#allocation2 + $0x228] sm:$0xff]  ;;  %v6305_v38 = vcombine.high %v158_v30, %v166_v32  ;;  %v277_v21 = vld [vmem:[#allocation2 + $0x560] sm:$0xff] }
  0xdc   :  { %v270_v22 = vld [vmem:[#allocation2 + $0x528] sm:$0xff] }
  0xde   :  { %1844 = vmatpush1.bf16.msra.mxu0 %v6426_v39  ;;  %1887 = vmatpush1.bf16.msra.mxu1 %v6428_v40  ;;  %v182_v39 = vld [vmem:[#allocation2 + $0x268] sm:$0xff]  ;;  %v6302_v40 = vcombine.low %v157_v28, %v165_v29  ;;  %v285_v28 = vld [vmem:[#allocation2 + $0x5a0] sm:$0xff] }
  0xdf   :  { %1845 = vmatprep.subr.bf16.mxu0 %v6443_v41  ;;  %1888 = vmatprep.subr.bf16.mxu1 %v6445_v45  ;;  %v6304_v41 = vcombine.low %v158_v30, %v166_v32  ;;  %v6321_v45 = vcombine.high %v174_v37, %v182_v39  ;;  %v293_v29 = vld [vmem:[#allocation2 + $0x5e0] sm:$0xff]  ;;  %v286_v30 = vld [vmem:[#allocation2 + $0x5a8] sm:$0xff] }
  0xe0   :  { %v294_v32 = vld [vmem:[#allocation2 + $0x5e8] sm:$0xff] }
  0xe2   :  { %1846 = vmatpush1.bf16.msra.mxu0 %v6442_v47  ;;  %1889 = vmatpush1.bf16.msra.mxu1 %v6444_v48  ;;  %v6318_v47 = vcombine.low %v173_v35, %v181_v36  ;;  %v6320_v48 = vcombine.low %v174_v37, %v182_v39  ;;  %v301_v35 = vld [vmem:[#allocation2 + $0x620] sm:$0xff]  ;;  %v302_v37 = vld [vmem:[#allocation2 + $0x628] sm:$0xff] }
  0xe3   :  { %1847 = vmatprep.subr.bf16.mxu0 %v6459_v49  ;;  %1890 = vmatprep.subr.bf16.mxu1 %v6461_v53  ;;  %v6337_v53 = vcombine.high %v190_v44, %v198_v46  ;;  %v309_v36 = vld [vmem:[#allocation2 + $0x660] sm:$0xff]  ;;  %v310_v39 = vld [vmem:[#allocation2 + $0x668] sm:$0xff] }
  0xe6   :  { %1848 = vmatpush1.bf16.msra.mxu0 %v6458_v55  ;;  %1891 = vmatpush1.bf16.msra.mxu1 %v6460_v57  ;;  %v6336_v57 = vcombine.low %v190_v44, %v198_v46  ;;  %v318_v44 = vld [vmem:[#allocation2 + $0x6a8] sm:$0xff] }
  0xe7   :  { %1849 = vmatprep.subr.bf16.mxu0 %v6475_v58  ;;  %1892 = vmatprep.subr.bf16.mxu1 %v6477_v62  ;;  %v6351_v58 = vcombine.high %v205_v50, %v213_v51  ;;  %v222_v62 = vld [vmem:[#allocation2 + $0x3a8] sm:$0xff] }
  0xe8   :  { %v6369_v3 = vcombine.high %v222_v62, %v230_v63  ;;  %v326_v46 = vld [vmem:[#allocation2 + $0x6e8] sm:$0xff] }
  0xea   :  { %1850 = vmatpush1.bf16.msra.mxu0 %v6474_v0  ;;  %1893 = vmatpush1.bf16.msra.mxu1 %v6476_v1  ;;  %v6350_v0 = vcombine.low %v205_v50, %v213_v51  ;;  %v6352_v1 = vcombine.low %v206_v52, %v214_v54  ;;  %v333_v50 = vld [vmem:[#allocation2 + $0x720] sm:$0xff]  ;;  %v334_v52 = vld [vmem:[#allocation2 + $0x728] sm:$0xff] }
  0xeb   :  { %1851 = vmatprep.subr.bf16.mxu0 %v6491_v2  ;;  %1894 = vmatprep.subr.bf16.mxu1 %v6493_v6  ;;  %v6367_v2 = vcombine.high %v221_v60, %v229_v61  ;;  %v238_v6 = vld [vmem:[#allocation2 + $0x428] sm:$0xff]  ;;  %v341_v51 = vld [vmem:[#allocation2 + $0x760] sm:$0xff] }
  0xec   :  { %v6385_v12 = vcombine.high %v238_v6, %v246_v7  ;;  %v342_v54 = vld [vmem:[#allocation2 + $0x768] sm:$0xff] }
  0xee   :  { %1852 = vmatpush1.bf16.msra.mxu0 %v6490_v8  ;;  %1895 = vmatpush1.bf16.msra.mxu1 %v6492_v9  ;;  %v6366_v8 = vcombine.low %v221_v60, %v229_v61  ;;  %v6368_v9 = vcombine.low %v222_v62, %v230_v63  ;;  %v357_v60 = vld [vmem:[#allocation2 + $0x7e0] sm:$0xff]  ;;  %v350_v61 = vld [vmem:[#allocation2 + $0x7a8] sm:$0xff]  ;;  %v6481_v62 = vcombine.high %v334_v52, %v342_v54 }
  0xef   :  { %1907 = vmatprep.subr.bf16.mxu0 %v6255_v11  ;;  %1950 = vmatprep.subr.bf16.mxu1 %v6257_v15  ;;  %v6383_v11 = vcombine.high %v237_v4, %v245_v5  ;;  %v254_v15 = vld [vmem:[#allocation2 + $0x4a8] sm:$0xff] }
  0xf0   :  { %v358_v63 = vld [vmem:[#allocation2 + $0x7e8] sm:$0xff] }
  0xf1   :  { %1854 = vmatmul.mubr.bf16.vlgmr.msra.gmra.mrb[4].mxu0 %v8247_v10  ;;  %1897 = vmatmul.mubr.bf16.vlgmr.msra.gmra.mrb[4].mxu1 %v8247_v10  ;;  %v6288_v10 = vcombine.low %v142_v23, %v150_v24  ;;  %v6401_v23 = vcombine.high %v254_v15, %v262_v16  ;;  %v278_v24 = vld [vmem:[#allocation2 + $0x568] sm:$0xff] }
  0xf2   :  { %1908 = vmatpush1.bf16.msra.mxu0 %v6254_v17  ;;  %1951 = vmatpush1.bf16.msra.mxu1 %v6256_v18  ;;  %v6382_v17 = vcombine.low %v237_v4, %v245_v5  ;;  %v6384_v18 = vcombine.low %v238_v6, %v246_v7  ;;  %v119_v4 = vld [vmem:[#allocation2 + $0x70] sm:$0xff]  ;;  %v112_v5 = vld [vmem:[#allocation2 + $0x38] sm:$0xff]  ;;  %v6497_v6 = vcombine.high %v350_v61, %v358_v63 }
  0xf3   :  { %1909 = vmatprep.subr.bf16.mxu0 %v6271_v19  ;;  %1952 = vmatprep.subr.bf16.mxu1 %v6273_v20  ;;  %v6399_v19 = vcombine.high %v253_v13, %v261_v14  ;;  %v269_v20 = vld [vmem:[#allocation2 + $0x520] sm:$0xff]  ;;  %v120_v7 = vld [vmem:[#allocation2 + $0x78] sm:$0xff] }
  0xf4   :  { %1939 = vmatprep.mubr.bf16.mxu0 %v8240_v56  ;;  %1982 = vmatprep.mubr.bf16.mxu1 %v8240_v56  ;;  %v197_v56 = vld [vmem:[#allocation2 + $0x2e0] sm:$0xff] }
  0xf5   :  { %v6335_v49 = vcombine.high %v189_v43, %v197_v56  ;;  %v6334_v55 = vcombine.low %v189_v43, %v197_v56  ;;  %v317_v43 = vld [vmem:[#allocation2 + $0x6a0] sm:$0xff] }
  0xf6   :  { %1910 = vmatpush1.bf16.msra.mxu0 %v6270_v25  ;;  %1953 = vmatpush1.bf16.msra.mxu1 %v6272_v26  ;;  %v6398_v25 = vcombine.low %v253_v13, %v261_v14  ;;  %v6400_v26 = vcombine.low %v254_v15, %v262_v16  ;;  %v325_v56 = vld [vmem:[#allocation2 + $0x6e0] sm:$0xff]  ;;  %v135_v13 = vld [vmem:[#allocation2 + $0xf0] sm:$0xff]  ;;  %v128_v14 = vld [vmem:[#allocation2 + $0xb8] sm:$0xff]  ;;  %v6261_v15 = vcombine.high %v112_v5, %v120_v7 }
  0xf7   :  { %1911 = vmatprep.subr.bf16.mxu0 %v6287_v27  ;;  %1954 = vmatprep.subr.bf16.mxu1 %v6289_v31  ;;  %v6415_v27 = vcombine.high %v269_v20, %v277_v21  ;;  %v6417_v31 = vcombine.high %v270_v22, %v278_v24  ;;  %v136_v16 = vld [vmem:[#allocation2 + $0xf8] sm:$0xff] }
  0xfa   :  { %1912 = vmatpush1.bf16.msra.mxu0 %v6286_v33  ;;  %1955 = vmatpush1.bf16.msra.mxu1 %v6288_v10  ;;  %v6414_v33 = vcombine.low %v269_v20, %v277_v21  ;;  %v6416_v10 = vcombine.low %v270_v22, %v278_v24  ;;  %v6277_v20 = vcombine.high %v128_v14, %v136_v16  ;;  %v143_v21 = vld [vmem:[#allocation2 + $0x130] sm:$0xff]  ;;  %v144_v24 = vld [vmem:[#allocation2 + $0x138] sm:$0xff] }
  0xfb   :  { %1913 = vmatprep.subr.bf16.mxu0 %v6303_v34  ;;  %1956 = vmatprep.subr.bf16.mxu1 %v6305_v38  ;;  %v6431_v34 = vcombine.high %v285_v28, %v293_v29  ;;  %v6433_v38 = vcombine.high %v286_v30, %v294_v32  ;;  %v151_v22 = vld [vmem:[#allocation2 + $0x170] sm:$0xff] }
  0xfe   :  { %1914 = vmatpush1.bf16.msra.mxu0 %v6302_v40  ;;  %1957 = vmatpush1.bf16.msra.mxu1 %v6304_v41  ;;  %v6430_v40 = vcombine.low %v285_v28, %v293_v29  ;;  %v6432_v41 = vcombine.low %v286_v30, %v294_v32  ;;  %v6291_v28 = vcombine.high %v143_v21, %v151_v22  ;;  %v159_v30 = vld [vmem:[#allocation2 + $0x1b0] sm:$0xff]  ;;  %v160_v32 = vld [vmem:[#allocation2 + $0x1b8] sm:$0xff] }
  0xff   :  { %1915 = vmatprep.subr.bf16.mxu0 %v6319_v42  ;;  %1958 = vmatprep.subr.bf16.mxu1 %v6321_v45  ;;  %v6447_v42 = vcombine.high %v301_v35, %v309_v36  ;;  %v6449_v45 = vcombine.high %v302_v37, %v310_v39 }
 0x102   :  { %1916 = vmatpush1.bf16.msra.mxu0 %v6318_v47  ;;  %1959 = vmatpush1.bf16.msra.mxu1 %v6320_v48  ;;  %v6446_v47 = vcombine.low %v301_v35, %v309_v36  ;;  %v6448_v48 = vcombine.low %v302_v37, %v310_v39  ;;  %v175_v37 = vld [vmem:[#allocation2 + $0x230] sm:$0xff]  ;;  %v176_v39 = vld [vmem:[#allocation2 + $0x238] sm:$0xff] }
 0x103   :  { %1917 = vmatprep.subr.bf16.mxu0 %v6335_v49  ;;  %1960 = vmatprep.subr.bf16.mxu1 %v6337_v53  ;;  %v6463_v49 = vcombine.high %v317_v43, %v325_v56  ;;  %v6465_v53 = vcombine.high %v318_v44, %v326_v46 }
 0x106   :  { %1918 = vmatpush1.bf16.msra.mxu0 %v6334_v55  ;;  %1961 = vmatpush1.bf16.msra.mxu1 %v6336_v57  ;;  %v6462_v55 = vcombine.low %v317_v43, %v325_v56  ;;  %v6464_v57 = vcombine.low %v318_v44, %v326_v46  ;;  %v191_v44 = vld [vmem:[#allocation2 + $0x2b0] sm:$0xff]  ;;  %v192_v46 = vld [vmem:[#allocation2 + $0x2b8] sm:$0xff] }
 0x107   :  { %1919 = vmatprep.subr.bf16.mxu0 %v6351_v58  ;;  %1962 = vmatprep.subr.bf16.mxu1 %v6353_v59  ;;  %v6479_v58 = vcombine.high %v333_v50, %v341_v51  ;;  %v349_v59 = vld [vmem:[#allocation2 + $0x7a0] sm:$0xff] }
 0x10a   :  { %1920 = vmatpush1.bf16.msra.mxu0 %v6350_v0  ;;  %1963 = vmatpush1.bf16.msra.mxu1 %v6352_v1  ;;  %v6478_v0 = vcombine.low %v333_v50, %v341_v51  ;;  %v6480_v1 = vcombine.low %v334_v52, %v342_v54  ;;  %v207_v52 = vld [vmem:[#allocation2 + $0x330] sm:$0xff]  ;;  %v208_v54 = vld [vmem:[#allocation2 + $0x338] sm:$0xff] }
 0x10b   :  { %1921 = vmatprep.subr.bf16.mxu0 %v6367_v2  ;;  %1964 = vmatprep.subr.bf16.mxu1 %v6369_v3  ;;  %v6495_v2 = vcombine.high %v349_v59, %v357_v60  ;;  %v111_v3 = vld [vmem:[#allocation2 + $0x30] sm:$0xff] }
 0x10e   :  { %1922 = vmatpush1.bf16.msra.mxu0 %v6366_v8  ;;  %1965 = vmatpush1.bf16.msra.mxu1 %v6368_v9  ;;  %v6494_v8 = vcombine.low %v349_v59, %v357_v60  ;;  %v6496_v9 = vcombine.low %v350_v61, %v358_v63  ;;  %v223_v59 = vld [vmem:[#allocation2 + $0x3b0] sm:$0xff] }
 0x10f   :  { %1923 = vmatprep.subr.bf16.mxu0 %v6383_v11  ;;  %1966 = vmatprep.subr.bf16.mxu1 %v6385_v12  ;;  %v6259_v11 = vcombine.high %v111_v3, %v119_v4  ;;  %v127_v12 = vld [vmem:[#allocation2 + $0xb0] sm:$0xff] }
 0x110   :  { %v231_v60 = vld [vmem:[#allocation2 + $0x3f0] sm:$0xff] }
 0x112   :  { %1924 = vmatpush1.bf16.msra.mxu0 %v6382_v17  ;;  %1967 = vmatpush1.bf16.msra.mxu1 %v6384_v18  ;;  %v6258_v17 = vcombine.low %v111_v3, %v119_v4  ;;  %v6260_v18 = vcombine.low %v112_v5, %v120_v7  ;;  %v239_v3 = vld [vmem:[#allocation2 + $0x430] sm:$0xff] }
 0x113   :  { %1925 = vmatprep.subr.bf16.mxu0 %v6399_v19  ;;  %1968 = vmatprep.subr.bf16.mxu1 %v6401_v23  ;;  %v6275_v19 = vcombine.high %v127_v12, %v135_v13  ;;  %v8260_v23 = vld [vmem:[%s8401_s0] ss:$8 sps:$4 sm:$0xff]   ;;  %v247_v4 = vld [vmem:[#allocation2 + $0x470] sm:$0xff] }
 0x116   :  { %1926 = vmatpush1.bf16.msra.mxu0 %v6398_v25  ;;  %1969 = vmatpush1.bf16.msra.mxu1 %v6400_v26  ;;  %v152_v25 = vld [vmem:[#allocation2 + $0x178] sm:$0xff]  ;;  %v6274_v26 = vcombine.low %v127_v12, %v135_v13  ;;  %v6387_v13 = vcombine.high %v239_v3, %v247_v4 }
 0x117   :  { %1927 = vmatprep.subr.bf16.mxu0 %v6415_v27  ;;  %1970 = vmatprep.subr.bf16.mxu1 %v6417_v31  ;;  %v6276_v27 = vcombine.low %v128_v14, %v136_v16  ;;  %v6293_v29 = vcombine.high %v144_v24, %v152_v25  ;;  %v167_v31 = vld [vmem:[#allocation2 + $0x1f0] sm:$0xff]  ;;  %v6292_v35 = vcombine.low %v144_v24, %v152_v25  ;;  %v256_v16 = vld [vmem:[#allocation2 + $0x4b8] sm:$0xff] }
 0x118   :  { %v6307_v36 = vcombine.high %v159_v30, %v167_v31  ;;  %v255_v14 = vld [vmem:[#allocation2 + $0x4b0] sm:$0xff]  ;;  %v272_v25 = vld [vmem:[#allocation2 + $0x538] sm:$0xff] }
 0x119   :  { %v279_v24 = vld [vmem:[#allocation2 + $0x570] sm:$0xff] }
 0x11a   :  { %1928 = vmatpush1.bf16.msra.mxu0 %v6414_v33  ;;  %1971 = vmatpush1.bf16.msra.mxu1 %v6416_v10  ;;  %v7970_v33 = vld [vmem:[%s8401_s0 + $0x4] ss:$8 sps:$4 sm:$0xff]   ;;  %v168_v10 = vld [vmem:[#allocation2 + $0x1f8] sm:$0xff] }
 0x11b   :  { %1929 = vmatprep.subr.bf16.mxu0 %v6431_v34  ;;  %1972 = vmatprep.subr.bf16.mxu1 %v6433_v38  ;;  %v6290_v34 = vcombine.low %v143_v21, %v151_v22  ;;  %v183_v38 = vld [vmem:[#allocation2 + $0x270] sm:$0xff]  ;;  %v6308_v43 = vcombine.low %v160_v32, %v168_v10 }
 0x11c   :  { %v6323_v56 = vcombine.high %v175_v37, %v183_v38  ;;  %v271_v22 = vld [vmem:[#allocation2 + $0x530] sm:$0xff] }
 0x11e   :  { %1930 = vmatpush1.bf16.msra.mxu0 %v6430_v40  ;;  %1973 = vmatpush1.bf16.msra.mxu1 %v6432_v41  ;;  %v6309_v40 = vcombine.high %v160_v32, %v168_v10  ;;  %v184_v41 = vld [vmem:[#allocation2 + $0x278] sm:$0xff]  ;;  %v295_v32 = vld [vmem:[#allocation2 + $0x5f0] sm:$0xff] }
 0x11f   :  { %1931 = vmatprep.subr.bf16.mxu0 %v6447_v42  ;;  %1974 = vmatprep.subr.bf16.mxu1 %v6449_v45  ;;  %v6306_v42 = vcombine.low %v159_v30, %v167_v31  ;;  %v199_v45 = vld [vmem:[#allocation2 + $0x2f0] sm:$0xff]  ;;  %v6324_v50 = vcombine.low %v176_v39, %v184_v41  ;;  %v6419_v30 = vcombine.high %v271_v22, %v279_v24 }
 0x120   :  { %v6339_v51 = vcombine.high %v191_v44, %v199_v45  ;;  %v287_v31 = vld [vmem:[#allocation2 + $0x5b0] sm:$0xff] }
 0x122   :  { %1932 = vmatpush1.bf16.msra.mxu0 %v6446_v47  ;;  %1975 = vmatpush1.bf16.msra.mxu1 %v6448_v48  ;;  %v6325_v47 = vcombine.high %v176_v39, %v184_v41  ;;  %v200_v48 = vld [vmem:[#allocation2 + $0x2f8] sm:$0xff]  ;;  %v311_v39 = vld [vmem:[#allocation2 + $0x670] sm:$0xff] }
 0x123   :  { %1933 = vmatprep.subr.bf16.mxu0 %v6463_v49  ;;  %1976 = vmatprep.subr.bf16.mxu1 %v6465_v53  ;;  %v6322_v49 = vcombine.low %v175_v37, %v183_v38  ;;  %v215_v53 = vld [vmem:[#allocation2 + $0x370] sm:$0xff]  ;;  %v6340_v61 = vcombine.low %v192_v46, %v200_v48  ;;  %v6435_v37 = vcombine.high %v287_v31, %v295_v32 }
 0x124   :  { %v303_v38 = vld [vmem:[#allocation2 + $0x630] sm:$0xff] }
 0x126   :  { %1934 = vmatpush1.bf16.msra.mxu0 %v6462_v55  ;;  %1977 = vmatpush1.bf16.msra.mxu1 %v6464_v57  ;;  %v6341_v55 = vcombine.high %v192_v46, %v200_v48  ;;  %v216_v57 = vld [vmem:[#allocation2 + $0x378] sm:$0xff]  ;;  %v327_v46 = vld [vmem:[#allocation2 + $0x6f0] sm:$0xff] }
 0x127   :  { %1935 = vmatprep.subr.bf16.mxu0 %v6479_v58  ;;  %1978 = vmatprep.subr.bf16.mxu1 %v6481_v62  ;;  %v6338_v58 = vcombine.low %v191_v44, %v199_v45  ;;  %v6355_v62 = vcombine.high %v207_v52, %v215_v53  ;;  %v6357_v63 = vcombine.high %v208_v54, %v216_v57  ;;  %v319_v45 = vld [vmem:[#allocation2 + $0x6b0] sm:$0xff] }
 0x128   :  { %v6356_v5 = vcombine.low %v208_v54, %v216_v57  ;;  %v6451_v44 = vcombine.high %v303_v38, %v311_v39  ;;  %v343_v54 = vld [vmem:[#allocation2 + $0x770] sm:$0xff] }
 0x12a   :  { %1936 = vmatpush1.bf16.msra.mxu0 %v6478_v0  ;;  %1979 = vmatpush1.bf16.msra.mxu1 %v6480_v1  ;;  %v224_v0 = vld [vmem:[#allocation2 + $0x3b8] sm:$0xff] }
 0x12b   :  { %1937 = vmatprep.subr.bf16.mxu0 %v6495_v2  ;;  %1980 = vmatprep.subr.bf16.mxu1 %v6497_v6  ;;  %v232_v1 = vld [vmem:[#allocation2 + $0x3f8] sm:$0xff]  ;;  %v6354_v2 = vcombine.low %v207_v52, %v215_v53  ;;  %v6371_v6 = vcombine.high %v223_v59, %v231_v60  ;;  %v6467_v52 = vcombine.high %v319_v45, %v327_v46  ;;  %v335_v53 = vld [vmem:[#allocation2 + $0x730] sm:$0xff] }
 0x12c   :  { %v6373_v7 = vcombine.high %v224_v0, %v232_v1  ;;  %v6372_v12 = vcombine.low %v224_v0, %v232_v1  ;;  %v352_v0 = vld [vmem:[#allocation2 + $0x7b8] sm:$0xff] }
 0x12e   :  { %1938 = vmatpush1.bf16.msra.mxu0 %v6494_v8  ;;  %1981 = vmatpush1.bf16.msra.mxu1 %v6496_v9  ;;  %v240_v8 = vld [vmem:[#allocation2 + $0x438] sm:$0xff] }
 0x12f   :  { %1993 = vmatprep.subr.bf16.mxu0 %v6259_v11  ;;  %2036 = vmatprep.subr.bf16.mxu1 %v6261_v15  ;;  %v248_v9 = vld [vmem:[#allocation2 + $0x478] sm:$0xff]  ;;  %v6370_v11 = vcombine.low %v223_v59, %v231_v60  ;;  %v263_v15 = vld [vmem:[#allocation2 + $0x4f0] sm:$0xff]  ;;  %v6466_v59 = vcombine.low %v319_v45, %v327_v46 }
 0x130   :  { %v6403_v21 = vcombine.high %v255_v14, %v263_v15 }
 0x131   :  { %1940 = vmatmul.mubr.bf16.vlgmr.msra.gmra.mrb[8].mxu0 %v8260_v23  ;;  %1983 = vmatmul.mubr.bf16.vlgmr.msra.gmra.mrb[8].mxu1 %v8260_v23 }
 0x132   :  { %1994 = vmatpush1.bf16.msra.mxu0 %v6258_v17  ;;  %2037 = vmatpush1.bf16.msra.mxu1 %v6260_v18  ;;  %v6389_v17 = vcombine.high %v240_v8, %v248_v9  ;;  %v264_v18 = vld [vmem:[#allocation2 + $0x4f8] sm:$0xff] }
 0x133   :  { %1995 = vmatprep.subr.bf16.mxu0 %v6275_v19  ;;  %2038 = vmatprep.subr.bf16.mxu1 %v6277_v20  ;;  %v6386_v19 = vcombine.low %v239_v3, %v247_v4  ;;  %v6388_v20 = vcombine.low %v240_v8, %v248_v9  ;;  %v6482_v3 = vcombine.low %v335_v53, %v343_v54  ;;  %v7171_v9 = vld [vmem:[#allocation6 + $0x4] ss:$16 sps:$4 sm:$0xff]  }
 0x134   :  { %2025 = vmatprep.mubr.bf16.mxu0 %v7970_v33  ;;  %2068 = vmatprep.mubr.bf16.mxu1 %v7970_v33  ;;  %v288_v33 = vld [vmem:[#allocation2 + $0x5b8] sm:$0xff] }
 0x136   :  { %1996 = vmatpush1.bf16.msra.mxu0 %v6274_v26  ;;  %2039 = vmatpush1.bf16.msra.mxu1 %v6276_v27  ;;  %v6405_v26 = vcombine.high %v256_v16, %v264_v18  ;;  %v280_v27 = vld [vmem:[#allocation2 + $0x578] sm:$0xff] }
 0x137   :  { %1997 = vmatprep.subr.bf16.mxu0 %v6291_v28  ;;  %2040 = vmatprep.subr.bf16.mxu1 %v6293_v29  ;;  %v6402_v28 = vcombine.low %v255_v14, %v263_v15  ;;  %v6404_v29 = vcombine.low %v256_v16, %v264_v18  ;;  %v6421_v10 = vcombine.high %v272_v25, %v280_v27  ;;  %v7177_v14 = vld [vmem:[#allocation6 + $0x24] ss:$16 sps:$4 sm:$0xff]   ;;  %v7180_v15 = vld [vmem:[#allocation6 + $0x2c] ss:$16 sps:$4 sm:$0xff]   ;;  %v7175_v16 = vld [vmem:[#allocation6 + $0x20] ss:$16 sps:$4 sm:$0xff]  }
 0x138   :  { %v7183_v18 = vld [vmem:[#allocation6 + $0x44] ss:$16 sps:$4 sm:$0xff]  }
 0x13a   :  { %1998 = vmatpush1.bf16.msra.mxu0 %v6290_v34  ;;  %2041 = vmatpush1.bf16.msra.mxu1 %v6292_v35  ;;  %v296_v34 = vld [vmem:[#allocation2 + $0x5f8] sm:$0xff]  ;;  %v6418_v35 = vcombine.low %v271_v22, %v279_v24  ;;  %v7189_v24 = vld [vmem:[#allocation6 + $0x64] ss:$16 sps:$4 sm:$0xff]  }
 0x13b   :  { %1999 = vmatprep.subr.bf16.mxu0 %v6307_v36  ;;  %2042 = vmatprep.subr.bf16.mxu1 %v6309_v40  ;;  %v6420_v36 = vcombine.low %v272_v25, %v280_v27  ;;  %v304_v40 = vld [vmem:[#allocation2 + $0x638] sm:$0xff]  ;;  %v6437_v41 = vcombine.high %v288_v33, %v296_v34  ;;  %v7187_v25 = vld [vmem:[#allocation6 + $0x60] ss:$16 sps:$4 sm:$0xff]  }
 0x13c   :  { %v7184_v22 = vld [vmem:[#allocation6 + $0x48] ss:$16 sps:$4 sm:$0xff]  }
 0x13e   :  { %2000 = vmatpush1.bf16.msra.mxu0 %v6306_v42  ;;  %2043 = vmatpush1.bf16.msra.mxu1 %v6308_v43  ;;  %v312_v42 = vld [vmem:[#allocation2 + $0x678] sm:$0xff]  ;;  %v6434_v43 = vcombine.low %v287_v31, %v295_v32  ;;  %v8271_v31 = vld [vmem:[#allocation4] sm:$0xff] }
 0x13f   :  { %2001 = vmatprep.subr.bf16.mxu0 %v6323_v56  ;;  %2044 = vmatprep.subr.bf16.mxu1 %v6325_v47  ;;  %v6436_v56 = vcombine.low %v288_v33, %v296_v34  ;;  %v320_v47 = vld [vmem:[#allocation2 + $0x6b8] sm:$0xff]  ;;  %v6453_v48 = vcombine.high %v304_v40, %v312_v42 }
 0x140   :  { %v7196_v32 = vld [vmem:[#allocation6 + $0x88] ss:$16 sps:$4 sm:$0xff]  }
 0x142   :  { %2002 = vmatpush1.bf16.msra.mxu0 %v6322_v49  ;;  %2045 = vmatpush1.bf16.msra.mxu1 %v6324_v50  ;;  %v328_v49 = vld [vmem:[#allocation2 + $0x6f8] sm:$0xff]  ;;  %v6450_v50 = vcombine.low %v303_v38, %v311_v39  ;;  %v7199_v38 = vld [vmem:[#allocation6 + $0xa0] ss:$16 sps:$4 sm:$0xff]  }
 0x143   :  { %2003 = vmatprep.subr.bf16.mxu0 %v6339_v51  ;;  %2046 = vmatprep.subr.bf16.mxu1 %v6341_v55  ;;  %v6452_v51 = vcombine.low %v304_v40, %v312_v42  ;;  %v336_v55 = vld [vmem:[#allocation2 + $0x738] sm:$0xff]  ;;  %v6469_v57 = vcombine.high %v320_v47, %v328_v49  ;;  %v6468_v60 = vcombine.low %v320_v47, %v328_v49  ;;  %v7205_v49 = vld [vmem:[#allocation6 + $0xc0] ss:$16 sps:$4 sm:$0xff]  }
 0x144   :  { %v7202_v40 = vld [vmem:[#allocation6 + $0xa8] ss:$16 sps:$4 sm:$0xff]  }
 0x146   :  { %2004 = vmatpush1.bf16.msra.mxu0 %v6338_v58  ;;  %2047 = vmatpush1.bf16.msra.mxu1 %v6340_v61  ;;  %v344_v58 = vld [vmem:[#allocation2 + $0x778] sm:$0xff]  ;;  %v6483_v61 = vcombine.high %v335_v53, %v343_v54  ;;  %v7213_v54 = vld [vmem:[#allocation6 + $0xe4] ss:$16 sps:$4 sm:$0xff]  }
 0x147   :  { %2005 = vmatprep.subr.bf16.mxu0 %v6355_v62  ;;  %2048 = vmatprep.subr.bf16.mxu1 %v6357_v63  ;;  %v351_v62 = vld [vmem:[#allocation2 + $0x7b0] sm:$0xff]  ;;  %v6485_v1 = vcombine.high %v336_v55, %v344_v58  ;;  %v6484_v4 = vcombine.low %v336_v55, %v344_v58  ;;  %v7208_v53 = vld [vmem:[#allocation6 + $0xc8] ss:$16 sps:$4 sm:$0xff]  }
 0x148   :  { %v359_v63 = vld [vmem:[#allocation2 + $0x7f0] sm:$0xff] }
 0x14a   :  { %2006 = vmatpush1.bf16.msra.mxu0 %v6354_v2  ;;  %2049 = vmatpush1.bf16.msra.mxu1 %v6356_v5  ;;  %v360_v2 = vld [vmem:[#allocation2 + $0x7f8] sm:$0xff]  ;;  %v6499_v5 = vcombine.high %v351_v62, %v359_v63 }
 0x14b   :  { %2007 = vmatprep.subr.bf16.mxu0 %v6371_v6  ;;  %2050 = vmatprep.subr.bf16.mxu1 %v6373_v7  ;;  %v6501_v6 = vcombine.high %v352_v0, %v360_v2  ;;  %v6498_v7 = vcombine.low %v351_v62, %v359_v63  ;;  %v6500_v8 = vcombine.low %v352_v0, %v360_v2  ;;  %v7216_v2 = vld [vmem:[#allocation6 + $0xec] ss:$16 sps:$4 sm:$0xff]  }
 0x14e   :  { %2008 = vmatpush1.bf16.msra.mxu0 %v6370_v11  ;;  %2051 = vmatpush1.bf16.msra.mxu1 %v6372_v12  ;;  %v7174_v11 = vld [vmem:[#allocation6 + $0xc] ss:$16 sps:$4 sm:$0xff]   ;;  %v7169_v12 = vld [vmem:[#allocation6] ss:$16 sps:$4 sm:$0xff]  }
 0x14f   :  { %2009 = vmatprep.subr.bf16.mxu0 %v6387_v13  ;;  %2052 = vmatprep.subr.bf16.mxu1 %v6389_v17  ;;  %v7172_v13 = vld [vmem:[#allocation6 + $0x8] ss:$16 sps:$4 sm:$0xff]  }
 0x150   :  { %v7178_v17 = vld [vmem:[#allocation6 + $0x28] ss:$16 sps:$4 sm:$0xff]  }
 0x152   :  { %2010 = vmatpush1.bf16.msra.mxu0 %v6386_v19  ;;  %2053 = vmatpush1.bf16.msra.mxu1 %v6388_v20  ;;  %v7186_v19 = vld [vmem:[#allocation6 + $0x4c] ss:$16 sps:$4 sm:$0xff]   ;;  %v7181_v20 = vld [vmem:[#allocation6 + $0x40] ss:$16 sps:$4 sm:$0xff]  }
 0x153   :  { %2011 = vmatprep.subr.bf16.mxu0 %v6403_v21  ;;  %2054 = vmatprep.subr.bf16.mxu1 %v6405_v26  ;;  %v365_v21 = vlaneseq  ;;  %v7192_v26 = vld [vmem:[#allocation6 + $0x6c] ss:$16 sps:$4 sm:$0xff]  }
 0x155   :  { %v8269_v27 = vshrl.u32 %v365_v21, 7  ;;  %v7237_v21 = vld [vmem:[#allocation6 + $0x164] ss:$16 sps:$4 sm:$0xff]  }
 0x156   :  { %2012 = vmatpush1.bf16.msra.mxu0 %v6402_v28  ;;  %2055 = vmatpush1.bf16.msra.mxu1 %v6404_v29  ;;  %v7195_v28 = vld [vmem:[#allocation6 + $0x84] ss:$16 sps:$4 sm:$0xff]   ;;  %v7198_v29 = vld [vmem:[#allocation6 + $0x8c] ss:$16 sps:$4 sm:$0xff]  }
 0x157   :  { %2013 = vmatprep.subr.bf16.mxu0 %v6419_v30  ;;  %2056 = vmatprep.subr.bf16.mxu1 %v6421_v10  ;;  %v7193_v30 = vld [vmem:[#allocation6 + $0x80] ss:$16 sps:$4 sm:$0xff]   ;;  %v8274_v33 = vsub.s32 0, %v8269_v27  ;;  %v8277_v10 = vsub.s32 2, %v8269_v27  ;;  %v8280_v34 = vsub.s32 3, %v8269_v27 }
 0x159   :  { %v368_v39 = vrot.slane %v8271_v31, %v8274_v33  ;;  %v376_v42 = vrot.slane %v8271_v31, %v8277_v10 }
 0x15a   :  { %2014 = vmatpush1.bf16.msra.mxu0 %v6418_v35  ;;  %2057 = vmatpush1.bf16.msra.mxu1 %v6420_v36  ;;  %v7201_v35 = vld [vmem:[#allocation6 + $0xa4] ss:$16 sps:$4 sm:$0xff]   ;;  %v7204_v36 = vld [vmem:[#allocation6 + $0xac] ss:$16 sps:$4 sm:$0xff]  }
 0x15b   :  { %2015 = vmatprep.subr.bf16.mxu0 %v6435_v37  ;;  %2058 = vmatprep.subr.bf16.mxu1 %v6437_v41  ;;  %v8283_v37 = vsub.s32 1, %v8269_v27  ;;  %v7207_v41 = vld [vmem:[#allocation6 + $0xc4] ss:$16 sps:$4 sm:$0xff]  }
 0x15d   :  { %v372_v45 = vrot.slane %v8271_v31, %v8283_v37 }
 0x15e   :  { %2016 = vmatpush1.bf16.msra.mxu0 %v6434_v43  ;;  %2059 = vmatpush1.bf16.msra.mxu1 %v6436_v56  ;;  %v380_v43 = vrot.slane %v8271_v31, %v8280_v34  ;;  %v7210_v56 = vld [vmem:[#allocation6 + $0xcc] ss:$16 sps:$4 sm:$0xff]  }
 0x15f   :  { %2017 = vmatprep.subr.bf16.mxu0 %v6451_v44  ;;  %2060 = vmatprep.subr.bf16.mxu1 %v6453_v48 }
 0x162   :  { %2018 = vmatpush1.bf16.msra.mxu0 %v6450_v50  ;;  %2061 = vmatpush1.bf16.msra.mxu1 %v6452_v51 }
 0x163   :  { %2019 = vmatprep.subr.bf16.mxu0 %v6467_v52  ;;  %2062 = vmatprep.subr.bf16.mxu1 %v6469_v57 }
 0x166   :  { %2020 = vmatpush1.bf16.msra.mxu0 %v6466_v59  ;;  %2063 = vmatpush1.bf16.msra.mxu1 %v6468_v60 }
 0x167   :  { %2021 = vmatprep.subr.bf16.mxu0 %v6483_v61  ;;  %2064 = vmatprep.subr.bf16.mxu1 %v6485_v1 }
 0x16a   :  { %2022 = vmatpush1.bf16.msra.mxu0 %v6482_v3  ;;  %2065 = vmatpush1.bf16.msra.mxu1 %v6484_v4 }
 0x16b   :  { %2023 = vmatprep.subr.bf16.mxu0 %v6499_v5  ;;  %2066 = vmatprep.subr.bf16.mxu1 %v6501_v6  ;;  %v7211_v5 = vld [vmem:[#allocation6 + $0xe0] ss:$16 sps:$4 sm:$0xff]  }
 0x16e   :  { %2024 = vmatpush1.bf16.msra.mxu0 %v6498_v7  ;;  %2067 = vmatpush1.bf16.msra.mxu1 %v6500_v8  ;;  %v7214_v7 = vld [vmem:[#allocation6 + $0xe8] ss:$16 sps:$4 sm:$0xff]   ;;  %v7219_v8 = vld [vmem:[#allocation6 + $0x104] ss:$16 sps:$4 sm:$0xff]  }
 0x16f   :  { %5189 = vmatprep.subr.bf16.mxu0 %v7171_v9  ;;  %5533 = vmatprep.subr.bf16.mxu1 %v7174_v11  ;;  %v7217_v9 = vld [vmem:[#allocation6 + $0x100] ss:$16 sps:$4 sm:$0xff]   ;;  %v7222_v11 = vld [vmem:[#allocation6 + $0x10c] ss:$16 sps:$4 sm:$0xff]  }
 0x171   :  { %2026 = vmatmul.mubr.bf16.vlgmr.msra.gmra.mrb[12].mxu0 %v8260_v23  ;;  %2069 = vmatmul.mubr.bf16.vlgmr.msra.gmra.mrb[12].mxu1 %v8260_v23  ;;  %v7190_v23 = vld [vmem:[#allocation6 + $0x68] ss:$16 sps:$4 sm:$0xff]  }
 0x172   :  { %5190 = vmatpush1.bf16.msra.mxu0 %v7169_v12  ;;  %5534 = vmatpush1.bf16.msra.mxu1 %v7172_v13  ;;  %v7220_v12 = vld [vmem:[#allocation6 + $0x108] ss:$16 sps:$4 sm:$0xff]   ;;  %v7225_v13 = vld [vmem:[#allocation6 + $0x124] ss:$16 sps:$4 sm:$0xff]  }
 0x173   :  { %5191 = vmatprep.subr.bf16.mxu0 %v7177_v14  ;;  %5535 = vmatprep.subr.bf16.mxu1 %v7180_v15  ;;  %v7223_v14 = vld [vmem:[#allocation6 + $0x120] ss:$16 sps:$4 sm:$0xff]   ;;  %v7228_v15 = vld [vmem:[#allocation6 + $0x12c] ss:$16 sps:$4 sm:$0xff]  }
 0x176   :  { %5192 = vmatpush1.bf16.msra.mxu0 %v7175_v16  ;;  %5536 = vmatpush1.bf16.msra.mxu1 %v7178_v17  ;;  %v7226_v16 = vld [vmem:[#allocation6 + $0x128] ss:$16 sps:$4 sm:$0xff]   ;;  %v7231_v17 = vld [vmem:[#allocation6 + $0x144] ss:$16 sps:$4 sm:$0xff]  }
 0x177   :  { %5193 = vmatprep.subr.bf16.mxu0 %v7183_v18  ;;  %5537 = vmatprep.subr.bf16.mxu1 %v7186_v19  ;;  %v7229_v18 = vld [vmem:[#allocation6 + $0x140] ss:$16 sps:$4 sm:$0xff]   ;;  %v7234_v19 = vld [vmem:[#allocation6 + $0x14c] ss:$16 sps:$4 sm:$0xff]  }
 0x17a   :  { %5194 = vmatpush1.bf16.msra.mxu0 %v7181_v20  ;;  %5538 = vmatpush1.bf16.msra.mxu1 %v7184_v22  ;;  %v7232_v20 = vld [vmem:[#allocation6 + $0x148] ss:$16 sps:$4 sm:$0xff]   ;;  %v7235_v22 = vld [vmem:[#allocation6 + $0x160] ss:$16 sps:$4 sm:$0xff]  }
 0x17b   :  { %5195 = vmatprep.subr.bf16.mxu0 %v7189_v24  ;;  %5539 = vmatprep.subr.bf16.mxu1 %v7192_v26  ;;  %v7240_v24 = vld [vmem:[#allocation6 + $0x16c] ss:$16 sps:$4 sm:$0xff]   ;;  %v7243_v26 = vld [vmem:[#allocation6 + $0x184] ss:$16 sps:$4 sm:$0xff]  }
 0x17e   :  { %5196 = vmatpush1.bf16.msra.mxu0 %v7187_v25  ;;  %5540 = vmatpush1.bf16.msra.mxu1 %v7190_v23  ;;  %v7238_v25 = vld [vmem:[#allocation6 + $0x168] ss:$16 sps:$4 sm:$0xff]   ;;  %v7241_v23 = vld [vmem:[#allocation6 + $0x180] ss:$16 sps:$4 sm:$0xff]  }
 0x17f   :  { %5197 = vmatprep.subr.bf16.mxu0 %v7195_v28  ;;  %5541 = vmatprep.subr.bf16.mxu1 %v7198_v29  ;;  %v7246_v28 = vld [vmem:[#allocation6 + $0x18c] ss:$16 sps:$4 sm:$0xff]   ;;  %v7244_v29 = vld [vmem:[#allocation6 + $0x188] ss:$16 sps:$4 sm:$0xff]  }
 0x182   :  { %5198 = vmatpush1.bf16.msra.mxu0 %v7193_v30  ;;  %5542 = vmatpush1.bf16.msra.mxu1 %v7196_v32  ;;  %v7249_v30 = vld [vmem:[#allocation6 + $0x1a4] ss:$16 sps:$4 sm:$0xff]   ;;  %v7247_v32 = vld [vmem:[#allocation6 + $0x1a0] ss:$16 sps:$4 sm:$0xff]  }
 0x183   :  { %5199 = vmatprep.subr.bf16.mxu0 %v7201_v35  ;;  %5543 = vmatprep.subr.bf16.mxu1 %v7204_v36  ;;  %v7252_v35 = vld [vmem:[#allocation6 + $0x1ac] ss:$16 sps:$4 sm:$0xff]   ;;  %v7250_v36 = vld [vmem:[#allocation6 + $0x1a8] ss:$16 sps:$4 sm:$0xff]  }
 0x184   :  { %v1769_v44 = vpop.f32.mrb[0].mxu0  ;;  %v1812_v47 = vpop.f32.mrb[0].mxu1 }
 0x185   :  { %v1770_v46 = vadd.f32 %v1769_v44, %v368_v39  ;;  %v1771_v48 = vpop.f32.mrb[1].mxu0  ;;  %v1813_v50 = vadd.f32 %v1812_v47, %v376_v42  ;;  %v1814_v51 = vpop.f32.mrb[1].mxu1  ;;  %v7262_v44 = vld [vmem:[#allocation6 + $0x1e8] ss:$16 sps:$4 sm:$0xff]   ;;  %v7265_v47 = vld [vmem:[#allocation6 + $0x200] ss:$16 sps:$4 sm:$0xff]  }
 0x186   :  { %v1773_v52 = vpop.f32.mrb[2].mxu0  ;;  %5200 = vmatpush1.bf16.msra.mxu0 %v7199_v38  ;;  %v1815_v55 = vadd.f32 %v1814_v51, %v380_v43  ;;  %v1816_v58 = vpop.f32.mrb[2].mxu1  ;;  %5544 = vmatpush1.bf16.msra.mxu1 %v7202_v40  ;;  %v1772_v60 = vadd.f32 %v1771_v48, %v372_v45  ;;  %v7255_v38 = vld [vmem:[#allocation6 + $0x1c4] ss:$16 sps:$4 sm:$0xff]   ;;  %v7258_v40 = vld [vmem:[#allocation6 + $0x1cc] ss:$16 sps:$4 sm:$0xff]  }
 0x187   :  { %v1774_v57 = vadd.f32 %v1773_v52, %v368_v39  ;;  %v1775_v59 = vpop.f32.mrb[3].mxu0  ;;  %5201 = vmatprep.subr.bf16.mxu0 %v7207_v41  ;;  %v1817_v61 = vadd.f32 %v1816_v58, %v376_v42  ;;  %v1818_v63 = vpop.f32.mrb[3].mxu1  ;;  %5545 = vmatprep.subr.bf16.mxu1 %v7210_v56  ;;  %v7253_v39 = vld [vmem:[#allocation6 + $0x1c0] ss:$16 sps:$4 sm:$0xff]   ;;  %v7256_v41 = vld [vmem:[#allocation6 + $0x1c8] ss:$16 sps:$4 sm:$0xff]  }
 0x188   :  { %v1776_v62 = vadd.f32 %v1775_v59, %v372_v45  ;;  %v1819_v1 = vadd.f32 %v1818_v63, %v380_v43  ;;  %v7261_v42 = vld [vmem:[#allocation6 + $0x1e4] ss:$16 sps:$4 sm:$0xff]   ;;  %v7259_v43 = vld [vmem:[#allocation6 + $0x1e0] ss:$16 sps:$4 sm:$0xff]   ;;  %v7264_v56 = vld [vmem:[#allocation6 + $0x1ec] ss:$16 sps:$4 sm:$0xff]  }
 0x189   :  { %v8293_v0 = vpack.c.bf16 %v1774_v57, %v1770_v46  ;;  %v8295_v3 = vpack.c.bf16 %v1817_v61, %v1813_v50  ;;  %v7267_v45 = vld [vmem:[#allocation6 + $0x204] ss:$16 sps:$4 sm:$0xff]   ;;  %v7270_v46 = vld [vmem:[#allocation6 + $0x20c] ss:$16 sps:$4 sm:$0xff]   ;;  %v7268_v48 = vld [vmem:[#allocation6 + $0x208] ss:$16 sps:$4 sm:$0xff]  }
 0x18a   :  { %v2080_v4 = vpack.c.bf16 %v1776_v62, %v1772_v60  ;;  %5202 = vmatpush1.bf16.msra.mxu0 %v7205_v49  ;;  %v8297_v6 = vpack.c.bf16 %v1819_v1, %v1815_v55  ;;  %5546 = vmatpush1.bf16.msra.mxu1 %v7208_v53  ;;  %v7273_v49 = vld [vmem:[#allocation6 + $0x224] ss:$16 sps:$4 sm:$0xff]   ;;  %v7271_v50 = vld [vmem:[#allocation6 + $0x220] ss:$16 sps:$4 sm:$0xff]   ;;  %v7274_v51 = vld [vmem:[#allocation6 + $0x228] ss:$16 sps:$4 sm:$0xff]  }
 0x18b   :  { %5203 = vmatprep.subr.bf16.mxu0 %v7213_v54  ;;  %5547 = vmatprep.subr.bf16.mxu1 %v7216_v2  ;;  %v7276_v52 = vld [vmem:[#allocation6 + $0x22c] ss:$16 sps:$4 sm:$0xff]   ;;  %v7279_v53 = vld [vmem:[#allocation6 + $0x244] ss:$16 sps:$4 sm:$0xff]   ;;  %v7277_v55 = vld [vmem:[#allocation6 + $0x240] ss:$16 sps:$4 sm:$0xff]  }
 0x18c   :  { %5221 = vmatprep.mubr.bf16.mxu0 %v2080_v4  ;;  %5565 = vmatprep.mubr.bf16.mxu1 %v2080_v4  ;;  %v7282_v54 = vld [vmem:[#allocation6 + $0x24c] ss:$16 sps:$4 sm:$0xff]   ;;  %v7280_v57 = vld [vmem:[#allocation6 + $0x248] ss:$16 sps:$4 sm:$0xff]   ;;  %v7285_v58 = vld [vmem:[#allocation6 + $0x264] ss:$16 sps:$4 sm:$0xff]  }
 0x18d   :  { %v7283_v59 = vld [vmem:[#allocation6 + $0x260] ss:$16 sps:$4 sm:$0xff]   ;;  %v7288_v60 = vld [vmem:[#allocation6 + $0x26c] ss:$16 sps:$4 sm:$0xff]   ;;  %v7286_v61 = vld [vmem:[#allocation6 + $0x268] ss:$16 sps:$4 sm:$0xff]  }
 0x18e   :  { %5204 = vmatpush1.bf16.msra.mxu0 %v7211_v5  ;;  %5548 = vmatpush1.bf16.msra.mxu1 %v7214_v7  ;;  %v7291_v62 = vld [vmem:[#allocation6 + $0x284] ss:$16 sps:$4 sm:$0xff]   ;;  %v7294_v63 = vld [vmem:[#allocation6 + $0x28c] ss:$16 sps:$4 sm:$0xff]   ;;  %v383_v1 = vsub.s32 4, %v8269_v27  ;;  %v391_v2 = vsub.s32 6, %v8269_v27 }
 0x18f   :  { %5205 = vmatprep.subr.bf16.mxu0 %v7219_v8  ;;  %5549 = vmatprep.subr.bf16.mxu1 %v7222_v11  ;;  %v7292_v4 = vld [vmem:[#allocation6 + $0x288] ss:$16 sps:$4 sm:$0xff]   ;;  %v387_v5 = vsub.s32 5, %v8269_v27  ;;  %v7297_v7 = vld [vmem:[#allocation6 + $0x2a4] ss:$16 sps:$4 sm:$0xff]  }
 0x190   :  { %v7300_v8 = vld [vmem:[#allocation6 + $0x2ac] ss:$16 sps:$4 sm:$0xff]   ;;  %v384_v11 = vrot.slane %v8271_v31, %v383_v1 }
 0x192   :  { %5206 = vmatpush1.bf16.msra.mxu0 %v7217_v9  ;;  %5550 = vmatpush1.bf16.msra.mxu1 %v7220_v12  ;;  %v7295_v9 = vld [vmem:[#allocation6 + $0x2a0] ss:$16 sps:$4 sm:$0xff]   ;;  %v7298_v12 = vld [vmem:[#allocation6 + $0x2a8] ss:$16 sps:$4 sm:$0xff]  }
 0x193   :  { %5207 = vmatprep.subr.bf16.mxu0 %v7225_v13  ;;  %5551 = vmatprep.subr.bf16.mxu1 %v7228_v15  ;;  %v7303_v13 = vld [vmem:[#allocation6 + $0x2c4] ss:$16 sps:$4 sm:$0xff]   ;;  %v7306_v15 = vld [vmem:[#allocation6 + $0x2cc] ss:$16 sps:$4 sm:$0xff]  }
 0x196   :  { %5208 = vmatpush1.bf16.msra.mxu0 %v7223_v14  ;;  %5552 = vmatpush1.bf16.msra.mxu1 %v7226_v16  ;;  %v392_v14 = vrot.slane %v8271_v31, %v391_v2 }
 0x197   :  { %5209 = vmatprep.subr.bf16.mxu0 %v7231_v17  ;;  %5553 = vmatprep.subr.bf16.mxu1 %v7234_v19 }
 0x19a   :  { %5210 = vmatpush1.bf16.msra.mxu0 %v7229_v18  ;;  %5554 = vmatpush1.bf16.msra.mxu1 %v7232_v20  ;;  %v388_v18 = vrot.slane %v8271_v31, %v387_v5 }
 0x19b   :  { %5211 = vmatprep.subr.bf16.mxu0 %v7237_v21  ;;  %5555 = vmatprep.subr.bf16.mxu1 %v7240_v24  ;;  %v7304_v24 = vld [vmem:[#allocation6 + $0x2c8] ss:$16 sps:$4 sm:$0xff]  }
 0x19e   :  { %5212 = vmatpush1.bf16.msra.mxu0 %v7235_v22  ;;  %5556 = vmatpush1.bf16.msra.mxu1 %v7238_v25  ;;  %v7301_v22 = vld [vmem:[#allocation6 + $0x2c0] ss:$16 sps:$4 sm:$0xff]  }
 0x19f   :  { %5213 = vmatprep.subr.bf16.mxu0 %v7243_v26  ;;  %5557 = vmatprep.subr.bf16.mxu1 %v7246_v28  ;;  %v7309_v28 = vld [vmem:[#allocation6 + $0x2e4] ss:$16 sps:$4 sm:$0xff]  }
 0x1a2   :  { %5214 = vmatpush1.bf16.msra.mxu0 %v7241_v23  ;;  %5558 = vmatpush1.bf16.msra.mxu1 %v7244_v29  ;;  %v7312_v29 = vld [vmem:[#allocation6 + $0x2ec] ss:$16 sps:$4 sm:$0xff]  }
 0x1a3   :  { %5215 = vmatprep.subr.bf16.mxu0 %v7249_v30  ;;  %5559 = vmatprep.subr.bf16.mxu1 %v7252_v35 }
 0x1a6   :  { %5216 = vmatpush1.bf16.msra.mxu0 %v7247_v32  ;;  %5560 = vmatpush1.bf16.msra.mxu1 %v7250_v36 }
 0x1a7   :  { %5217 = vmatprep.subr.bf16.mxu0 %v7255_v38  ;;  %5561 = vmatprep.subr.bf16.mxu1 %v7258_v40 }
 0x1aa   :  { %5218 = vmatpush1.bf16.msra.mxu0 %v7253_v39  ;;  %5562 = vmatpush1.bf16.msra.mxu1 %v7256_v41 }
 0x1ab   :  { %5219 = vmatprep.subr.bf16.mxu0 %v7261_v42  ;;  %5563 = vmatprep.subr.bf16.mxu1 %v7264_v56 }
 0x1ae   :  { %5220 = vmatpush1.bf16.msra.mxu0 %v7259_v43  ;;  %5564 = vmatpush1.bf16.msra.mxu1 %v7262_v44  ;;  %v7307_v44 = vld [vmem:[#allocation6 + $0x2e0] ss:$16 sps:$4 sm:$0xff]  }
 0x1af   :  { %5232 = vmatprep.subr.bf16.mxu0 %v7267_v45  ;;  %5576 = vmatprep.subr.bf16.mxu1 %v7270_v46  ;;  %v7310_v46 = vld [vmem:[#allocation6 + $0x2e8] ss:$16 sps:$4 sm:$0xff]  }
 0x1b1   :  { %5222 = vmatmul.mubr.bf16.vlgmr.msra.gmra.mrb[16].mxu0 %v8293_v0  ;;  %5566 = vmatmul.mubr.bf16.vlgmr.msra.gmra.mrb[16].mxu1 %v8293_v0  ;;  %v7289_v0 = vld [vmem:[#allocation6 + $0x280] ss:$16 sps:$4 sm:$0xff]  }
 0x1b2   :  { %5233 = vmatpush1.bf16.msra.mxu0 %v7265_v47  ;;  %5264 = vmatprep.mubr.bf16.mxu0 %v8297_v6  ;;  %v7315_v47 = vld [vmem:[#allocation6 + $0x304] ss:$16 sps:$4 sm:$0xff]  }
 0x1b3   :  { %5577 = vmatpush1.bf16.msra.mxu1 %v7268_v48  ;;  %5608 = vmatprep.mubr.bf16.mxu1 %v8297_v6  ;;  %v395_v6 = vsub.s32 7, %v8269_v27  ;;  %v7313_v48 = vld [vmem:[#allocation6 + $0x300] ss:$16 sps:$4 sm:$0xff]   ;;  %v7501_v27 = vld [vmem:[#allocation6 + $0x6e4] ss:$16 sps:$4 sm:$0xff]  }
 0x1b4   :  { %5234 = vmatprep.subr.bf16.mxu0 %v7273_v49  ;;  %5578 = vmatprep.subr.bf16.mxu1 %v7276_v52  ;;  %v7318_v49 = vld [vmem:[#allocation6 + $0x30c] ss:$16 sps:$4 sm:$0xff]   ;;  %v7319_v52 = vld [vmem:[#allocation6 + $0x320] ss:$16 sps:$4 sm:$0xff]  }
 0x1b5   :  { %v396_v16 = vrot.slane %v8271_v31, %v395_v6 }
 0x1b6   :  { %5235 = vmatpush1.bf16.msra.mxu0 %v7271_v50  ;;  %v7316_v50 = vld [vmem:[#allocation6 + $0x308] ss:$16 sps:$4 sm:$0xff]  }
 0x1b7   :  { %5579 = vmatpush1.bf16.msra.mxu1 %v7274_v51  ;;  %5236 = vmatprep.subr.bf16.mxu0 %v7279_v53  ;;  %v7321_v51 = vld [vmem:[#allocation6 + $0x324] ss:$16 sps:$4 sm:$0xff]   ;;  %v7324_v53 = vld [vmem:[#allocation6 + $0x32c] ss:$16 sps:$4 sm:$0xff]  }
 0x1b8   :  { %5580 = vmatprep.subr.bf16.mxu1 %v7282_v54  ;;  %v7322_v54 = vld [vmem:[#allocation6 + $0x328] ss:$16 sps:$4 sm:$0xff]  }
 0x1ba   :  { %5237 = vmatpush1.bf16.msra.mxu0 %v7277_v55  ;;  %v7327_v55 = vld [vmem:[#allocation6 + $0x344] ss:$16 sps:$4 sm:$0xff]  }
 0x1bb   :  { %5581 = vmatpush1.bf16.msra.mxu1 %v7280_v57  ;;  %5238 = vmatprep.subr.bf16.mxu0 %v7285_v58  ;;  %v7330_v57 = vld [vmem:[#allocation6 + $0x34c] ss:$16 sps:$4 sm:$0xff]   ;;  %v7325_v58 = vld [vmem:[#allocation6 + $0x340] ss:$16 sps:$4 sm:$0xff]  }
 0x1bc   :  { %5582 = vmatprep.subr.bf16.mxu1 %v7288_v60  ;;  %v7333_v60 = vld [vmem:[#allocation6 + $0x364] ss:$16 sps:$4 sm:$0xff]  }
 0x1be   :  { %5239 = vmatpush1.bf16.msra.mxu0 %v7283_v59  ;;  %v7328_v59 = vld [vmem:[#allocation6 + $0x348] ss:$16 sps:$4 sm:$0xff]  }
 0x1bf   :  { %5583 = vmatpush1.bf16.msra.mxu1 %v7286_v61  ;;  %5240 = vmatprep.subr.bf16.mxu0 %v7291_v62  ;;  %v7336_v61 = vld [vmem:[#allocation6 + $0x36c] ss:$16 sps:$4 sm:$0xff]   ;;  %v7331_v62 = vld [vmem:[#allocation6 + $0x360] ss:$16 sps:$4 sm:$0xff]  }
 0x1c0   :  { %5584 = vmatprep.subr.bf16.mxu1 %v7294_v63  ;;  %v7334_v63 = vld [vmem:[#allocation6 + $0x368] ss:$16 sps:$4 sm:$0xff]  }
 0x1c2   :  { %5241 = vmatpush1.bf16.msra.mxu0 %v7289_v0  ;;  %v7339_v0 = vld [vmem:[#allocation6 + $0x384] ss:$16 sps:$4 sm:$0xff]  }
 0x1c3   :  { %5585 = vmatpush1.bf16.msra.mxu1 %v7292_v4  ;;  %5242 = vmatprep.subr.bf16.mxu0 %v7297_v7  ;;  %v7342_v4 = vld [vmem:[#allocation6 + $0x38c] ss:$16 sps:$4 sm:$0xff]   ;;  %v7337_v7 = vld [vmem:[#allocation6 + $0x380] ss:$16 sps:$4 sm:$0xff]  }
 0x1c4   :  { %v1855_v17 = vpop.f32.mrb[4].mxu0  ;;  %5586 = vmatprep.subr.bf16.mxu1 %v7300_v8  ;;  %v1898_v20 = vpop.f32.mrb[4].mxu1  ;;  %v7340_v8 = vld [vmem:[#allocation6 + $0x388] ss:$16 sps:$4 sm:$0xff]  }
 0x1c5   :  { %v1856_v19 = vadd.f32 %v1855_v17, %v384_v11  ;;  %v1857_v21 = vpop.f32.mrb[5].mxu0  ;;  %v1899_v25 = vadd.f32 %v1898_v20, %v392_v14  ;;  %v1900_v26 = vpop.f32.mrb[5].mxu1  ;;  %v7352_v17 = vld [vmem:[#allocation6 + $0x3c8] ss:$16 sps:$4 sm:$0xff]   ;;  %v7355_v20 = vld [vmem:[#allocation6 + $0x3e0] ss:$16 sps:$4 sm:$0xff]  }
 0x1c6   :  { %v1859_v23 = vpop.f32.mrb[6].mxu0  ;;  %5243 = vmatpush1.bf16.msra.mxu0 %v7295_v9  ;;  %v1901_v30 = vadd.f32 %v1900_v26, %v396_v16  ;;  %v1902_v35 = vpop.f32.mrb[6].mxu1  ;;  %v1858_v38 = vadd.f32 %v1857_v21, %v388_v18  ;;  %v7345_v9 = vld [vmem:[#allocation6 + $0x3a4] ss:$16 sps:$4 sm:$0xff]   ;;  %v7358_v21 = vld [vmem:[#allocation6 + $0x3e8] ss:$16 sps:$4 sm:$0xff]  }
 0x1c7   :  { %v1860_v32 = vadd.f32 %v1859_v23, %v384_v11  ;;  %5587 = vmatpush1.bf16.msra.mxu1 %v7298_v12  ;;  %v1861_v36 = vpop.f32.mrb[7].mxu0  ;;  %5244 = vmatprep.subr.bf16.mxu0 %v7303_v13  ;;  %v1903_v31 = vadd.f32 %v1902_v35, %v392_v14  ;;  %v1904_v40 = vpop.f32.mrb[7].mxu1  ;;  %v7348_v11 = vld [vmem:[#allocation6 + $0x3ac] ss:$16 sps:$4 sm:$0xff]   ;;  %v7343_v12 = vld [vmem:[#allocation6 + $0x3a0] ss:$16 sps:$4 sm:$0xff]  }
 0x1c8   :  { %v1862_v39 = vadd.f32 %v1861_v36, %v388_v18  ;;  %5588 = vmatprep.subr.bf16.mxu1 %v7306_v15  ;;  %v1905_v42 = vadd.f32 %v1904_v40, %v396_v16  ;;  %v7346_v13 = vld [vmem:[#allocation6 + $0x3a8] ss:$16 sps:$4 sm:$0xff]   ;;  %v7351_v14 = vld [vmem:[#allocation6 + $0x3c4] ss:$16 sps:$4 sm:$0xff]   ;;  %v7354_v15 = vld [vmem:[#allocation6 + $0x3cc] ss:$16 sps:$4 sm:$0xff]  }
 0x1c9   :  { %v8319_v41 = vpack.c.bf16 %v1860_v32, %v1856_v19  ;;  %v8321_v43 = vpack.c.bf16 %v1903_v31, %v1899_v25  ;;  %v7349_v16 = vld [vmem:[#allocation6 + $0x3c0] ss:$16 sps:$4 sm:$0xff]   ;;  %v7357_v18 = vld [vmem:[#allocation6 + $0x3e4] ss:$16 sps:$4 sm:$0xff]   ;;  %v7360_v19 = vld [vmem:[#allocation6 + $0x3ec] ss:$16 sps:$4 sm:$0xff]  }
 0x1ca   :  { %v8323_v56 = vpack.c.bf16 %v1862_v39, %v1858_v38  ;;  %5245 = vmatpush1.bf16.msra.mxu0 %v7301_v22  ;;  %v8325_v45 = vpack.c.bf16 %v1905_v42, %v1901_v30  ;;  %v7363_v22 = vld [vmem:[#allocation6 + $0x404] ss:$16 sps:$4 sm:$0xff]   ;;  %v7361_v25 = vld [vmem:[#allocation6 + $0x400] ss:$16 sps:$4 sm:$0xff]   ;;  %v7364_v26 = vld [vmem:[#allocation6 + $0x408] ss:$16 sps:$4 sm:$0xff]  }
 0x1cb   :  { %5589 = vmatpush1.bf16.msra.mxu1 %v7304_v24  ;;  %5246 = vmatprep.subr.bf16.mxu0 %v7309_v28  ;;  %v7366_v24 = vld [vmem:[#allocation6 + $0x40c] ss:$16 sps:$4 sm:$0xff]   ;;  %v7369_v23 = vld [vmem:[#allocation6 + $0x424] ss:$16 sps:$4 sm:$0xff]   ;;  %v7370_v30 = vld [vmem:[#allocation6 + $0x428] ss:$16 sps:$4 sm:$0xff]  }
 0x1cc   :  { %5590 = vmatprep.subr.bf16.mxu1 %v7312_v29  ;;  %v7372_v28 = vld [vmem:[#allocation6 + $0x42c] ss:$16 sps:$4 sm:$0xff]   ;;  %v7367_v29 = vld [vmem:[#allocation6 + $0x420] ss:$16 sps:$4 sm:$0xff]   ;;  %v7375_v32 = vld [vmem:[#allocation6 + $0x444] ss:$16 sps:$4 sm:$0xff]  }
 0x1cd   :  { %v7378_v35 = vld [vmem:[#allocation6 + $0x44c] ss:$16 sps:$4 sm:$0xff]   ;;  %v7373_v36 = vld [vmem:[#allocation6 + $0x440] ss:$16 sps:$4 sm:$0xff]   ;;  %v7376_v38 = vld [vmem:[#allocation6 + $0x448] ss:$16 sps:$4 sm:$0xff]  }
 0x1ce   :  { %5247 = vmatpush1.bf16.msra.mxu0 %v7307_v44  ;;  %v7381_v31 = vld [vmem:[#allocation6 + $0x464] ss:$16 sps:$4 sm:$0xff]   ;;  %v7379_v39 = vld [vmem:[#allocation6 + $0x460] ss:$16 sps:$4 sm:$0xff]   ;;  %v7382_v40 = vld [vmem:[#allocation6 + $0x468] ss:$16 sps:$4 sm:$0xff]  }
 0x1cf   :  { %5591 = vmatpush1.bf16.msra.mxu1 %v7310_v46  ;;  %5248 = vmatprep.subr.bf16.mxu0 %v7315_v47  ;;  %v7387_v42 = vld [vmem:[#allocation6 + $0x484] ss:$16 sps:$4 sm:$0xff]   ;;  %v7390_v44 = vld [vmem:[#allocation6 + $0x48c] ss:$16 sps:$4 sm:$0xff]   ;;  %v7388_v47 = vld [vmem:[#allocation6 + $0x488] ss:$16 sps:$4 sm:$0xff]  }
 0x1d0   :  { %5592 = vmatprep.subr.bf16.mxu1 %v7318_v49  ;;  %v8331_v46 = vld [vmem:[#allocation4 + $0x8] sm:$0xff] }
 0x1d1   :  { %v7396_v49 = vld [vmem:[#allocation6 + $0x4ac] ss:$16 sps:$4 sm:$0xff]  }
 0x1d2   :  { %5249 = vmatpush1.bf16.msra.mxu0 %v7313_v48  ;;  %v7393_v48 = vld [vmem:[#allocation6 + $0x4a4] ss:$16 sps:$4 sm:$0xff]  }
 0x1d3   :  { %5593 = vmatpush1.bf16.msra.mxu1 %v7316_v50  ;;  %5250 = vmatprep.subr.bf16.mxu0 %v7321_v51  ;;  %v400_v50 = vrot.slane %v8331_v46, %v8274_v33  ;;  %v408_v51 = vrot.slane %v8331_v46, %v8277_v10 }
 0x1d4   :  { %5594 = vmatprep.subr.bf16.mxu1 %v7324_v53  ;;  %v412_v53 = vrot.slane %v8331_v46, %v8280_v34 }
 0x1d6   :  { %5251 = vmatpush1.bf16.msra.mxu0 %v7319_v52  ;;  %v7391_v52 = vld [vmem:[#allocation6 + $0x4a0] ss:$16 sps:$4 sm:$0xff]  }
 0x1d7   :  { %5595 = vmatpush1.bf16.msra.mxu1 %v7322_v54  ;;  %5252 = vmatprep.subr.bf16.mxu0 %v7327_v55  ;;  %v7394_v54 = vld [vmem:[#allocation6 + $0x4a8] ss:$16 sps:$4 sm:$0xff]   ;;  %v7399_v55 = vld [vmem:[#allocation6 + $0x4c4] ss:$16 sps:$4 sm:$0xff]  }
 0x1d8   :  { %5596 = vmatprep.subr.bf16.mxu1 %v7330_v57 }
 0x1da   :  { %5253 = vmatpush1.bf16.msra.mxu0 %v7325_v58  ;;  %v404_v58 = vrot.slane %v8331_v46, %v8283_v37 }
 0x1db   :  { %5597 = vmatpush1.bf16.msra.mxu1 %v7328_v59  ;;  %5254 = vmatprep.subr.bf16.mxu0 %v7333_v60  ;;  %v7402_v59 = vld [vmem:[#allocation6 + $0x4cc] ss:$16 sps:$4 sm:$0xff]  }
 0x1dc   :  { %5598 = vmatprep.subr.bf16.mxu1 %v7336_v61 }
 0x1de   :  { %5255 = vmatpush1.bf16.msra.mxu0 %v7331_v62 }
 0x1df   :  { %5599 = vmatpush1.bf16.msra.mxu1 %v7334_v63  ;;  %5256 = vmatprep.subr.bf16.mxu0 %v7339_v0 }
 0x1e0   :  { %5600 = vmatprep.subr.bf16.mxu1 %v7342_v4 }
 0x1e2   :  { %5257 = vmatpush1.bf16.msra.mxu0 %v7337_v7  ;;  %v7397_v7 = vld [vmem:[#allocation6 + $0x4c0] ss:$16 sps:$4 sm:$0xff]  }
 0x1e3   :  { %5601 = vmatpush1.bf16.msra.mxu1 %v7340_v8  ;;  %5258 = vmatprep.subr.bf16.mxu0 %v7345_v9 }
 0x1e4   :  { %5602 = vmatprep.subr.bf16.mxu1 %v7348_v11 }
 0x1e6   :  { %5259 = vmatpush1.bf16.msra.mxu0 %v7343_v12 }
 0x1e7   :  { %5603 = vmatpush1.bf16.msra.mxu1 %v7346_v13  ;;  %5260 = vmatprep.subr.bf16.mxu0 %v7351_v14  ;;  %v7400_v13 = vld [vmem:[#allocation6 + $0x4c8] ss:$16 sps:$4 sm:$0xff]   ;;  %v7405_v14 = vld [vmem:[#allocation6 + $0x4e4] ss:$16 sps:$4 sm:$0xff]  }
 0x1e8   :  { %5604 = vmatprep.subr.bf16.mxu1 %v7354_v15 }
 0x1ea   :  { %5261 = vmatpush1.bf16.msra.mxu0 %v7349_v16 }
 0x1eb   :  { %5605 = vmatpush1.bf16.msra.mxu1 %v7352_v17  ;;  %5262 = vmatprep.subr.bf16.mxu0 %v7357_v18 }
 0x1ec   :  { %5606 = vmatprep.subr.bf16.mxu1 %v7360_v19  ;;  %v7408_v19 = vld [vmem:[#allocation6 + $0x4ec] ss:$16 sps:$4 sm:$0xff]  }
 0x1ee   :  { %5263 = vmatpush1.bf16.msra.mxu0 %v7355_v20 }
 0x1ef   :  { %5607 = vmatpush1.bf16.msra.mxu1 %v7358_v21  ;;  %5275 = vmatprep.subr.bf16.mxu0 %v7363_v22 }
 0x1f0   :  { %5619 = vmatprep.subr.bf16.mxu1 %v7366_v24 }
 0x1f1   :  { %5265 = vmatmul.mubr.bf16.vlgmr.msra.gmra.mrb[16].mxu0 %v8295_v3 }
 0x1f2   :  { %5609 = vmatmul.mubr.bf16.vlgmr.msra.gmra.mrb[16].mxu1 %v8295_v3  ;;  %5276 = vmatpush1.bf16.msra.mxu0 %v7361_v25  ;;  %v7384_v3 = vld [vmem:[#allocation6 + $0x46c] ss:$16 sps:$4 sm:$0xff]   ;;  %v7403_v25 = vld [vmem:[#allocation6 + $0x4e0] ss:$16 sps:$4 sm:$0xff]  }
 0x1f3   :  { %5307 = vmatprep.mubr.bf16.mxu0 %v8323_v56  ;;  %5620 = vmatpush1.bf16.msra.mxu1 %v7364_v26 }
 0x1f4   :  { %5651 = vmatprep.mubr.bf16.mxu1 %v8323_v56  ;;  %5277 = vmatprep.subr.bf16.mxu0 %v7369_v23  ;;  %v7385_v56 = vld [vmem:[#allocation6 + $0x480] ss:$16 sps:$4 sm:$0xff]   ;;  %v7406_v23 = vld [vmem:[#allocation6 + $0x4e8] ss:$16 sps:$4 sm:$0xff]  }
 0x1f5   :  { %5621 = vmatprep.subr.bf16.mxu1 %v7372_v28  ;;  %v7411_v28 = vld [vmem:[#allocation6 + $0x504] ss:$16 sps:$4 sm:$0xff]  }
 0x1f6   :  { %5278 = vmatpush1.bf16.msra.mxu0 %v7367_v29  ;;  %v7414_v29 = vld [vmem:[#allocation6 + $0x50c] ss:$16 sps:$4 sm:$0xff]  }
 0x1f7   :  { %5622 = vmatpush1.bf16.msra.mxu1 %v7370_v30  ;;  %5279 = vmatprep.subr.bf16.mxu0 %v7375_v32  ;;  %v7409_v30 = vld [vmem:[#allocation6 + $0x500] ss:$16 sps:$4 sm:$0xff]   ;;  %v7412_v32 = vld [vmem:[#allocation6 + $0x508] ss:$16 sps:$4 sm:$0xff]  }
 0x1f8   :  { %5623 = vmatprep.subr.bf16.mxu1 %v7378_v35  ;;  %v7417_v35 = vld [vmem:[#allocation6 + $0x524] ss:$16 sps:$4 sm:$0xff]  }
 0x1fa   :  { %5280 = vmatpush1.bf16.msra.mxu0 %v7373_v36  ;;  %v7420_v36 = vld [vmem:[#allocation6 + $0x52c] ss:$16 sps:$4 sm:$0xff]  }
 0x1fb   :  { %5624 = vmatpush1.bf16.msra.mxu1 %v7376_v38  ;;  %5281 = vmatprep.subr.bf16.mxu0 %v7381_v31  ;;  %v7415_v38 = vld [vmem:[#allocation6 + $0x520] ss:$16 sps:$4 sm:$0xff]   ;;  %v7418_v31 = vld [vmem:[#allocation6 + $0x528] ss:$16 sps:$4 sm:$0xff]  }
 0x1fc   :  { %5625 = vmatprep.subr.bf16.mxu1 %v7384_v3  ;;  %v7423_v3 = vld [vmem:[#allocation6 + $0x544] ss:$16 sps:$4 sm:$0xff]  }
 0x1fe   :  { %5282 = vmatpush1.bf16.msra.mxu0 %v7379_v39  ;;  %v7426_v39 = vld [vmem:[#allocation6 + $0x54c] ss:$16 sps:$4 sm:$0xff]  }
 0x1ff   :  { %5626 = vmatpush1.bf16.msra.mxu1 %v7382_v40  ;;  %5283 = vmatprep.subr.bf16.mxu0 %v7387_v42  ;;  %v7421_v40 = vld [vmem:[#allocation6 + $0x540] ss:$16 sps:$4 sm:$0xff]   ;;  %v7424_v42 = vld [vmem:[#allocation6 + $0x548] ss:$16 sps:$4 sm:$0xff]  }
 0x200   :  { %5627 = vmatprep.subr.bf16.mxu1 %v7390_v44  ;;  %v7429_v44 = vld [vmem:[#allocation6 + $0x564] ss:$16 sps:$4 sm:$0xff]  }
 0x202   :  { %5284 = vmatpush1.bf16.msra.mxu0 %v7385_v56  ;;  %v7432_v56 = vld [vmem:[#allocation6 + $0x56c] ss:$16 sps:$4 sm:$0xff]  }
 0x203   :  { %5628 = vmatpush1.bf16.msra.mxu1 %v7388_v47  ;;  %5285 = vmatprep.subr.bf16.mxu0 %v7393_v48  ;;  %v7427_v47 = vld [vmem:[#allocation6 + $0x560] ss:$16 sps:$4 sm:$0xff]   ;;  %v7430_v48 = vld [vmem:[#allocation6 + $0x568] ss:$16 sps:$4 sm:$0xff]  }
 0x204   :  { %v1941_v57 = vpop.f32.mrb[8].mxu0  ;;  %5629 = vmatprep.subr.bf16.mxu1 %v7396_v49  ;;  %v1984_v61 = vpop.f32.mrb[8].mxu1  ;;  %v7435_v49 = vld [vmem:[#allocation6 + $0x584] ss:$16 sps:$4 sm:$0xff]  }
 0x205   :  { %v1942_v60 = vadd.f32 %v1941_v57, %v400_v50  ;;  %v1943_v62 = vpop.f32.mrb[9].mxu0  ;;  %v1985_v63 = vadd.f32 %v1984_v61, %v408_v51  ;;  %v1986_v0 = vpop.f32.mrb[9].mxu1  ;;  %v7442_v57 = vld [vmem:[#allocation6 + $0x5a8] ss:$16 sps:$4 sm:$0xff]  }
 0x206   :  { %v1945_v4 = vpop.f32.mrb[10].mxu0  ;;  %5286 = vmatpush1.bf16.msra.mxu0 %v7391_v52  ;;  %v1987_v8 = vadd.f32 %v1986_v0, %v412_v53  ;;  %v1988_v11 = vpop.f32.mrb[10].mxu1  ;;  %v1944_v15 = vadd.f32 %v1943_v62, %v404_v58  ;;  %v7436_v52 = vld [vmem:[#allocation6 + $0x588] ss:$16 sps:$4 sm:$0xff]   ;;  %v7453_v62 = vld [vmem:[#allocation6 + $0x5e4] ss:$16 sps:$4 sm:$0xff]  }
 0x207   :  { %v1946_v9 = vadd.f32 %v1945_v4, %v400_v50  ;;  %5630 = vmatpush1.bf16.msra.mxu1 %v7394_v54  ;;  %v1947_v12 = vpop.f32.mrb[11].mxu0  ;;  %5287 = vmatprep.subr.bf16.mxu0 %v7399_v55  ;;  %v1989_v16 = vadd.f32 %v1988_v11, %v408_v51  ;;  %v1990_v18 = vpop.f32.mrb[11].mxu1  ;;  %v7438_v50 = vld [vmem:[#allocation6 + $0x58c] ss:$16 sps:$4 sm:$0xff]   ;;  %v7433_v51 = vld [vmem:[#allocation6 + $0x580] ss:$16 sps:$4 sm:$0xff]  }
 0x208   :  { %v1948_v17 = vadd.f32 %v1947_v12, %v404_v58  ;;  %5631 = vmatprep.subr.bf16.mxu1 %v7402_v59  ;;  %v1991_v21 = vadd.f32 %v1990_v18, %v412_v53  ;;  %v7441_v53 = vld [vmem:[#allocation6 + $0x5a4] ss:$16 sps:$4 sm:$0xff]   ;;  %v7444_v54 = vld [vmem:[#allocation6 + $0x5ac] ss:$16 sps:$4 sm:$0xff]   ;;  %v7439_v55 = vld [vmem:[#allocation6 + $0x5a0] ss:$16 sps:$4 sm:$0xff]  }
 0x209   :  { %v8341_v20 = vpack.c.bf16 %v1946_v9, %v1942_v60  ;;  %v8343_v22 = vpack.c.bf16 %v1989_v16, %v1985_v63  ;;  %v7447_v58 = vld [vmem:[#allocation6 + $0x5c4] ss:$16 sps:$4 sm:$0xff]   ;;  %v7450_v59 = vld [vmem:[#allocation6 + $0x5cc] ss:$16 sps:$4 sm:$0xff]   ;;  %v7445_v60 = vld [vmem:[#allocation6 + $0x5c0] ss:$16 sps:$4 sm:$0xff]  }
 0x20a   :  { %v8345_v24 = vpack.c.bf16 %v1948_v17, %v1944_v15  ;;  %5288 = vmatpush1.bf16.msra.mxu0 %v7397_v7  ;;  %v8347_v26 = vpack.c.bf16 %v1991_v21, %v1987_v8  ;;  %v7448_v61 = vld [vmem:[#allocation6 + $0x5c8] ss:$16 sps:$4 sm:$0xff]   ;;  %v7456_v63 = vld [vmem:[#allocation6 + $0x5ec] ss:$16 sps:$4 sm:$0xff]   ;;  %v7451_v0 = vld [vmem:[#allocation6 + $0x5e0] ss:$16 sps:$4 sm:$0xff]  }
 0x20b   :  { %5632 = vmatpush1.bf16.msra.mxu1 %v7400_v13  ;;  %5289 = vmatprep.subr.bf16.mxu0 %v7405_v14  ;;  %v7454_v4 = vld [vmem:[#allocation6 + $0x5e8] ss:$16 sps:$4 sm:$0xff]   ;;  %v7459_v7 = vld [vmem:[#allocation6 + $0x604] ss:$16 sps:$4 sm:$0xff]   ;;  %v7462_v8 = vld [vmem:[#allocation6 + $0x60c] ss:$16 sps:$4 sm:$0xff]  }
 0x20c   :  { %5633 = vmatprep.subr.bf16.mxu1 %v7408_v19  ;;  %v7457_v9 = vld [vmem:[#allocation6 + $0x600] ss:$16 sps:$4 sm:$0xff]   ;;  %v7460_v11 = vld [vmem:[#allocation6 + $0x608] ss:$16 sps:$4 sm:$0xff]   ;;  %v7465_v12 = vld [vmem:[#allocation6 + $0x624] ss:$16 sps:$4 sm:$0xff]  }
 0x20d   :  { %v7468_v13 = vld [vmem:[#allocation6 + $0x62c] ss:$16 sps:$4 sm:$0xff]   ;;  %v7463_v14 = vld [vmem:[#allocation6 + $0x620] ss:$16 sps:$4 sm:$0xff]   ;;  %v7466_v15 = vld [vmem:[#allocation6 + $0x628] ss:$16 sps:$4 sm:$0xff]  }
 0x20e   :  { %5290 = vmatpush1.bf16.msra.mxu0 %v7403_v25  ;;  %v7471_v16 = vld [vmem:[#allocation6 + $0x644] ss:$16 sps:$4 sm:$0xff]   ;;  %v7474_v17 = vld [vmem:[#allocation6 + $0x64c] ss:$16 sps:$4 sm:$0xff]   ;;  %v7469_v18 = vld [vmem:[#allocation6 + $0x640] ss:$16 sps:$4 sm:$0xff]  }
 0x20f   :  { %5634 = vmatpush1.bf16.msra.mxu1 %v7406_v23  ;;  %5291 = vmatprep.subr.bf16.mxu0 %v7411_v28  ;;  %v7472_v19 = vld [vmem:[#allocation6 + $0x648] ss:$16 sps:$4 sm:$0xff]   ;;  %v7477_v21 = vld [vmem:[#allocation6 + $0x664] ss:$16 sps:$4 sm:$0xff]   ;;  %v7475_v25 = vld [vmem:[#allocation6 + $0x660] ss:$16 sps:$4 sm:$0xff]  }
 0x210   :  { %5635 = vmatprep.subr.bf16.mxu1 %v7414_v29  ;;  %v7478_v23 = vld [vmem:[#allocation6 + $0x668] ss:$16 sps:$4 sm:$0xff]   ;;  %v7483_v28 = vld [vmem:[#allocation6 + $0x684] ss:$16 sps:$4 sm:$0xff]   ;;  %v7486_v29 = vld [vmem:[#allocation6 + $0x68c] ss:$16 sps:$4 sm:$0xff]  }
 0x212   :  { %5292 = vmatpush1.bf16.msra.mxu0 %v7409_v30  ;;  %v7484_v30 = vld [vmem:[#allocation6 + $0x688] ss:$16 sps:$4 sm:$0xff]  }
 0x213   :  { %5636 = vmatpush1.bf16.msra.mxu1 %v7412_v32  ;;  %5293 = vmatprep.subr.bf16.mxu0 %v7417_v35  ;;  %v7489_v32 = vld [vmem:[#allocation6 + $0x6a4] ss:$16 sps:$4 sm:$0xff]   ;;  %v7492_v35 = vld [vmem:[#allocation6 + $0x6ac] ss:$16 sps:$4 sm:$0xff]  }
 0x214   :  { %5637 = vmatprep.subr.bf16.mxu1 %v7420_v36  ;;  %v416_v36 = vrot.slane %v8331_v46, %v383_v1  ;;  %v7498_v1 = vld [vmem:[#allocation6 + $0x6cc] ss:$16 sps:$4 sm:$0xff]  }
 0x216   :  { %5294 = vmatpush1.bf16.msra.mxu0 %v7415_v38  ;;  %v424_v38 = vrot.slane %v8331_v46, %v391_v2 }
 0x217   :  { %5638 = vmatpush1.bf16.msra.mxu1 %v7418_v31  ;;  %5295 = vmatprep.subr.bf16.mxu0 %v7423_v3  ;;  %v7487_v31 = vld [vmem:[#allocation6 + $0x6a0] ss:$16 sps:$4 sm:$0xff]   ;;  %v428_v3 = vrot.slane %v8331_v46, %v395_v6 }
 0x218   :  { %5639 = vmatprep.subr.bf16.mxu1 %v7426_v39  ;;  %v7490_v39 = vld [vmem:[#allocation6 + $0x6a8] ss:$16 sps:$4 sm:$0xff]  }
 0x21a   :  { %5296 = vmatpush1.bf16.msra.mxu0 %v7421_v40  ;;  %v7495_v40 = vld [vmem:[#allocation6 + $0x6c4] ss:$16 sps:$4 sm:$0xff]  }
 0x21b   :  { %5640 = vmatpush1.bf16.msra.mxu1 %v7424_v42  ;;  %5297 = vmatprep.subr.bf16.mxu0 %v7429_v44  ;;  %v420_v44 = vrot.slane %v8331_v46, %v387_v5 }
 0x21c   :  { %5641 = vmatprep.subr.bf16.mxu1 %v7432_v56 }
 0x21e   :  { %5298 = vmatpush1.bf16.msra.mxu0 %v7427_v47 }
 0x21f   :  { %5642 = vmatpush1.bf16.msra.mxu1 %v7430_v48  ;;  %5299 = vmatprep.subr.bf16.mxu0 %v7435_v49 }
 0x220   :  { %5643 = vmatprep.subr.bf16.mxu1 %v7438_v50 }
 0x222   :  { %5300 = vmatpush1.bf16.msra.mxu0 %v7433_v51  ;;  %v7493_v51 = vld [vmem:[#allocation6 + $0x6c0] ss:$16 sps:$4 sm:$0xff]  }
 0x223   :  { %5644 = vmatpush1.bf16.msra.mxu1 %v7436_v52  ;;  %5301 = vmatprep.subr.bf16.mxu0 %v7441_v53 }
 0x224   :  { %5645 = vmatprep.subr.bf16.mxu1 %v7444_v54 }
 0x226   :  { %5302 = vmatpush1.bf16.msra.mxu0 %v7439_v55  ;;  %v7496_v55 = vld [vmem:[#allocation6 + $0x6c8] ss:$16 sps:$4 sm:$0xff]  }
 0x227   :  { %5646 = vmatpush1.bf16.msra.mxu1 %v7442_v57  ;;  %5303 = vmatprep.subr.bf16.mxu0 %v7447_v58 }
 0x228   :  { %5647 = vmatprep.subr.bf16.mxu1 %v7450_v59  ;;  %v7504_v59 = vld [vmem:[#allocation6 + $0x6ec] ss:$16 sps:$4 sm:$0xff]  }
 0x22a   :  { %5304 = vmatpush1.bf16.msra.mxu0 %v7445_v60 }
 0x22b   :  { %5648 = vmatpush1.bf16.msra.mxu1 %v7448_v61  ;;  %5305 = vmatprep.subr.bf16.mxu0 %v7453_v62 }
 0x22c   :  { %5649 = vmatprep.subr.bf16.mxu1 %v7456_v63 }
 0x22e   :  { %5306 = vmatpush1.bf16.msra.mxu0 %v7451_v0  ;;  %v7499_v0 = vld [vmem:[#allocation6 + $0x6e0] ss:$16 sps:$4 sm:$0xff]  }
 0x22f   :  { %5650 = vmatpush1.bf16.msra.mxu1 %v7454_v4  ;;  %5318 = vmatprep.subr.bf16.mxu0 %v7459_v7  ;;  %v7502_v7 = vld [vmem:[#allocation6 + $0x6e8] ss:$16 sps:$4 sm:$0xff]  }
 0x230   :  { %5662 = vmatprep.subr.bf16.mxu1 %v7462_v8  ;;  %v7507_v8 = vld [vmem:[#allocation6 + $0x704] ss:$16 sps:$4 sm:$0xff]  }
 0x231   :  { %5308 = vmatmul.mubr.bf16.vlgmr.msra.gmra.mrb[16].mxu0 %v8319_v41 }
 0x232   :  { %5652 = vmatmul.mubr.bf16.vlgmr.msra.gmra.mrb[16].mxu1 %v8319_v41  ;;  %5319 = vmatpush1.bf16.msra.mxu0 %v7457_v9  ;;  %v7480_v41 = vld [vmem:[#allocation6 + $0x66c] ss:$16 sps:$4 sm:$0xff]  }
 0x233   :  { %5350 = vmatprep.mubr.bf16.mxu0 %v8325_v45  ;;  %5663 = vmatpush1.bf16.msra.mxu1 %v7460_v11  ;;  %v7510_v9 = vld [vmem:[#allocation6 + $0x70c] ss:$16 sps:$4 sm:$0xff]   ;;  %v7505_v11 = vld [vmem:[#allocation6 + $0x700] ss:$16 sps:$4 sm:$0xff]  }
 0x234   :  { %5694 = vmatprep.mubr.bf16.mxu1 %v8325_v45  ;;  %5320 = vmatprep.subr.bf16.mxu0 %v7465_v12  ;;  %v7481_v45 = vld [vmem:[#allocation6 + $0x680] ss:$16 sps:$4 sm:$0xff]   ;;  %v7508_v12 = vld [vmem:[#allocation6 + $0x708] ss:$16 sps:$4 sm:$0xff]  }
 0x235   :  { %5664 = vmatprep.subr.bf16.mxu1 %v7468_v13  ;;  %v7513_v13 = vld [vmem:[#allocation6 + $0x724] ss:$16 sps:$4 sm:$0xff]  }
 0x236   :  { %5321 = vmatpush1.bf16.msra.mxu0 %v7463_v14  ;;  %v7516_v14 = vld [vmem:[#allocation6 + $0x72c] ss:$16 sps:$4 sm:$0xff]  }
 0x237   :  { %5665 = vmatpush1.bf16.msra.mxu1 %v7466_v15  ;;  %5322 = vmatprep.subr.bf16.mxu0 %v7471_v16  ;;  %v7511_v15 = vld [vmem:[#allocation6 + $0x720] ss:$16 sps:$4 sm:$0xff]   ;;  %v7514_v16 = vld [vmem:[#allocation6 + $0x728] ss:$16 sps:$4 sm:$0xff]  }
 0x238   :  { %5666 = vmatprep.subr.bf16.mxu1 %v7474_v17  ;;  %v7519_v17 = vld [vmem:[#allocation6 + $0x744] ss:$16 sps:$4 sm:$0xff]  }
 0x23a   :  { %5323 = vmatpush1.bf16.msra.mxu0 %v7469_v18  ;;  %v7522_v18 = vld [vmem:[#allocation6 + $0x74c] ss:$16 sps:$4 sm:$0xff]  }
 0x23b   :  { %5667 = vmatpush1.bf16.msra.mxu1 %v7472_v19  ;;  %5324 = vmatprep.subr.bf16.mxu0 %v7477_v21  ;;  %v7517_v19 = vld [vmem:[#allocation6 + $0x740] ss:$16 sps:$4 sm:$0xff]   ;;  %v7520_v21 = vld [vmem:[#allocation6 + $0x748] ss:$16 sps:$4 sm:$0xff]  }
 0x23c   :  { %5668 = vmatprep.subr.bf16.mxu1 %v7480_v41  ;;  %v7525_v41 = vld [vmem:[#allocation6 + $0x764] ss:$16 sps:$4 sm:$0xff]  }
 0x23e   :  { %5325 = vmatpush1.bf16.msra.mxu0 %v7475_v25  ;;  %v7528_v25 = vld [vmem:[#allocation6 + $0x76c] ss:$16 sps:$4 sm:$0xff]  }
 0x23f   :  { %5669 = vmatpush1.bf16.msra.mxu1 %v7478_v23  ;;  %5326 = vmatprep.subr.bf16.mxu0 %v7483_v28  ;;  %v7523_v23 = vld [vmem:[#allocation6 + $0x760] ss:$16 sps:$4 sm:$0xff]   ;;  %v7526_v28 = vld [vmem:[#allocation6 + $0x768] ss:$16 sps:$4 sm:$0xff]  }
 0x240   :  { %5670 = vmatprep.subr.bf16.mxu1 %v7486_v29  ;;  %v7531_v29 = vld [vmem:[#allocation6 + $0x784] ss:$16 sps:$4 sm:$0xff]  }
 0x242   :  { %5327 = vmatpush1.bf16.msra.mxu0 %v7481_v45  ;;  %v7534_v45 = vld [vmem:[#allocation6 + $0x78c] ss:$16 sps:$4 sm:$0xff]  }
 0x243   :  { %5671 = vmatpush1.bf16.msra.mxu1 %v7484_v30  ;;  %5328 = vmatprep.subr.bf16.mxu0 %v7489_v32  ;;  %v7529_v30 = vld [vmem:[#allocation6 + $0x780] ss:$16 sps:$4 sm:$0xff]   ;;  %v7532_v32 = vld [vmem:[#allocation6 + $0x788] ss:$16 sps:$4 sm:$0xff]  }
 0x244   :  { %v2027_v42 = vpop.f32.mrb[12].mxu0  ;;  %5672 = vmatprep.subr.bf16.mxu1 %v7492_v35  ;;  %v2070_v47 = vpop.f32.mrb[12].mxu1  ;;  %v7537_v35 = vld [vmem:[#allocation6 + $0x7a4] ss:$16 sps:$4 sm:$0xff]  }
 0x245   :  { %v2028_v56 = vadd.f32 %v2027_v42, %v416_v36  ;;  %v2029_v48 = vpop.f32.mrb[13].mxu0  ;;  %v2071_v2 = vadd.f32 %v2070_v47, %v424_v38  ;;  %v2072_v49 = vpop.f32.mrb[13].mxu1  ;;  %v7544_v42 = vld [vmem:[#allocation6 + $0x7c8] ss:$16 sps:$4 sm:$0xff]  }
 0x246   :  { %v2031_v50 = vpop.f32.mrb[14].mxu0  ;;  %5329 = vmatpush1.bf16.msra.mxu0 %v7487_v31  ;;  %v2073_v52 = vadd.f32 %v2072_v49, %v428_v3  ;;  %v2074_v53 = vpop.f32.mrb[14].mxu1  ;;  %v2030_v57 = vadd.f32 %v2029_v48, %v420_v44  ;;  %v7538_v31 = vld [vmem:[#allocation6 + $0x7a8] ss:$16 sps:$4 sm:$0xff]   ;;  %v7555_v48 = vld [vmem:[#allocation6 + $0x804] ss:$16 sps:$4 sm:$0xff]  }
 0x247   :  { %v2032_v6 = vadd.f32 %v2031_v50, %v416_v36  ;;  %5673 = vmatpush1.bf16.msra.mxu1 %v7490_v39  ;;  %v2033_v54 = vpop.f32.mrb[15].mxu0  ;;  %5330 = vmatprep.subr.bf16.mxu0 %v7495_v40  ;;  %v2075_v5 = vadd.f32 %v2074_v53, %v424_v38  ;;  %v2076_v58 = vpop.f32.mrb[15].mxu1  ;;  %v7540_v36 = vld [vmem:[#allocation6 + $0x7ac] ss:$16 sps:$4 sm:$0xff]   ;;  %v7535_v38 = vld [vmem:[#allocation6 + $0x7a0] ss:$16 sps:$4 sm:$0xff]  }
 0x248   :  { %v2034_v46 = vadd.f32 %v2033_v54, %v420_v44  ;;  %5674 = vmatprep.subr.bf16.mxu1 %v7498_v1  ;;  %v2077_v61 = vadd.f32 %v2076_v58, %v428_v3  ;;  %v7543_v3 = vld [vmem:[#allocation6 + $0x7c4] ss:$16 sps:$4 sm:$0xff]   ;;  %v7546_v39 = vld [vmem:[#allocation6 + $0x7cc] ss:$16 sps:$4 sm:$0xff]   ;;  %v7541_v40 = vld [vmem:[#allocation6 + $0x7c0] ss:$16 sps:$4 sm:$0xff]  }
 0x249   :  { %v8365_v60 = vpack.c.bf16 %v2032_v6, %v2028_v56  ;;  %v8367_v62 = vpack.c.bf16 %v2075_v5, %v2071_v2  ;;  %v7549_v44 = vld [vmem:[#allocation6 + $0x7e4] ss:$16 sps:$4 sm:$0xff]   ;;  %v7552_v1 = vld [vmem:[#allocation6 + $0x7ec] ss:$16 sps:$4 sm:$0xff]   ;;  %v7547_v56 = vld [vmem:[#allocation6 + $0x7e0] ss:$16 sps:$4 sm:$0xff]  }
 0x24a   :  { %v8369_v63 = vpack.c.bf16 %v2034_v46, %v2030_v57  ;;  %5331 = vmatpush1.bf16.msra.mxu0 %v7493_v51  ;;  %v8371_v4 = vpack.c.bf16 %v2077_v61, %v2073_v52  ;;  %v7550_v47 = vld [vmem:[#allocation6 + $0x7e8] ss:$16 sps:$4 sm:$0xff]   ;;  %v7558_v2 = vld [vmem:[#allocation6 + $0x80c] ss:$16 sps:$4 sm:$0xff]   ;;  %v7553_v49 = vld [vmem:[#allocation6 + $0x800] ss:$16 sps:$4 sm:$0xff]  }
 0x24b   :  { %5675 = vmatpush1.bf16.msra.mxu1 %v7496_v55  ;;  %5332 = vmatprep.subr.bf16.mxu0 %v7501_v27  ;;  %v7556_v50 = vld [vmem:[#allocation6 + $0x808] ss:$16 sps:$4 sm:$0xff]   ;;  %v7561_v51 = vld [vmem:[#allocation6 + $0x824] ss:$16 sps:$4 sm:$0xff]   ;;  %v7564_v52 = vld [vmem:[#allocation6 + $0x82c] ss:$16 sps:$4 sm:$0xff]  }
 0x24c   :  { %5676 = vmatprep.subr.bf16.mxu1 %v7504_v59  ;;  %v7559_v6 = vld [vmem:[#allocation6 + $0x820] ss:$16 sps:$4 sm:$0xff]   ;;  %v7562_v53 = vld [vmem:[#allocation6 + $0x828] ss:$16 sps:$4 sm:$0xff]   ;;  %v7567_v54 = vld [vmem:[#allocation6 + $0x844] ss:$16 sps:$4 sm:$0xff]  }
 0x24d   :  { %v7570_v55 = vld [vmem:[#allocation6 + $0x84c] ss:$16 sps:$4 sm:$0xff]   ;;  %v7565_v27 = vld [vmem:[#allocation6 + $0x840] ss:$16 sps:$4 sm:$0xff]   ;;  %v7568_v57 = vld [vmem:[#allocation6 + $0x848] ss:$16 sps:$4 sm:$0xff]  }
 0x24e   :  { %5333 = vmatpush1.bf16.msra.mxu0 %v7499_v0  ;;  %v7573_v5 = vld [vmem:[#allocation6 + $0x864] ss:$16 sps:$4 sm:$0xff]   ;;  %v7571_v46 = vld [vmem:[#allocation6 + $0x860] ss:$16 sps:$4 sm:$0xff]   ;;  %v7574_v58 = vld [vmem:[#allocation6 + $0x868] ss:$16 sps:$4 sm:$0xff]  }
 0x24f   :  { %5677 = vmatpush1.bf16.msra.mxu1 %v7502_v7  ;;  %5334 = vmatprep.subr.bf16.mxu0 %v7507_v8  ;;  %v7579_v59 = vld [vmem:[#allocation6 + $0x884] ss:$16 sps:$4 sm:$0xff]   ;;  %v7582_v61 = vld [vmem:[#allocation6 + $0x88c] ss:$16 sps:$4 sm:$0xff]   ;;  %v7580_v0 = vld [vmem:[#allocation6 + $0x888] ss:$16 sps:$4 sm:$0xff]  }
 0x250   :  { %5678 = vmatprep.subr.bf16.mxu1 %v7510_v9  ;;  %v7585_v7 = vld [vmem:[#allocation6 + $0x8a4] ss:$16 sps:$4 sm:$0xff]   ;;  %v7588_v8 = vld [vmem:[#allocation6 + $0x8ac] ss:$16 sps:$4 sm:$0xff]   ;;  %v7583_v9 = vld [vmem:[#allocation6 + $0x8a0] ss:$16 sps:$4 sm:$0xff]  }
 0x252   :  { %5335 = vmatpush1.bf16.msra.mxu0 %v7505_v11  ;;  %v7586_v11 = vld [vmem:[#allocation6 + $0x8a8] ss:$16 sps:$4 sm:$0xff]  }
 0x253   :  { %5679 = vmatpush1.bf16.msra.mxu1 %v7508_v12  ;;  %5336 = vmatprep.subr.bf16.mxu0 %v7513_v13  ;;  %v7591_v12 = vld [vmem:[#allocation6 + $0x8c4] ss:$16 sps:$4 sm:$0xff]   ;;  %v7594_v13 = vld [vmem:[#allocation6 + $0x8cc] ss:$16 sps:$4 sm:$0xff]  }
 0x254   :  { %5680 = vmatprep.subr.bf16.mxu1 %v7516_v14  ;;  %v7589_v14 = vld [vmem:[#allocation6 + $0x8c0] ss:$16 sps:$4 sm:$0xff]  }
 0x256   :  { %5337 = vmatpush1.bf16.msra.mxu0 %v7511_v15  ;;  %v7592_v15 = vld [vmem:[#allocation6 + $0x8c8] ss:$16 sps:$4 sm:$0xff]  }
 0x257   :  { %5681 = vmatpush1.bf16.msra.mxu1 %v7514_v16  ;;  %5338 = vmatprep.subr.bf16.mxu0 %v7519_v17  ;;  %v7597_v16 = vld [vmem:[#allocation6 + $0x8e4] ss:$16 sps:$4 sm:$0xff]   ;;  %v7600_v17 = vld [vmem:[#allocation6 + $0x8ec] ss:$16 sps:$4 sm:$0xff]  }
 0x258   :  { %5682 = vmatprep.subr.bf16.mxu1 %v7522_v18  ;;  %v7595_v18 = vld [vmem:[#allocation6 + $0x8e0] ss:$16 sps:$4 sm:$0xff]  }
 0x25a   :  { %5339 = vmatpush1.bf16.msra.mxu0 %v7517_v19  ;;  %v7598_v19 = vld [vmem:[#allocation6 + $0x8e8] ss:$16 sps:$4 sm:$0xff]  }
 0x25b   :  { %5683 = vmatpush1.bf16.msra.mxu1 %v7520_v21  ;;  %5340 = vmatprep.subr.bf16.mxu0 %v7525_v41  ;;  %v7603_v21 = vld [vmem:[#allocation6 + $0x904] ss:$16 sps:$4 sm:$0xff]   ;;  %v7606_v41 = vld [vmem:[#allocation6 + $0x90c] ss:$16 sps:$4 sm:$0xff]  }
 0x25c   :  { %5684 = vmatprep.subr.bf16.mxu1 %v7528_v25  ;;  %v7601_v25 = vld [vmem:[#allocation6 + $0x900] ss:$16 sps:$4 sm:$0xff]  }
 0x25e   :  { %5341 = vmatpush1.bf16.msra.mxu0 %v7523_v23  ;;  %v7604_v23 = vld [vmem:[#allocation6 + $0x908] ss:$16 sps:$4 sm:$0xff]  }
 0x25f   :  { %5685 = vmatpush1.bf16.msra.mxu1 %v7526_v28  ;;  %5342 = vmatprep.subr.bf16.mxu0 %v7531_v29  ;;  %v7609_v28 = vld [vmem:[#allocation6 + $0x924] ss:$16 sps:$4 sm:$0xff]   ;;  %v7612_v29 = vld [vmem:[#allocation6 + $0x92c] ss:$16 sps:$4 sm:$0xff]  }
 0x260   :  { %5686 = vmatprep.subr.bf16.mxu1 %v7534_v45  ;;  %v7607_v45 = vld [vmem:[#allocation6 + $0x920] ss:$16 sps:$4 sm:$0xff]  }
 0x262   :  { %5343 = vmatpush1.bf16.msra.mxu0 %v7529_v30  ;;  %v7610_v30 = vld [vmem:[#allocation6 + $0x928] ss:$16 sps:$4 sm:$0xff]  }
 0x263   :  { %5687 = vmatpush1.bf16.msra.mxu1 %v7532_v32  ;;  %5344 = vmatprep.subr.bf16.mxu0 %v7537_v35  ;;  %v7615_v32 = vld [vmem:[#allocation6 + $0x944] ss:$16 sps:$4 sm:$0xff]   ;;  %v7618_v35 = vld [vmem:[#allocation6 + $0x94c] ss:$16 sps:$4 sm:$0xff]  }
 0x264   :  { %5688 = vmatprep.subr.bf16.mxu1 %v7540_v36  ;;  %v7613_v36 = vld [vmem:[#allocation6 + $0x940] ss:$16 sps:$4 sm:$0xff]  }
 0x266   :  { %5345 = vmatpush1.bf16.msra.mxu0 %v7535_v38  ;;  %v7616_v38 = vld [vmem:[#allocation6 + $0x948] ss:$16 sps:$4 sm:$0xff]  }
 0x267   :  { %5689 = vmatpush1.bf16.msra.mxu1 %v7538_v31  ;;  %5346 = vmatprep.subr.bf16.mxu0 %v7543_v3  ;;  %v7621_v31 = vld [vmem:[#allocation6 + $0x964] ss:$16 sps:$4 sm:$0xff]   ;;  %v7624_v3 = vld [vmem:[#allocation6 + $0x96c] ss:$16 sps:$4 sm:$0xff]  }
 0x268   :  { %5690 = vmatprep.subr.bf16.mxu1 %v7546_v39  ;;  %v7619_v39 = vld [vmem:[#allocation6 + $0x960] ss:$16 sps:$4 sm:$0xff]  }
 0x26a   :  { %5347 = vmatpush1.bf16.msra.mxu0 %v7541_v40  ;;  %v7622_v40 = vld [vmem:[#allocation6 + $0x968] ss:$16 sps:$4 sm:$0xff]  }
 0x26b   :  { %5691 = vmatpush1.bf16.msra.mxu1 %v7544_v42  ;;  %5348 = vmatprep.subr.bf16.mxu0 %v7549_v44  ;;  %v7627_v42 = vld [vmem:[#allocation6 + $0x984] ss:$16 sps:$4 sm:$0xff]   ;;  %v7630_v44 = vld [vmem:[#allocation6 + $0x98c] ss:$16 sps:$4 sm:$0xff]  }
 0x26c   :  { %5692 = vmatprep.subr.bf16.mxu1 %v7552_v1  ;;  %v7625_v1 = vld [vmem:[#allocation6 + $0x980] ss:$16 sps:$4 sm:$0xff]  }
 0x26e   :  { %5349 = vmatpush1.bf16.msra.mxu0 %v7547_v56  ;;  %v7628_v56 = vld [vmem:[#allocation6 + $0x988] ss:$16 sps:$4 sm:$0xff]  }
 0x26f   :  { %5693 = vmatpush1.bf16.msra.mxu1 %v7550_v47  ;;  %5361 = vmatprep.subr.bf16.mxu0 %v7555_v48  ;;  %v7633_v47 = vld [vmem:[#allocation6 + $0x9a4] ss:$16 sps:$4 sm:$0xff]   ;;  %v7636_v48 = vld [vmem:[#allocation6 + $0x9ac] ss:$16 sps:$4 sm:$0xff]  }
 0x270   :  { %5705 = vmatprep.subr.bf16.mxu1 %v7558_v2  ;;  %v7631_v2 = vld [vmem:[#allocation6 + $0x9a0] ss:$16 sps:$4 sm:$0xff]  }
 0x271   :  { %5351 = vmatmul.mubr.bf16.vlgmr.msra.gmra.mrb[16].mxu0 %v8321_v43 }
 0x272   :  { %5695 = vmatmul.mubr.bf16.vlgmr.msra.gmra.mrb[16].mxu1 %v8321_v43  ;;  %5362 = vmatpush1.bf16.msra.mxu0 %v7553_v49  ;;  %v7576_v43 = vld [vmem:[#allocation6 + $0x86c] ss:$16 sps:$4 sm:$0xff]   ;;  %v7634_v49 = vld [vmem:[#allocation6 + $0x9a8] ss:$16 sps:$4 sm:$0xff]  }
 0x273   :  { %5393 = vmatprep.mubr.bf16.mxu0 %v8345_v24  ;;  %5706 = vmatpush1.bf16.msra.mxu1 %v7556_v50  ;;  %v7639_v50 = vld [vmem:[#allocation6 + $0x9c4] ss:$16 sps:$4 sm:$0xff]  }
 0x274   :  { %5737 = vmatprep.mubr.bf16.mxu1 %v8345_v24  ;;  %5363 = vmatprep.subr.bf16.mxu0 %v7561_v51  ;;  %v7577_v24 = vld [vmem:[#allocation6 + $0x880] ss:$16 sps:$4 sm:$0xff]   ;;  %v7642_v51 = vld [vmem:[#allocation6 + $0x9cc] ss:$16 sps:$4 sm:$0xff]  }
 0x275   :  { %5707 = vmatprep.subr.bf16.mxu1 %v7564_v52  ;;  %v7637_v52 = vld [vmem:[#allocation6 + $0x9c0] ss:$16 sps:$4 sm:$0xff]  }
 0x276   :  { %5364 = vmatpush1.bf16.msra.mxu0 %v7559_v6  ;;  %v7640_v6 = vld [vmem:[#allocation6 + $0x9c8] ss:$16 sps:$4 sm:$0xff]  }
 0x277   :  { %5708 = vmatpush1.bf16.msra.mxu1 %v7562_v53  ;;  %5365 = vmatprep.subr.bf16.mxu0 %v7567_v54  ;;  %v7645_v53 = vld [vmem:[#allocation6 + $0x9e4] ss:$16 sps:$4 sm:$0xff]   ;;  %v7648_v54 = vld [vmem:[#allocation6 + $0x9ec] ss:$16 sps:$4 sm:$0xff]  }
 0x278   :  { %5709 = vmatprep.subr.bf16.mxu1 %v7570_v55  ;;  %v7643_v55 = vld [vmem:[#allocation6 + $0x9e0] ss:$16 sps:$4 sm:$0xff]  }
 0x27a   :  { %5366 = vmatpush1.bf16.msra.mxu0 %v7565_v27  ;;  %v7646_v27 = vld [vmem:[#allocation6 + $0x9e8] ss:$16 sps:$4 sm:$0xff]  }
 0x27b   :  { %5710 = vmatpush1.bf16.msra.mxu1 %v7568_v57  ;;  %5367 = vmatprep.subr.bf16.mxu0 %v7573_v5  ;;  %v7651_v57 = vld [vmem:[#allocation6 + $0xa04] ss:$16 sps:$4 sm:$0xff]   ;;  %v7654_v5 = vld [vmem:[#allocation6 + $0xa0c] ss:$16 sps:$4 sm:$0xff]  }
 0x27c   :  { %5711 = vmatprep.subr.bf16.mxu1 %v7576_v43  ;;  %v7649_v43 = vld [vmem:[#allocation6 + $0xa00] ss:$16 sps:$4 sm:$0xff]  }
 0x27e   :  { %5368 = vmatpush1.bf16.msra.mxu0 %v7571_v46  ;;  %v7652_v46 = vld [vmem:[#allocation6 + $0xa08] ss:$16 sps:$4 sm:$0xff]  }
 0x27f   :  { %5712 = vmatpush1.bf16.msra.mxu1 %v7574_v58  ;;  %5369 = vmatprep.subr.bf16.mxu0 %v7579_v59  ;;  %v7657_v58 = vld [vmem:[#allocation6 + $0xa24] ss:$16 sps:$4 sm:$0xff]   ;;  %v7660_v59 = vld [vmem:[#allocation6 + $0xa2c] ss:$16 sps:$4 sm:$0xff]  }
 0x280   :  { %5713 = vmatprep.subr.bf16.mxu1 %v7582_v61  ;;  %v7655_v61 = vld [vmem:[#allocation6 + $0xa20] ss:$16 sps:$4 sm:$0xff]  }
 0x282   :  { %5370 = vmatpush1.bf16.msra.mxu0 %v7577_v24  ;;  %v7658_v24 = vld [vmem:[#allocation6 + $0xa28] ss:$16 sps:$4 sm:$0xff]  }
 0x283   :  { %5714 = vmatpush1.bf16.msra.mxu1 %v7580_v0  ;;  %5371 = vmatprep.subr.bf16.mxu0 %v7585_v7  ;;  %v7663_v0 = vld [vmem:[#allocation6 + $0xa44] ss:$16 sps:$4 sm:$0xff]   ;;  %v7666_v7 = vld [vmem:[#allocation6 + $0xa4c] ss:$16 sps:$4 sm:$0xff]  }
 0x284   :  { %5715 = vmatprep.subr.bf16.mxu1 %v7588_v8  ;;  %v7661_v8 = vld [vmem:[#allocation6 + $0xa40] ss:$16 sps:$4 sm:$0xff]  }
 0x286   :  { %5372 = vmatpush1.bf16.msra.mxu0 %v7583_v9  ;;  %v7664_v9 = vld [vmem:[#allocation6 + $0xa48] ss:$16 sps:$4 sm:$0xff]  }
 0x287   :  { %5716 = vmatpush1.bf16.msra.mxu1 %v7586_v11  ;;  %5373 = vmatprep.subr.bf16.mxu0 %v7591_v12  ;;  %v7669_v11 = vld [vmem:[#allocation6 + $0xa64] ss:$16 sps:$4 sm:$0xff]   ;;  %v7667_v12 = vld [vmem:[#allocation6 + $0xa60] ss:$16 sps:$4 sm:$0xff]  }
 0x288   :  { %5717 = vmatprep.subr.bf16.mxu1 %v7594_v13  ;;  %v7670_v13 = vld [vmem:[#allocation6 + $0xa68] ss:$16 sps:$4 sm:$0xff]  }
 0x28a   :  { %5374 = vmatpush1.bf16.msra.mxu0 %v7589_v14  ;;  %v7675_v14 = vld [vmem:[#allocation6 + $0xa84] ss:$16 sps:$4 sm:$0xff]  }
 0x28b   :  { %5718 = vmatpush1.bf16.msra.mxu1 %v7592_v15  ;;  %5375 = vmatprep.subr.bf16.mxu0 %v7597_v16  ;;  %v7678_v15 = vld [vmem:[#allocation6 + $0xa8c] ss:$16 sps:$4 sm:$0xff]   ;;  %v7676_v16 = vld [vmem:[#allocation6 + $0xa88] ss:$16 sps:$4 sm:$0xff]  }
 0x28c   :  { %5719 = vmatprep.subr.bf16.mxu1 %v7600_v17  ;;  %v7681_v17 = vld [vmem:[#allocation6 + $0xaa4] ss:$16 sps:$4 sm:$0xff]  }
 0x28e   :  { %5376 = vmatpush1.bf16.msra.mxu0 %v7595_v18  ;;  %v7684_v18 = vld [vmem:[#allocation6 + $0xaac] ss:$16 sps:$4 sm:$0xff]  }
 0x28f   :  { %5720 = vmatpush1.bf16.msra.mxu1 %v7598_v19  ;;  %5377 = vmatprep.subr.bf16.mxu0 %v7603_v21  ;;  %v7679_v19 = vld [vmem:[#allocation6 + $0xaa0] ss:$16 sps:$4 sm:$0xff]   ;;  %v7682_v21 = vld [vmem:[#allocation6 + $0xaa8] ss:$16 sps:$4 sm:$0xff]  }
 0x290   :  { %5721 = vmatprep.subr.bf16.mxu1 %v7606_v41  ;;  %v7687_v41 = vld [vmem:[#allocation6 + $0xac4] ss:$16 sps:$4 sm:$0xff]  }
 0x292   :  { %5378 = vmatpush1.bf16.msra.mxu0 %v7601_v25  ;;  %v7690_v25 = vld [vmem:[#allocation6 + $0xacc] ss:$16 sps:$4 sm:$0xff]  }
 0x293   :  { %5722 = vmatpush1.bf16.msra.mxu1 %v7604_v23  ;;  %5379 = vmatprep.subr.bf16.mxu0 %v7609_v28  ;;  %v7685_v23 = vld [vmem:[#allocation6 + $0xac0] ss:$16 sps:$4 sm:$0xff]   ;;  %v7688_v28 = vld [vmem:[#allocation6 + $0xac8] ss:$16 sps:$4 sm:$0xff]  }
 0x294   :  { %5723 = vmatprep.subr.bf16.mxu1 %v7612_v29  ;;  %v7693_v29 = vld [vmem:[#allocation6 + $0xae4] ss:$16 sps:$4 sm:$0xff]  }
 0x296   :  { %5380 = vmatpush1.bf16.msra.mxu0 %v7607_v45  ;;  %v7696_v45 = vld [vmem:[#allocation6 + $0xaec] ss:$16 sps:$4 sm:$0xff]  }
 0x297   :  { %5724 = vmatpush1.bf16.msra.mxu1 %v7610_v30  ;;  %5381 = vmatprep.subr.bf16.mxu0 %v7615_v32  ;;  %v7691_v30 = vld [vmem:[#allocation6 + $0xae0] ss:$16 sps:$4 sm:$0xff]   ;;  %v7694_v32 = vld [vmem:[#allocation6 + $0xae8] ss:$16 sps:$4 sm:$0xff]  }
 0x298   :  { %5725 = vmatprep.subr.bf16.mxu1 %v7618_v35  ;;  %v7699_v35 = vld [vmem:[#allocation6 + $0xb04] ss:$16 sps:$4 sm:$0xff]  }
 0x29a   :  { %5382 = vmatpush1.bf16.msra.mxu0 %v7613_v36  ;;  %v7702_v36 = vld [vmem:[#allocation6 + $0xb0c] ss:$16 sps:$4 sm:$0xff]  }
 0x29b   :  { %5726 = vmatpush1.bf16.msra.mxu1 %v7616_v38  ;;  %5383 = vmatprep.subr.bf16.mxu0 %v7621_v31  ;;  %v7697_v38 = vld [vmem:[#allocation6 + $0xb00] ss:$16 sps:$4 sm:$0xff]   ;;  %v7700_v31 = vld [vmem:[#allocation6 + $0xb08] ss:$16 sps:$4 sm:$0xff]  }
 0x29c   :  { %5727 = vmatprep.subr.bf16.mxu1 %v7624_v3  ;;  %v7705_v3 = vld [vmem:[#allocation6 + $0xb24] ss:$16 sps:$4 sm:$0xff]  }
 0x29e   :  { %5384 = vmatpush1.bf16.msra.mxu0 %v7619_v39  ;;  %v7708_v39 = vld [vmem:[#allocation6 + $0xb2c] ss:$16 sps:$4 sm:$0xff]  }
 0x29f   :  { %5728 = vmatpush1.bf16.msra.mxu1 %v7622_v40  ;;  %5385 = vmatprep.subr.bf16.mxu0 %v7627_v42  ;;  %v7703_v40 = vld [vmem:[#allocation6 + $0xb20] ss:$16 sps:$4 sm:$0xff]   ;;  %v7706_v42 = vld [vmem:[#allocation6 + $0xb28] ss:$16 sps:$4 sm:$0xff]  }
 0x2a0   :  { %5729 = vmatprep.subr.bf16.mxu1 %v7630_v44  ;;  %v7711_v44 = vld [vmem:[#allocation6 + $0xb44] ss:$16 sps:$4 sm:$0xff]  }
 0x2a2   :  { %5386 = vmatpush1.bf16.msra.mxu0 %v7625_v1  ;;  %v7714_v1 = vld [vmem:[#allocation6 + $0xb4c] ss:$16 sps:$4 sm:$0xff]  }
 0x2a3   :  { %5730 = vmatpush1.bf16.msra.mxu1 %v7628_v56  ;;  %5387 = vmatprep.subr.bf16.mxu0 %v7633_v47  ;;  %v7709_v56 = vld [vmem:[#allocation6 + $0xb40] ss:$16 sps:$4 sm:$0xff]   ;;  %v7712_v47 = vld [vmem:[#allocation6 + $0xb48] ss:$16 sps:$4 sm:$0xff]  }
 0x2a4   :  { %5731 = vmatprep.subr.bf16.mxu1 %v7636_v48  ;;  %v7717_v48 = vld [vmem:[#allocation6 + $0xb64] ss:$16 sps:$4 sm:$0xff]  }
 0x2a6   :  { %5388 = vmatpush1.bf16.msra.mxu0 %v7631_v2  ;;  %v7720_v2 = vld [vmem:[#allocation6 + $0xb6c] ss:$16 sps:$4 sm:$0xff]  }
 0x2a7   :  { %5732 = vmatpush1.bf16.msra.mxu1 %v7634_v49  ;;  %5389 = vmatprep.subr.bf16.mxu0 %v7639_v50  ;;  %v7715_v49 = vld [vmem:[#allocation6 + $0xb60] ss:$16 sps:$4 sm:$0xff]   ;;  %v7718_v50 = vld [vmem:[#allocation6 + $0xb68] ss:$16 sps:$4 sm:$0xff]  }
 0x2a8   :  { %5733 = vmatprep.subr.bf16.mxu1 %v7642_v51  ;;  %v7723_v51 = vld [vmem:[#allocation6 + $0xb84] ss:$16 sps:$4 sm:$0xff]  }
 0x2aa   :  { %5390 = vmatpush1.bf16.msra.mxu0 %v7637_v52  ;;  %v7726_v52 = vld [vmem:[#allocation6 + $0xb8c] ss:$16 sps:$4 sm:$0xff]  }
 0x2ab   :  { %5734 = vmatpush1.bf16.msra.mxu1 %v7640_v6  ;;  %5391 = vmatprep.subr.bf16.mxu0 %v7645_v53  ;;  %v7721_v6 = vld [vmem:[#allocation6 + $0xb80] ss:$16 sps:$4 sm:$0xff]   ;;  %v7724_v53 = vld [vmem:[#allocation6 + $0xb88] ss:$16 sps:$4 sm:$0xff]  }
 0x2ac   :  { %5735 = vmatprep.subr.bf16.mxu1 %v7648_v54  ;;  %v7729_v54 = vld [vmem:[#allocation6 + $0xba4] ss:$16 sps:$4 sm:$0xff]  }
 0x2ae   :  { %5392 = vmatpush1.bf16.msra.mxu0 %v7643_v55  ;;  %v7732_v55 = vld [vmem:[#allocation6 + $0xbac] ss:$16 sps:$4 sm:$0xff]  }
 0x2af   :  { %5736 = vmatpush1.bf16.msra.mxu1 %v7646_v27  ;;  %5404 = vmatprep.subr.bf16.mxu0 %v7651_v57  ;;  %v7727_v27 = vld [vmem:[#allocation6 + $0xba0] ss:$16 sps:$4 sm:$0xff]   ;;  %v7730_v57 = vld [vmem:[#allocation6 + $0xba8] ss:$16 sps:$4 sm:$0xff]  }
 0x2b0   :  { %5748 = vmatprep.subr.bf16.mxu1 %v7654_v5  ;;  %v7735_v5 = vld [vmem:[#allocation6 + $0xbc4] ss:$16 sps:$4 sm:$0xff]  }
 0x2b1   :  { %5394 = vmatmul.mubr.bf16.vlgmr.msra.gmra.mrb[16].mxu0 %v8341_v20 }
 0x2b2   :  { %5738 = vmatmul.mubr.bf16.vlgmr.msra.gmra.mrb[16].mxu1 %v8341_v20  ;;  %5405 = vmatpush1.bf16.msra.mxu0 %v7649_v43  ;;  %v7672_v20 = vld [vmem:[#allocation6 + $0xa6c] ss:$16 sps:$4 sm:$0xff]  }
 0x2b3   :  { %5436 = vmatprep.mubr.bf16.mxu0 %v8347_v26  ;;  %5749 = vmatpush1.bf16.msra.mxu1 %v7652_v46  ;;  %v7738_v43 = vld [vmem:[#allocation6 + $0xbcc] ss:$16 sps:$4 sm:$0xff]   ;;  %v7733_v46 = vld [vmem:[#allocation6 + $0xbc0] ss:$16 sps:$4 sm:$0xff]  }
 0x2b4   :  { %5780 = vmatprep.mubr.bf16.mxu1 %v8347_v26  ;;  %5406 = vmatprep.subr.bf16.mxu0 %v7657_v58  ;;  %v7673_v26 = vld [vmem:[#allocation6 + $0xa80] ss:$16 sps:$4 sm:$0xff]   ;;  %v7736_v58 = vld [vmem:[#allocation6 + $0xbc8] ss:$16 sps:$4 sm:$0xff]  }
 0x2b5   :  { %5750 = vmatprep.subr.bf16.mxu1 %v7660_v59  ;;  %v7741_v59 = vld [vmem:[#allocation6 + $0xbe4] ss:$16 sps:$4 sm:$0xff]  }
 0x2b6   :  { %5407 = vmatpush1.bf16.msra.mxu0 %v7655_v61  ;;  %v7744_v61 = vld [vmem:[#allocation6 + $0xbec] ss:$16 sps:$4 sm:$0xff]  }
 0x2b7   :  { %5751 = vmatpush1.bf16.msra.mxu1 %v7658_v24  ;;  %5408 = vmatprep.subr.bf16.mxu0 %v7663_v0  ;;  %v7739_v24 = vld [vmem:[#allocation6 + $0xbe0] ss:$16 sps:$4 sm:$0xff]   ;;  %v7742_v0 = vld [vmem:[#allocation6 + $0xbe8] ss:$16 sps:$4 sm:$0xff]  }
 0x2b8   :  { %5752 = vmatprep.subr.bf16.mxu1 %v7666_v7  ;;  %v7747_v7 = vld [vmem:[#allocation6 + $0xc04] ss:$16 sps:$4 sm:$0xff]  }
 0x2ba   :  { %5409 = vmatpush1.bf16.msra.mxu0 %v7661_v8  ;;  %v7750_v8 = vld [vmem:[#allocation6 + $0xc0c] ss:$16 sps:$4 sm:$0xff]  }
 0x2bb   :  { %5753 = vmatpush1.bf16.msra.mxu1 %v7664_v9  ;;  %5410 = vmatprep.subr.bf16.mxu0 %v7669_v11  ;;  %v7745_v9 = vld [vmem:[#allocation6 + $0xc00] ss:$16 sps:$4 sm:$0xff]   ;;  %v7748_v11 = vld [vmem:[#allocation6 + $0xc08] ss:$16 sps:$4 sm:$0xff]  }
 0x2bc   :  { %5754 = vmatprep.subr.bf16.mxu1 %v7672_v20  ;;  %v7753_v20 = vld [vmem:[#allocation6 + $0xc24] ss:$16 sps:$4 sm:$0xff]  }
 0x2be   :  { %5411 = vmatpush1.bf16.msra.mxu0 %v7667_v12  ;;  %v7756_v12 = vld [vmem:[#allocation6 + $0xc2c] ss:$16 sps:$4 sm:$0xff]  }
 0x2bf   :  { %5755 = vmatpush1.bf16.msra.mxu1 %v7670_v13  ;;  %5412 = vmatprep.subr.bf16.mxu0 %v7675_v14  ;;  %v7751_v13 = vld [vmem:[#allocation6 + $0xc20] ss:$16 sps:$4 sm:$0xff]   ;;  %v7754_v14 = vld [vmem:[#allocation6 + $0xc28] ss:$16 sps:$4 sm:$0xff]  }
 0x2c0   :  { %5756 = vmatprep.subr.bf16.mxu1 %v7678_v15  ;;  %v7759_v15 = vld [vmem:[#allocation6 + $0xc44] ss:$16 sps:$4 sm:$0xff]  }
 0x2c2   :  { %5413 = vmatpush1.bf16.msra.mxu0 %v7673_v26  ;;  %v7762_v26 = vld [vmem:[#allocation6 + $0xc4c] ss:$16 sps:$4 sm:$0xff]  }
 0x2c3   :  { %5757 = vmatpush1.bf16.msra.mxu1 %v7676_v16  ;;  %5414 = vmatprep.subr.bf16.mxu0 %v7681_v17  ;;  %v7757_v16 = vld [vmem:[#allocation6 + $0xc40] ss:$16 sps:$4 sm:$0xff]   ;;  %v7760_v17 = vld [vmem:[#allocation6 + $0xc48] ss:$16 sps:$4 sm:$0xff]  }
 0x2c4   :  { %5758 = vmatprep.subr.bf16.mxu1 %v7684_v18  ;;  %v7765_v18 = vld [vmem:[#allocation6 + $0xc64] ss:$16 sps:$4 sm:$0xff]  }
 0x2c6   :  { %5415 = vmatpush1.bf16.msra.mxu0 %v7679_v19  ;;  %v7763_v19 = vld [vmem:[#allocation6 + $0xc60] ss:$16 sps:$4 sm:$0xff]  }
 0x2c7   :  { %5759 = vmatpush1.bf16.msra.mxu1 %v7682_v21  ;;  %5416 = vmatprep.subr.bf16.mxu0 %v7687_v41  ;;  %v7766_v21 = vld [vmem:[#allocation6 + $0xc68] ss:$16 sps:$4 sm:$0xff]   ;;  %v7771_v41 = vld [vmem:[#allocation6 + $0xc84] ss:$16 sps:$4 sm:$0xff]  }
 0x2c8   :  { %5760 = vmatprep.subr.bf16.mxu1 %v7690_v25  ;;  %v7774_v25 = vld [vmem:[#allocation6 + $0xc8c] ss:$16 sps:$4 sm:$0xff]  }
 0x2ca   :  { %5417 = vmatpush1.bf16.msra.mxu0 %v7685_v23  ;;  %v7772_v23 = vld [vmem:[#allocation6 + $0xc88] ss:$16 sps:$4 sm:$0xff]  }
 0x2cb   :  { %5761 = vmatpush1.bf16.msra.mxu1 %v7688_v28  ;;  %5418 = vmatprep.subr.bf16.mxu0 %v7693_v29  ;;  %v7777_v28 = vld [vmem:[#allocation6 + $0xca4] ss:$16 sps:$4 sm:$0xff]   ;;  %v7780_v29 = vld [vmem:[#allocation6 + $0xcac] ss:$16 sps:$4 sm:$0xff]  }
 0x2cc   :  { %5762 = vmatprep.subr.bf16.mxu1 %v7696_v45  ;;  %v7775_v45 = vld [vmem:[#allocation6 + $0xca0] ss:$16 sps:$4 sm:$0xff]  }
 0x2ce   :  { %5419 = vmatpush1.bf16.msra.mxu0 %v7691_v30  ;;  %v7778_v30 = vld [vmem:[#allocation6 + $0xca8] ss:$16 sps:$4 sm:$0xff]  }
 0x2cf   :  { %5763 = vmatpush1.bf16.msra.mxu1 %v7694_v32  ;;  %5420 = vmatprep.subr.bf16.mxu0 %v7699_v35  ;;  %v7783_v32 = vld [vmem:[#allocation6 + $0xcc4] ss:$16 sps:$4 sm:$0xff]   ;;  %v7786_v35 = vld [vmem:[#allocation6 + $0xccc] ss:$16 sps:$4 sm:$0xff]  }
 0x2d0   :  { %5764 = vmatprep.subr.bf16.mxu1 %v7702_v36  ;;  %v7781_v36 = vld [vmem:[#allocation6 + $0xcc0] ss:$16 sps:$4 sm:$0xff]  }
 0x2d2   :  { %5421 = vmatpush1.bf16.msra.mxu0 %v7697_v38  ;;  %v7784_v38 = vld [vmem:[#allocation6 + $0xcc8] ss:$16 sps:$4 sm:$0xff]  }
 0x2d3   :  { %5765 = vmatpush1.bf16.msra.mxu1 %v7700_v31  ;;  %5422 = vmatprep.subr.bf16.mxu0 %v7705_v3  ;;  %v7789_v31 = vld [vmem:[#allocation6 + $0xce4] ss:$16 sps:$4 sm:$0xff]   ;;  %v7792_v3 = vld [vmem:[#allocation6 + $0xcec] ss:$16 sps:$4 sm:$0xff]  }
 0x2d4   :  { %5766 = vmatprep.subr.bf16.mxu1 %v7708_v39  ;;  %v7787_v39 = vld [vmem:[#allocation6 + $0xce0] ss:$16 sps:$4 sm:$0xff]  }
 0x2d6   :  { %5423 = vmatpush1.bf16.msra.mxu0 %v7703_v40  ;;  %v7790_v40 = vld [vmem:[#allocation6 + $0xce8] ss:$16 sps:$4 sm:$0xff]  }
 0x2d7   :  { %5767 = vmatpush1.bf16.msra.mxu1 %v7706_v42  ;;  %5424 = vmatprep.subr.bf16.mxu0 %v7711_v44  ;;  %v7795_v42 = vld [vmem:[#allocation6 + $0xd04] ss:$16 sps:$4 sm:$0xff]   ;;  %v7798_v44 = vld [vmem:[#allocation6 + $0xd0c] ss:$16 sps:$4 sm:$0xff]  }
 0x2d8   :  { %5768 = vmatprep.subr.bf16.mxu1 %v7714_v1  ;;  %v7793_v1 = vld [vmem:[#allocation6 + $0xd00] ss:$16 sps:$4 sm:$0xff]  }
 0x2da   :  { %5425 = vmatpush1.bf16.msra.mxu0 %v7709_v56  ;;  %v7796_v56 = vld [vmem:[#allocation6 + $0xd08] ss:$16 sps:$4 sm:$0xff]  }
 0x2db   :  { %5769 = vmatpush1.bf16.msra.mxu1 %v7712_v47  ;;  %5426 = vmatprep.subr.bf16.mxu0 %v7717_v48  ;;  %v7801_v47 = vld [vmem:[#allocation6 + $0xd24] ss:$16 sps:$4 sm:$0xff]   ;;  %v7804_v48 = vld [vmem:[#allocation6 + $0xd2c] ss:$16 sps:$4 sm:$0xff]  }
 0x2dc   :  { %5770 = vmatprep.subr.bf16.mxu1 %v7720_v2  ;;  %v7799_v2 = vld [vmem:[#allocation6 + $0xd20] ss:$16 sps:$4 sm:$0xff]  }
 0x2de   :  { %5427 = vmatpush1.bf16.msra.mxu0 %v7715_v49  ;;  %v7802_v49 = vld [vmem:[#allocation6 + $0xd28] ss:$16 sps:$4 sm:$0xff]  }
 0x2df   :  { %5771 = vmatpush1.bf16.msra.mxu1 %v7718_v50  ;;  %5428 = vmatprep.subr.bf16.mxu0 %v7723_v51  ;;  %v7807_v50 = vld [vmem:[#allocation6 + $0xd44] ss:$16 sps:$4 sm:$0xff]   ;;  %v7810_v51 = vld [vmem:[#allocation6 + $0xd4c] ss:$16 sps:$4 sm:$0xff]  }
 0x2e0   :  { %5772 = vmatprep.subr.bf16.mxu1 %v7726_v52  ;;  %v7805_v52 = vld [vmem:[#allocation6 + $0xd40] ss:$16 sps:$4 sm:$0xff]  }
 0x2e2   :  { %5429 = vmatpush1.bf16.msra.mxu0 %v7721_v6  ;;  %v7808_v6 = vld [vmem:[#allocation6 + $0xd48] ss:$16 sps:$4 sm:$0xff]  }
 0x2e3   :  { %5773 = vmatpush1.bf16.msra.mxu1 %v7724_v53  ;;  %5430 = vmatprep.subr.bf16.mxu0 %v7729_v54  ;;  %v7813_v53 = vld [vmem:[#allocation6 + $0xd64] ss:$16 sps:$4 sm:$0xff]   ;;  %v7816_v54 = vld [vmem:[#allocation6 + $0xd6c] ss:$16 sps:$4 sm:$0xff]  }
 0x2e4   :  { %5774 = vmatprep.subr.bf16.mxu1 %v7732_v55  ;;  %v7811_v55 = vld [vmem:[#allocation6 + $0xd60] ss:$16 sps:$4 sm:$0xff]  }
 0x2e6   :  { %5431 = vmatpush1.bf16.msra.mxu0 %v7727_v27  ;;  %v7814_v27 = vld [vmem:[#allocation6 + $0xd68] ss:$16 sps:$4 sm:$0xff]  }
 0x2e7   :  { %5775 = vmatpush1.bf16.msra.mxu1 %v7730_v57  ;;  %5432 = vmatprep.subr.bf16.mxu0 %v7735_v5  ;;  %v7819_v57 = vld [vmem:[#allocation6 + $0xd84] ss:$16 sps:$4 sm:$0xff]   ;;  %v7822_v5 = vld [vmem:[#allocation6 + $0xd8c] ss:$16 sps:$4 sm:$0xff]  }
 0x2e8   :  { %5776 = vmatprep.subr.bf16.mxu1 %v7738_v43  ;;  %v7817_v43 = vld [vmem:[#allocation6 + $0xd80] ss:$16 sps:$4 sm:$0xff]  }
 0x2ea   :  { %5433 = vmatpush1.bf16.msra.mxu0 %v7733_v46  ;;  %v7820_v46 = vld [vmem:[#allocation6 + $0xd88] ss:$16 sps:$4 sm:$0xff]  }
 0x2eb   :  { %5777 = vmatpush1.bf16.msra.mxu1 %v7736_v58  ;;  %5434 = vmatprep.subr.bf16.mxu0 %v7741_v59  ;;  %v7825_v58 = vld [vmem:[#allocation6 + $0xda4] ss:$16 sps:$4 sm:$0xff]   ;;  %v7828_v59 = vld [vmem:[#allocation6 + $0xdac] ss:$16 sps:$4 sm:$0xff]  }
 0x2ec   :  { %5778 = vmatprep.subr.bf16.mxu1 %v7744_v61  ;;  %v7823_v61 = vld [vmem:[#allocation6 + $0xda0] ss:$16 sps:$4 sm:$0xff]  }
 0x2ee   :  { %5435 = vmatpush1.bf16.msra.mxu0 %v7739_v24  ;;  %v7826_v24 = vld [vmem:[#allocation6 + $0xda8] ss:$16 sps:$4 sm:$0xff]  }
 0x2ef   :  { %5779 = vmatpush1.bf16.msra.mxu1 %v7742_v0  ;;  %5447 = vmatprep.subr.bf16.mxu0 %v7747_v7  ;;  %v7831_v0 = vld [vmem:[#allocation6 + $0xdc4] ss:$16 sps:$4 sm:$0xff]   ;;  %v7834_v7 = vld [vmem:[#allocation6 + $0xdcc] ss:$16 sps:$4 sm:$0xff]  }
 0x2f0   :  { %5791 = vmatprep.subr.bf16.mxu1 %v7750_v8  ;;  %v7829_v8 = vld [vmem:[#allocation6 + $0xdc0] ss:$16 sps:$4 sm:$0xff]  }
 0x2f1   :  { %5437 = vmatmul.mubr.bf16.vlgmr.msra.gmra.mrb[16].mxu0 %v8343_v22 }
 0x2f2   :  { %5781 = vmatmul.mubr.bf16.vlgmr.msra.gmra.mrb[16].mxu1 %v8343_v22  ;;  %5448 = vmatpush1.bf16.msra.mxu0 %v7745_v9  ;;  %v7768_v22 = vld [vmem:[#allocation6 + $0xc6c] ss:$16 sps:$4 sm:$0xff]   ;;  %v7832_v9 = vld [vmem:[#allocation6 + $0xdc8] ss:$16 sps:$4 sm:$0xff]  }
 0x2f3   :  { %5479 = vmatprep.mubr.bf16.mxu0 %v8369_v63  ;;  %5792 = vmatpush1.bf16.msra.mxu1 %v7748_v11  ;;  %v7837_v11 = vld [vmem:[#allocation6 + $0xde4] ss:$16 sps:$4 sm:$0xff]  }
 0x2f4   :  { %5823 = vmatprep.mubr.bf16.mxu1 %v8369_v63  ;;  %5449 = vmatprep.subr.bf16.mxu0 %v7753_v20  ;;  %v7769_v63 = vld [vmem:[#allocation6 + $0xc80] ss:$16 sps:$4 sm:$0xff]   ;;  %v7840_v20 = vld [vmem:[#allocation6 + $0xdec] ss:$16 sps:$4 sm:$0xff]  }
 0x2f5   :  { %5793 = vmatprep.subr.bf16.mxu1 %v7756_v12  ;;  %v7835_v12 = vld [vmem:[#allocation6 + $0xde0] ss:$16 sps:$4 sm:$0xff]  }
 0x2f6   :  { %5450 = vmatpush1.bf16.msra.mxu0 %v7751_v13  ;;  %v7838_v13 = vld [vmem:[#allocation6 + $0xde8] ss:$16 sps:$4 sm:$0xff]  }
 0x2f7   :  { %5794 = vmatpush1.bf16.msra.mxu1 %v7754_v14  ;;  %5451 = vmatprep.subr.bf16.mxu0 %v7759_v15  ;;  %v7843_v14 = vld [vmem:[#allocation6 + $0xe04] ss:$16 sps:$4 sm:$0xff]   ;;  %v7846_v15 = vld [vmem:[#allocation6 + $0xe0c] ss:$16 sps:$4 sm:$0xff]  }
 0x2f8   :  { %5795 = vmatprep.subr.bf16.mxu1 %v7762_v26  ;;  %v7841_v26 = vld [vmem:[#allocation6 + $0xe00] ss:$16 sps:$4 sm:$0xff]  }
 0x2fa   :  { %5452 = vmatpush1.bf16.msra.mxu0 %v7757_v16  ;;  %v7844_v16 = vld [vmem:[#allocation6 + $0xe08] ss:$16 sps:$4 sm:$0xff]  }
 0x2fb   :  { %5796 = vmatpush1.bf16.msra.mxu1 %v7760_v17  ;;  %5453 = vmatprep.subr.bf16.mxu0 %v7765_v18  ;;  %v7849_v17 = vld [vmem:[#allocation6 + $0xe24] ss:$16 sps:$4 sm:$0xff]   ;;  %v7852_v18 = vld [vmem:[#allocation6 + $0xe2c] ss:$16 sps:$4 sm:$0xff]  }
 0x2fc   :  { %5797 = vmatprep.subr.bf16.mxu1 %v7768_v22  ;;  %v7847_v22 = vld [vmem:[#allocation6 + $0xe20] ss:$16 sps:$4 sm:$0xff]  }
 0x2fe   :  { %5454 = vmatpush1.bf16.msra.mxu0 %v7763_v19  ;;  %v7850_v19 = vld [vmem:[#allocation6 + $0xe28] ss:$16 sps:$4 sm:$0xff]  }
 0x2ff   :  { %5798 = vmatpush1.bf16.msra.mxu1 %v7766_v21  ;;  %5455 = vmatprep.subr.bf16.mxu0 %v7771_v41  ;;  %v7855_v21 = vld [vmem:[#allocation6 + $0xe44] ss:$16 sps:$4 sm:$0xff]   ;;  %v7858_v41 = vld [vmem:[#allocation6 + $0xe4c] ss:$16 sps:$4 sm:$0xff]  }
 0x300   :  { %5799 = vmatprep.subr.bf16.mxu1 %v7774_v25  ;;  %v7853_v25 = vld [vmem:[#allocation6 + $0xe40] ss:$16 sps:$4 sm:$0xff]  }
 0x302   :  { %5456 = vmatpush1.bf16.msra.mxu0 %v7769_v63  ;;  %v7856_v63 = vld [vmem:[#allocation6 + $0xe48] ss:$16 sps:$4 sm:$0xff]  }
 0x303   :  { %5800 = vmatpush1.bf16.msra.mxu1 %v7772_v23  ;;  %5457 = vmatprep.subr.bf16.mxu0 %v7777_v28  ;;  %v7861_v23 = vld [vmem:[#allocation6 + $0xe64] ss:$16 sps:$4 sm:$0xff]   ;;  %v7859_v28 = vld [vmem:[#allocation6 + $0xe60] ss:$16 sps:$4 sm:$0xff]  }
 0x304   :  { %5801 = vmatprep.subr.bf16.mxu1 %v7780_v29  ;;  %v7862_v29 = vld [vmem:[#allocation6 + $0xe68] ss:$16 sps:$4 sm:$0xff]  }
 0x306   :  { %5458 = vmatpush1.bf16.msra.mxu0 %v7775_v45  ;;  %v7867_v45 = vld [vmem:[#allocation6 + $0xe84] ss:$16 sps:$4 sm:$0xff]  }
 0x307   :  { %5802 = vmatpush1.bf16.msra.mxu1 %v7778_v30  ;;  %5459 = vmatprep.subr.bf16.mxu0 %v7783_v32  ;;  %v7870_v30 = vld [vmem:[#allocation6 + $0xe8c] ss:$16 sps:$4 sm:$0xff]   ;;  %v7868_v32 = vld [vmem:[#allocation6 + $0xe88] ss:$16 sps:$4 sm:$0xff]  }
 0x308   :  { %5803 = vmatprep.subr.bf16.mxu1 %v7786_v35  ;;  %v7873_v35 = vld [vmem:[#allocation6 + $0xea4] ss:$16 sps:$4 sm:$0xff]  }
 0x30a   :  { %5460 = vmatpush1.bf16.msra.mxu0 %v7781_v36  ;;  %v7876_v36 = vld [vmem:[#allocation6 + $0xeac] ss:$16 sps:$4 sm:$0xff]  }
 0x30b   :  { %5804 = vmatpush1.bf16.msra.mxu1 %v7784_v38  ;;  %5461 = vmatprep.subr.bf16.mxu0 %v7789_v31  ;;  %v7871_v38 = vld [vmem:[#allocation6 + $0xea0] ss:$16 sps:$4 sm:$0xff]   ;;  %v7874_v31 = vld [vmem:[#allocation6 + $0xea8] ss:$16 sps:$4 sm:$0xff]  }
 0x30c   :  { %5805 = vmatprep.subr.bf16.mxu1 %v7792_v3  ;;  %v7879_v3 = vld [vmem:[#allocation6 + $0xec4] ss:$16 sps:$4 sm:$0xff]  }
 0x30e   :  { %5462 = vmatpush1.bf16.msra.mxu0 %v7787_v39  ;;  %v7882_v39 = vld [vmem:[#allocation6 + $0xecc] ss:$16 sps:$4 sm:$0xff]  }
 0x30f   :  { %5806 = vmatpush1.bf16.msra.mxu1 %v7790_v40  ;;  %5463 = vmatprep.subr.bf16.mxu0 %v7795_v42  ;;  %v7877_v40 = vld [vmem:[#allocation6 + $0xec0] ss:$16 sps:$4 sm:$0xff]   ;;  %v7880_v42 = vld [vmem:[#allocation6 + $0xec8] ss:$16 sps:$4 sm:$0xff]  }
 0x310   :  { %5807 = vmatprep.subr.bf16.mxu1 %v7798_v44  ;;  %v7885_v44 = vld [vmem:[#allocation6 + $0xee4] ss:$16 sps:$4 sm:$0xff]  }
 0x312   :  { %5464 = vmatpush1.bf16.msra.mxu0 %v7793_v1  ;;  %v7888_v1 = vld [vmem:[#allocation6 + $0xeec] ss:$16 sps:$4 sm:$0xff]  }
 0x313   :  { %5808 = vmatpush1.bf16.msra.mxu1 %v7796_v56  ;;  %5465 = vmatprep.subr.bf16.mxu0 %v7801_v47  ;;  %v7883_v56 = vld [vmem:[#allocation6 + $0xee0] ss:$16 sps:$4 sm:$0xff]   ;;  %v7886_v47 = vld [vmem:[#allocation6 + $0xee8] ss:$16 sps:$4 sm:$0xff]  }
 0x314   :  { %5809 = vmatprep.subr.bf16.mxu1 %v7804_v48  ;;  %v7891_v48 = vld [vmem:[#allocation6 + $0xf04] ss:$16 sps:$4 sm:$0xff]  }
 0x316   :  { %5466 = vmatpush1.bf16.msra.mxu0 %v7799_v2  ;;  %v7894_v2 = vld [vmem:[#allocation6 + $0xf0c] ss:$16 sps:$4 sm:$0xff]  }
 0x317   :  { %5810 = vmatpush1.bf16.msra.mxu1 %v7802_v49  ;;  %5467 = vmatprep.subr.bf16.mxu0 %v7807_v50  ;;  %v7889_v49 = vld [vmem:[#allocation6 + $0xf00] ss:$16 sps:$4 sm:$0xff]   ;;  %v7892_v50 = vld [vmem:[#allocation6 + $0xf08] ss:$16 sps:$4 sm:$0xff]  }
 0x318   :  { %5811 = vmatprep.subr.bf16.mxu1 %v7810_v51  ;;  %v7897_v51 = vld [vmem:[#allocation6 + $0xf24] ss:$16 sps:$4 sm:$0xff]  }
 0x31a   :  { %5468 = vmatpush1.bf16.msra.mxu0 %v7805_v52  ;;  %v7900_v52 = vld [vmem:[#allocation6 + $0xf2c] ss:$16 sps:$4 sm:$0xff]  }
 0x31b   :  { %5812 = vmatpush1.bf16.msra.mxu1 %v7808_v6  ;;  %5469 = vmatprep.subr.bf16.mxu0 %v7813_v53  ;;  %v7895_v6 = vld [vmem:[#allocation6 + $0xf20] ss:$16 sps:$4 sm:$0xff]   ;;  %v7898_v53 = vld [vmem:[#allocation6 + $0xf28] ss:$16 sps:$4 sm:$0xff]  }
 0x31c   :  { %5813 = vmatprep.subr.bf16.mxu1 %v7816_v54  ;;  %v7903_v54 = vld [vmem:[#allocation6 + $0xf44] ss:$16 sps:$4 sm:$0xff]  }
 0x31e   :  { %5470 = vmatpush1.bf16.msra.mxu0 %v7811_v55  ;;  %v7906_v55 = vld [vmem:[#allocation6 + $0xf4c] ss:$16 sps:$4 sm:$0xff]  }
 0x31f   :  { %5814 = vmatpush1.bf16.msra.mxu1 %v7814_v27  ;;  %5471 = vmatprep.subr.bf16.mxu0 %v7819_v57  ;;  %v7901_v27 = vld [vmem:[#allocation6 + $0xf40] ss:$16 sps:$4 sm:$0xff]   ;;  %v7904_v57 = vld [vmem:[#allocation6 + $0xf48] ss:$16 sps:$4 sm:$0xff]  }
 0x320   :  { %5815 = vmatprep.subr.bf16.mxu1 %v7822_v5  ;;  %v7909_v5 = vld [vmem:[#allocation6 + $0xf64] ss:$16 sps:$4 sm:$0xff]  }
 0x322   :  { %5472 = vmatpush1.bf16.msra.mxu0 %v7817_v43  ;;  %v7912_v43 = vld [vmem:[#allocation6 + $0xf6c] ss:$16 sps:$4 sm:$0xff]  }
 0x323   :  { %5816 = vmatpush1.bf16.msra.mxu1 %v7820_v46  ;;  %5473 = vmatprep.subr.bf16.mxu0 %v7825_v58  ;;  %v7907_v46 = vld [vmem:[#allocation6 + $0xf60] ss:$16 sps:$4 sm:$0xff]   ;;  %v7910_v58 = vld [vmem:[#allocation6 + $0xf68] ss:$16 sps:$4 sm:$0xff]  }
 0x324   :  { %5817 = vmatprep.subr.bf16.mxu1 %v7828_v59  ;;  %v7915_v59 = vld [vmem:[#allocation6 + $0xf84] ss:$16 sps:$4 sm:$0xff]  }
 0x326   :  { %5474 = vmatpush1.bf16.msra.mxu0 %v7823_v61  ;;  %v7918_v61 = vld [vmem:[#allocation6 + $0xf8c] ss:$16 sps:$4 sm:$0xff]  }
 0x327   :  { %5818 = vmatpush1.bf16.msra.mxu1 %v7826_v24  ;;  %5475 = vmatprep.subr.bf16.mxu0 %v7831_v0  ;;  %v7913_v24 = vld [vmem:[#allocation6 + $0xf80] ss:$16 sps:$4 sm:$0xff]   ;;  %v7916_v0 = vld [vmem:[#allocation6 + $0xf88] ss:$16 sps:$4 sm:$0xff]  }
 0x328   :  { %5819 = vmatprep.subr.bf16.mxu1 %v7834_v7  ;;  %v7921_v7 = vld [vmem:[#allocation6 + $0xfa4] ss:$16 sps:$4 sm:$0xff]  }
 0x32a   :  { %5476 = vmatpush1.bf16.msra.mxu0 %v7829_v8  ;;  %v7924_v8 = vld [vmem:[#allocation6 + $0xfac] ss:$16 sps:$4 sm:$0xff]  }
 0x32b   :  { %5820 = vmatpush1.bf16.msra.mxu1 %v7832_v9  ;;  %5477 = vmatprep.subr.bf16.mxu0 %v7837_v11  ;;  %v7919_v9 = vld [vmem:[#allocation6 + $0xfa0] ss:$16 sps:$4 sm:$0xff]   ;;  %v7922_v11 = vld [vmem:[#allocation6 + $0xfa8] ss:$16 sps:$4 sm:$0xff]  }
 0x32c   :  { %5821 = vmatprep.subr.bf16.mxu1 %v7840_v20  ;;  %v7927_v20 = vld [vmem:[#allocation6 + $0xfc4] ss:$16 sps:$4 sm:$0xff]  }
 0x32e   :  { %5478 = vmatpush1.bf16.msra.mxu0 %v7835_v12  ;;  %v7930_v12 = vld [vmem:[#allocation6 + $0xfcc] ss:$16 sps:$4 sm:$0xff]  }
 0x32f   :  { %5822 = vmatpush1.bf16.msra.mxu1 %v7838_v13  ;;  %5490 = vmatprep.subr.bf16.mxu0 %v7843_v14  ;;  %v7925_v13 = vld [vmem:[#allocation6 + $0xfc0] ss:$16 sps:$4 sm:$0xff]   ;;  %v7928_v14 = vld [vmem:[#allocation6 + $0xfc8] ss:$16 sps:$4 sm:$0xff]  }
 0x330   :  { %5834 = vmatprep.subr.bf16.mxu1 %v7846_v15  ;;  %v7933_v15 = vld [vmem:[#allocation6 + $0xfe4] ss:$16 sps:$4 sm:$0xff]  }
 0x331   :  { %5480 = vmatmul.mubr.bf16.vlgmr.msra.gmra.mrb[16].mxu0 %v8365_v60 }
 0x332   :  { %5824 = vmatmul.mubr.bf16.vlgmr.msra.gmra.mrb[16].mxu1 %v8365_v60  ;;  %5491 = vmatpush1.bf16.msra.mxu0 %v7841_v26  ;;  %v7864_v60 = vld [vmem:[#allocation6 + $0xe6c] ss:$16 sps:$4 sm:$0xff]  }
 0x333   :  { %5522 = vmatprep.mubr.bf16.mxu0 %v8371_v4  ;;  %5835 = vmatpush1.bf16.msra.mxu1 %v7844_v16  ;;  %v7936_v26 = vld [vmem:[#allocation6 + $0xfec] ss:$16 sps:$4 sm:$0xff]   ;;  %v7931_v16 = vld [vmem:[#allocation6 + $0xfe0] ss:$16 sps:$4 sm:$0xff]  }
 0x334   :  { %5866 = vmatprep.mubr.bf16.mxu1 %v8371_v4  ;;  %5492 = vmatprep.subr.bf16.mxu0 %v7849_v17  ;;  %v7865_v4 = vld [vmem:[#allocation6 + $0xe80] ss:$16 sps:$4 sm:$0xff]   ;;  %v7934_v17 = vld [vmem:[#allocation6 + $0xfe8] ss:$16 sps:$4 sm:$0xff]  }
 0x335   :  { %5836 = vmatprep.subr.bf16.mxu1 %v7852_v18  ;;  %v7937_v18 = vld [vmem:[#allocation9 + $0x40] sm:$0xff]  }
 0x336   :  { %5493 = vmatpush1.bf16.msra.mxu0 %v7847_v22  ;;  %v7938_v22 = vld [vmem:[#allocation9 + $0xc0] sm:$0xff]  }
 0x337   :  { %5837 = vmatpush1.bf16.msra.mxu1 %v7850_v19  ;;  %5494 = vmatprep.subr.bf16.mxu0 %v7855_v21  ;;  %v7939_v19 = vld [vmem:[#allocation9] sm:$0xff]  }
 0x338   :  { %5838 = vmatprep.subr.bf16.mxu1 %v7858_v41  ;;  %v7940_v21 = vld [vmem:[#allocation9 + $0x80] sm:$0xff]   ;;  %v7941_v41 = vld [vmem:[#allocation9 + $0x48] sm:$0xff]  }
 0x33a   :  { %5495 = vmatpush1.bf16.msra.mxu0 %v7853_v25  ;;  %v7942_v25 = vld [vmem:[#allocation9 + $0xc8] sm:$0xff]  }
 0x33b   :  { %5839 = vmatpush1.bf16.msra.mxu1 %v7856_v63  ;;  %5496 = vmatprep.subr.bf16.mxu0 %v7861_v23  ;;  %v7943_v63 = vld [vmem:[#allocation9 + $0x8] sm:$0xff]  }
 0x33c   :  { %5840 = vmatprep.subr.bf16.mxu1 %v7864_v60  ;;  %v7944_v23 = vld [vmem:[#allocation9 + $0x88] sm:$0xff]   ;;  %v7945_v60 = vld [vmem:[#allocation9 + $0x50] sm:$0xff]  }
 0x33e   :  { %5497 = vmatpush1.bf16.msra.mxu0 %v7859_v28  ;;  %v7946_v28 = vld [vmem:[#allocation9 + $0xd0] sm:$0xff]  }
 0x33f   :  { %5841 = vmatpush1.bf16.msra.mxu1 %v7862_v29  ;;  %5498 = vmatprep.subr.bf16.mxu0 %v7867_v45  ;;  %v7947_v29 = vld [vmem:[#allocation9 + $0x10] sm:$0xff]  }
 0x340   :  { %5842 = vmatprep.subr.bf16.mxu1 %v7870_v30  ;;  %v7948_v45 = vld [vmem:[#allocation9 + $0x90] sm:$0xff]   ;;  %v7949_v30 = vld [vmem:[#allocation9 + $0x58] sm:$0xff]  }
 0x342   :  { %5499 = vmatpush1.bf16.msra.mxu0 %v7865_v4  ;;  %v7950_v4 = vld [vmem:[#allocation9 + $0xd8] sm:$0xff]  }
 0x343   :  { %5843 = vmatpush1.bf16.msra.mxu1 %v7868_v32  ;;  %5500 = vmatprep.subr.bf16.mxu0 %v7873_v35  ;;  %v7951_v32 = vld [vmem:[#allocation9 + $0x18] sm:$0xff]   ;;  %v7953_v35 = vld [vmem:[#allocation9 + $0x60] sm:$0xff]  }
 0x344   :  { %5844 = vmatprep.subr.bf16.mxu1 %v7876_v36  ;;  %v7954_v36 = vld [vmem:[#allocation9 + $0xe0] sm:$0xff]  }
 0x346   :  { %5501 = vmatpush1.bf16.msra.mxu0 %v7871_v38  ;;  %v7955_v38 = vld [vmem:[#allocation9 + $0x20] sm:$0xff]  }
 0x347   :  { %5845 = vmatpush1.bf16.msra.mxu1 %v7874_v31  ;;  %5502 = vmatprep.subr.bf16.mxu0 %v7879_v3  ;;  %v7956_v31 = vld [vmem:[#allocation9 + $0xa0] sm:$0xff]   ;;  %v7957_v3 = vld [vmem:[#allocation9 + $0x68] sm:$0xff]  }
 0x348   :  { %5846 = vmatprep.subr.bf16.mxu1 %v7882_v39  ;;  %v7958_v39 = vld [vmem:[#allocation9 + $0xe8] sm:$0xff]  }
 0x34a   :  { %5503 = vmatpush1.bf16.msra.mxu0 %v7877_v40  ;;  %v7959_v40 = vld [vmem:[#allocation9 + $0x28] sm:$0xff]  }
 0x34b   :  { %5847 = vmatpush1.bf16.msra.mxu1 %v7880_v42  ;;  %5504 = vmatprep.subr.bf16.mxu0 %v7885_v44  ;;  %v7960_v42 = vld [vmem:[#allocation9 + $0xa8] sm:$0xff]   ;;  %v7961_v44 = vld [vmem:[#allocation9 + $0x70] sm:$0xff]  }
 0x34c   :  { %5848 = vmatprep.subr.bf16.mxu1 %v7888_v1  ;;  %v7962_v1 = vld [vmem:[#allocation9 + $0xf0] sm:$0xff]  }
 0x34e   :  { %5505 = vmatpush1.bf16.msra.mxu0 %v7883_v56  ;;  %v7963_v56 = vld [vmem:[#allocation9 + $0x30] sm:$0xff]  }
 0x34f   :  { %5849 = vmatpush1.bf16.msra.mxu1 %v7886_v47  ;;  %5506 = vmatprep.subr.bf16.mxu0 %v7891_v48  ;;  %v7964_v47 = vld [vmem:[#allocation9 + $0xb0] sm:$0xff]   ;;  %v7965_v48 = vld [vmem:[#allocation9 + $0x78] sm:$0xff]  }
 0x350   :  { %5850 = vmatprep.subr.bf16.mxu1 %v7894_v2  ;;  %v7966_v2 = vld [vmem:[#allocation9 + $0xf8] sm:$0xff]  }
 0x352   :  { %5507 = vmatpush1.bf16.msra.mxu0 %v7889_v49  ;;  %v7967_v49 = vld [vmem:[#allocation9 + $0x38] sm:$0xff]  }
 0x353   :  { %5851 = vmatpush1.bf16.msra.mxu1 %v7892_v50  ;;  %5508 = vmatprep.subr.bf16.mxu0 %v7897_v51  ;;  %v7968_v50 = vld [vmem:[#allocation9 + $0xb8] sm:$0xff]  }
 0x354   :  { %5852 = vmatprep.subr.bf16.mxu1 %v7900_v52  ;;  %v2607_v51 = vld [vmem:[#allocation7] sm:$0xf] }
 0x355   :  { %v2612_v52 = vrot.slane %v2607_v51, %v8274_v33 }
 0x356   :  { %5509 = vmatpush1.bf16.msra.mxu0 %v7895_v6  ;;  %v2620_v6 = vrot.slane %v2607_v51, %v8277_v10 }
 0x357   :  { %5853 = vmatpush1.bf16.msra.mxu1 %v7898_v53  ;;  %5510 = vmatprep.subr.bf16.mxu0 %v7903_v54  ;;  %v2616_v53 = vrot.slane %v2607_v51, %v8283_v37  ;;  %v2624_v54 = vrot.slane %v2607_v51, %v8280_v34 }
 0x358   :  { %5854 = vmatprep.subr.bf16.mxu1 %v7906_v55 }
 0x35a   :  { %5511 = vmatpush1.bf16.msra.mxu0 %v7901_v27 }
 0x35b   :  { %5855 = vmatpush1.bf16.msra.mxu1 %v7904_v57  ;;  %5512 = vmatprep.subr.bf16.mxu0 %v7909_v5 }
 0x35c   :  { %5856 = vmatprep.subr.bf16.mxu1 %v7912_v43 }
 0x35e   :  { %5513 = vmatpush1.bf16.msra.mxu0 %v7907_v46 }
 0x35f   :  { %5857 = vmatpush1.bf16.msra.mxu1 %v7910_v58  ;;  %5514 = vmatprep.subr.bf16.mxu0 %v7915_v59 }
 0x360   :  { %5858 = vmatprep.subr.bf16.mxu1 %v7918_v61 }
 0x362   :  { %5515 = vmatpush1.bf16.msra.mxu0 %v7913_v24 }
 0x363   :  { %5859 = vmatpush1.bf16.msra.mxu1 %v7916_v0  ;;  %5516 = vmatprep.subr.bf16.mxu0 %v7921_v7 }
 0x364   :  { %5860 = vmatprep.subr.bf16.mxu1 %v7924_v8 }
 0x366   :  { %5517 = vmatpush1.bf16.msra.mxu0 %v7919_v9 }
 0x367   :  { %5861 = vmatpush1.bf16.msra.mxu1 %v7922_v11  ;;  %5518 = vmatprep.subr.bf16.mxu0 %v7927_v20 }
 0x368   :  { %5862 = vmatprep.subr.bf16.mxu1 %v7930_v12 }
 0x36a   :  { %5519 = vmatpush1.bf16.msra.mxu0 %v7925_v13 }
 0x36b   :  { %5863 = vmatpush1.bf16.msra.mxu1 %v7928_v14  ;;  %5520 = vmatprep.subr.bf16.mxu0 %v7933_v15 }
 0x36c   :  { %5864 = vmatprep.subr.bf16.mxu1 %v7936_v26 }
 0x36e   :  { %5521 = vmatpush1.bf16.msra.mxu0 %v7931_v16 }
 0x36f   :  { %5865 = vmatpush1.bf16.msra.mxu1 %v7934_v17  ;;  %7047 = vmatprep.subr.bf16.mxu0 %v7937_v18 }
 0x370   :  { %7069 = vmatprep.subr.bf16.mxu1 %v7938_v22 }
 0x371   :  { %5523 = vmatmul.mubr.bf16.vlgmr.msra.gmra.mrb[16].mxu0 %v8367_v62 }
 0x372   :  { %5867 = vmatmul.mubr.bf16.vlgmr.msra.gmra.mrb[16].mxu1 %v8367_v62  ;;  %7048 = vmatpush3.bf16.msra.mxu0 %v7939_v19  ;;  %v7952_v62 = vld [vmem:[#allocation9 + $0x98] sm:$0xff]  }
 0x373   :  { %7070 = vmatpush3.bf16.msra.mxu1 %v7940_v21  ;;  %7049 = vmatprep.subr.bf16.mxu0 %v7941_v41  ;;  %v7014_v21 = vld [vmem:[#allocation10] ss:$0 sm:$0xff] }
 0x374   :  { %7071 = vmatprep.subr.bf16.mxu1 %v7942_v25 }
 0x376   :  { %7050 = vmatpush3.bf16.msra.mxu0 %v7943_v63 }
 0x377   :  { %7072 = vmatpush3.bf16.msra.mxu1 %v7944_v23  ;;  %7051 = vmatprep.subr.bf16.mxu0 %v7945_v60 }
 0x378   :  { %7073 = vmatprep.subr.bf16.mxu1 %v7946_v28 }
 0x37a   :  { %7052 = vmatpush3.bf16.msra.mxu0 %v7947_v29 }
 0x37b   :  { %7074 = vmatpush3.bf16.msra.mxu1 %v7948_v45  ;;  %7053 = vmatprep.subr.bf16.mxu0 %v7949_v30 }
 0x37c   :  { %7075 = vmatprep.subr.bf16.mxu1 %v7950_v4 }
 0x37e   :  { %7054 = vmatpush3.bf16.msra.mxu0 %v7951_v32 }
 0x37f   :  { %7076 = vmatpush3.bf16.msra.mxu1 %v7952_v62  ;;  %7055 = vmatprep.subr.bf16.mxu0 %v7953_v35 }
 0x380   :  { %7077 = vmatprep.subr.bf16.mxu1 %v7954_v36 }
 0x382   :  { %7056 = vmatpush3.bf16.msra.mxu0 %v7955_v38 }
 0x383   :  { %7078 = vmatpush3.bf16.msra.mxu1 %v7956_v31  ;;  %7057 = vmatprep.subr.bf16.mxu0 %v7957_v3 }
 0x384   :  { %7079 = vmatprep.subr.bf16.mxu1 %v7958_v39 }
 0x386   :  { %7058 = vmatpush3.bf16.msra.mxu0 %v7959_v40 }
 0x387   :  { %7080 = vmatpush3.bf16.msra.mxu1 %v7960_v42  ;;  %7059 = vmatprep.subr.bf16.mxu0 %v7961_v44 }
 0x388   :  { %7081 = vmatprep.subr.bf16.mxu1 %v7962_v1 }
 0x38a   :  { %7060 = vmatpush3.bf16.msra.mxu0 %v7963_v56 }
 0x38b   :  { %7082 = vmatpush3.bf16.msra.mxu1 %v7964_v47  ;;  %7061 = vmatprep.subr.bf16.mxu0 %v7965_v48 }
 0x38c   :  { %7083 = vmatprep.subr.bf16.mxu1 %v7966_v2 }
 0x38e   :  { %7062 = vmatpush3.bf16.msra.mxu0 %v7967_v49 }
 0x38f   :  { %7084 = vmatpush3.bf16.msra.mxu1 %v7968_v50 }
 0x444   :  { %v5524_v55 = vpop.f32.mrb[16].mxu0 }
 0x445   :  { %v7091_v27 = vadd.f32 %v5524_v55, %v2612_v52  ;;  %v5868_v57 = vpop.f32.mrb[16].mxu1  ;;  %v5526_v5 = vpop.f32.mrb[17].mxu0 }
 0x446   :  { %v7095_v43 = vadd.f32 %v5868_v57, %v2620_v6  ;;  %v7092_v46 = vadd.f32 %v5526_v5, %v2616_v53  ;;  %v5870_v58 = vpop.f32.mrb[17].mxu1  ;;  %v5528_v59 = vpop.f32.mrb[18].mxu0 }
 0x447   :  { %v7096_v61 = vadd.f32 %v5870_v58, %v2624_v54  ;;  %v7093_v24 = vadd.f32 %v5528_v59, %v2612_v52  ;;  %v5872_v0 = vpop.f32.mrb[18].mxu1  ;;  %v5530_v7 = vpop.f32.mrb[19].mxu0  ;;  %v5877_v10 = vmax.f32 %v7091_v27, 0.0 }
 0x448   :  { %v7097_v8 = vadd.f32 %v5872_v0, %v2620_v6  ;;  %v7094_v33 = vadd.f32 %v5530_v7, %v2616_v53  ;;  %v5874_v9 = vpop.f32.mrb[19].mxu1  ;;  %v5879_v20 = vmax.f32 %v7095_v43, 0.0  ;;  %v5878_v34 = vmax.f32 %v7092_v46, 0.0 }
 0x449   :  { %v5881_v11 = vmax.f32 %v7093_v24, 0.0  ;;  %v7098_v37 = vadd.f32 %v5874_v9, %v2624_v54  ;;  %v5880_v14 = vmax.f32 %v7096_v61, 0.0 }
 0x44a   :  { %v5883_v12 = vmax.f32 %v7097_v8, 0.0  ;;  %v5882_v13 = vmax.f32 %v7094_v33, 0.0 }
 0x44b   :  { %v5885_v15 = vpack.c.bf16 %v5881_v11, %v5877_v10  ;;  %v5884_v26 = vmax.f32 %v7098_v37, 0.0 }
 0x44c   :  { %v5887_v16 = vpack.c.bf16 %v5883_v12, %v5879_v20  ;;  %v5886_v17 = vpack.c.bf16 %v5882_v13, %v5878_v34 }
 0x44d   :  { %v5888_v18 = vpack.c.bf16 %v5884_v26, %v5880_v14 }
 0x44e   :  { %6184 = vmatprep.mubr.bf16.mxu0 %v5886_v17 }
 0x44f   :  { %6225 = vmatprep.mubr.bf16.mxu1 %v5888_v18  ;;  %6185 = vmatmul.mubr.bf16.vlgmr.msra.gmra.mrb[20].mxu0 %v5885_v15 }
 0x450   :  { %6226 = vmatmul.mubr.bf16.vlgmr.msra.gmra.mrb[20].mxu1 %v5887_v16 }
 0x522   :  { %v7063_v22 = vpop.f32.mrb[20].mxu0 }
 0x523   :  { %v7085_v19 = vpop.f32.mrb[20].mxu1  ;;  %v7064_v41 = vpop.f32.mrb[21].mxu0 }
 0x524   :  { %v7065_v25 = vadd.f32 %v7064_v41, %v7063_v22  ;;  %v7086_v63 = vpop.f32.mrb[21].mxu1  ;;  %v7066_v23 = vpop.f32.mrb[22].mxu0 }
 0x525   :  { %v7087_v60 = vadd.f32 %v7086_v63, %v7085_v19  ;;  %v7088_v28 = vpop.f32.mrb[22].mxu1  ;;  %v7067_v29 = vpop.f32.mrb[23].mxu0 }
 0x526   :  { %v6187_v45 = vadd.f32 %v7065_v25, %v7014_v21  ;;  %v7068_v30 = vadd.f32 %v7067_v29, %v7066_v23  ;;  %v7089_v4 = vpop.f32.mrb[23].mxu1 }
 0x527   :  { %v7090_v32 = vadd.f32 %v7089_v4, %v7088_v28 }
 0x528   :  { %v6228_v62 = vadd.f32 %v7087_v60, %v6187_v45  ;;  %v6190_v35 = vadd.f32 %v7068_v30, %v7014_v21 }
 0x52a   :  { %6234 = vst [vmem:[%s8408_s7] sm:$0xff] %v6228_v62  ;;  %v6231_v36 = vadd.f32 %v7090_v32, %v6190_v35 }
 0x52c   :  { %6235 = vst [vmem:[%s8408_s7 + $0x8] sm:$0xff] %v6231_v36 }
 0x52d   :  { %6240 = vsyncpa [#allocation3], 1 }
 0x52e   :  { %6241 = vsyncpa [#allocation5], 1 }
 0x52f   :  { %6242 = vsyncpa [#allocation8], 1 }
 0x530   :  { %6243 = vsyncpa [#allocation11], 1 }

</bundles_post_ra>
